<compile_context>
chip_gen: v7x
topology: tpu7x:2x2x1
jax: 0.10.0
libtpu: 0.0.40
codegen_flags: <defaults>
</compile_context>

<pallas_src>
import functools

import jax
import jax.numpy as jnp
from jax import lax
from jax.experimental import pallas as pl
from jax.experimental.pallas import tpu as pltpu

HIDDEN = 128            # channel width of the first conv in each head
N_FUSED = 2 * HIDDEN    # pose and conf heads fused along N
ROW_TILE = 32           # output rows per grid step (capped at H)


def _head_kernel(band_ref, w1_ref, b1_ref, w2_ref, b2_ref, out_ref, *,
                 wp2, m_out):
    """One (batch, row-band) tile.

    band_ref : ((TR+3)*(W+2), C)  bf16   padded NHWC rows, spatially flattened
    w1_ref   : (9, C, 256)        bf16   fused pose||conf 3x3 conv weights
    b1_ref   : (1, 256)           f32
    w2_ref   : (256, 8)           f32    block-diagonal fused 1x1 conv weights
    b2_ref   : (1, 8)             f32
    out_ref  : (TR*(W+2), 8)      f32    [quat(4) | trans(3) | conf(1)]
    """
    # 3x3 conv == 9 shifted matmuls against the halo band (im2col happens only
    # as cheap VMEM re-reads; nothing is expanded in HBM).  Shift (dy, dx)
    # starts at flattened row dy*(W+2) + dx.
    acc = None
    for k in range(9):
        dy, dx = k // 3, k % 3
        x = band_ref[pl.ds(dy * wp2 + dx, m_out), :]           # (m_out, C) bf16
        part = jnp.dot(x, w1_ref[k], preferred_element_type=jnp.float32)
        acc = part if acc is None else acc + part
    hid = jnp.maximum(acc + b1_ref[...], 0.0)                  # ReLU, f32

    raw = jnp.dot(hid, w2_ref[...],
                  preferred_element_type=jnp.float32) + b2_ref[...]

    col = lax.broadcasted_iota(jnp.int32, raw.shape, 1)        # (m_out, 8)
    # F.normalize(dim=1, eps=1e-12): clamp squared norm at eps^2, use rsqrt.
    sumsq = jnp.sum(jnp.where(col < 4, raw * raw, 0.0), axis=-1, keepdims=True)
    inv_norm = lax.rsqrt(jnp.maximum(sumsq, 1e-24))
    scaled = raw * jnp.where(col < 4, inv_norm, 1.0)           # quat cols scaled
    out_ref[...] = jnp.where(col == 7, jax.nn.sigmoid(raw), scaled)


@jax.jit
def cosypose_detection_head(feat_map, params):
    """feat_map: (B, C, H, W) float32, PyTorch NCHW convention."""
    B, C, H, W = feat_map.shape
    TR = min(H, ROW_TILE)                 # output rows per tile
    nJ = -(-H // TR)                      # row-bands per image
    H_pad = nJ * TR
    Wp2 = W + 2
    M_IN = (TR + 3) * Wp2                 # 2 halo rows + 1 wrap row, flattened
    M_OUT = TR * Wp2                      # includes 2 garbage edge columns

    # Layout plumbing stays in XLA: NCHW -> NHWC, bf16 cast, spatial zero pad,
    # and overlapping row-bands (only 3/TR of the rows get duplicated).
    x = jnp.transpose(feat_map, (0, 2, 3, 1)).astype(jnp.bfloat16)  # (B,H,W,C)
    xp = jnp.pad(x, ((0, 0), (1, H_pad - H + 2), (1, 1), (0, 0)))
    bands = jnp.stack([xp[:, j * TR:j * TR + TR + 3] for j in range(nJ)],
                      axis=1)                                   # (B,nJ,TR+3,W+2,C)
    bands = bands.reshape(B * nJ, M_IN, C)

    kern = functools.partial(_head_kernel, wp2=Wp2, m_out=M_OUT)

    flops = 2 * B * nJ * M_OUT * (9 * C * N_FUSED + N_FUSED * 8)
    bytes_accessed = (bands.size * 2 + B * nJ * M_OUT * 8 * 4
                      + 9 * C * N_FUSED * 2 + N_FUSED * 8 * 4)

    grid_spec = pltpu.PrefetchScalarGridSpec(
        num_scalar_prefetch=0,
        grid=(B * nJ,),
        in_specs=[
            pl.BlockSpec((None, M_IN, C), lambda i: (i, 0, 0)),
            pl.BlockSpec((9, C, N_FUSED), lambda i: (0, 0, 0)),
            pl.BlockSpec((1, N_FUSED), lambda i: (0, 0)),
            pl.BlockSpec((N_FUSED, 8), lambda i: (0, 0)),
            pl.BlockSpec((1, 8), lambda i: (0, 0)),
        ],
        out_specs=pl.BlockSpec((None, M_OUT, 8), lambda i: (i, 0, 0)),
    )

    out_flat = pl.pallas_call(
        kern,
        out_shape=jax.ShapeDtypeStruct((B * nJ, M_OUT, 8), jnp.float32),
        grid_spec=grid_spec,
        compiler_params=pltpu.CompilerParams(
            dimension_semantics=("parallel",)),   # shards bands across TCs
        cost_estimate=pl.CostEstimate(
            flops=flops,
            transcendentals=2 * B * nJ * M_OUT,
            bytes_accessed=bytes_accessed),
    )(bands, params["w1"], params["b1"], params["w2"], params["b2"])

    # Back to the PyTorch output convention; drop padded rows / edge columns.
    out = out_flat.reshape(B, nJ, TR, Wp2, 8)[:, :, :, :W, :]
    out = out.reshape(B, H_pad, W, 8)[:, :H]
    quat = jnp.transpose(out[..., 0:4], (0, 3, 1, 2))           # (B, 4, H, W)
    trans = jnp.transpose(out[..., 4:7], (0, 3, 1, 2))          # (B, 3, H, W)
    conf = out[..., 7]                                          # (B, H, W)
    return quat, trans, conf


def init_params(key, feature_dim):
    """Deterministic synthetic init (torch OIHW layout -> fused kernel layout)."""
    ks = jax.random.split(key, 8)
    sc = 0.1
    w1p = sc * jax.random.normal(ks[0], (HIDDEN, feature_dim, 3, 3), jnp.float32)
    b1p = sc * jax.random.normal(ks[1], (HIDDEN,), jnp.float32)
    w2p = sc * jax.random.normal(ks[2], (7, HIDDEN, 1, 1), jnp.float32)
    b2p = sc * jax.random.normal(ks[3], (7,), jnp.float32)
    w1c = sc * jax.random.normal(ks[4], (HIDDEN, feature_dim, 3, 3), jnp.float32)
    b1c = sc * jax.random.normal(ks[5], (HIDDEN,), jnp.float32)
    w2c = sc * jax.random.normal(ks[6], (1, HIDDEN, 1, 1), jnp.float32)
    b2c = sc * jax.random.normal(ks[7], (1,), jnp.float32)

    def conv3x3_slabs(w_oihw):
        # (O, I, 3, 3) -> (9, I, O), slab index k = dy*3 + dx (matches kernel).
        o, i = w_oihw.shape[0], w_oihw.shape[1]
        return jnp.transpose(w_oihw, (2, 3, 1, 0)).reshape(9, i, o)

    # Heads fused along N: hidden cols 0:128 = pose, 128:256 = conf.
    w1 = jnp.concatenate([conv3x3_slabs(w1p), conv3x3_slabs(w1c)],
                         axis=2).astype(jnp.bfloat16)            # (9, C, 256)
    b1 = jnp.concatenate([b1p, b1c])[None, :]                    # (1, 256)
    # Block-diagonal 1x1: pose hidden -> cols 0:7, conf hidden -> col 7.
    w2 = jnp.zeros((N_FUSED, 8), jnp.float32)
    w2 = w2.at[:HIDDEN, 0:7].set(jnp.transpose(w2p[:, :, 0, 0]))
    w2 = w2.at[HIDDEN:, 7:8].set(jnp.transpose(w2c[:, :, 0, 0]))
    b2 = jnp.concatenate([b2p, b2c])[None, :]                    # (1, 8)

    kernel_params = {"w1": w1, "b1": b1, "w2": w2, "b2": b2}
    torch_params = {
        "w1p": w1p, "b1p": b1p, "w2p": w2p, "b2p": b2p,
        "w1c": w1c, "b1c": b1c, "w2c": w2c, "b2c": b2c,
    }
    return kernel_params, torch_params


def reference_forward(x, tp):
    """Pure-JAX f32 reference mirroring the PyTorch module (NCHW / OIHW)."""
    def conv(inp, w, b, pad):
        y = lax.conv_general_dilated(
            inp, w, (1, 1), pad,
            dimension_numbers=("NCHW", "OIHW", "NCHW"))
        return y + b[None, :, None, None]

    h = jax.nn.relu(conv(x, tp["w1p"], tp["b1p"], ((1, 1), (1, 1))))
    pose = conv(h, tp["w2p"], tp["b2p"], ((0, 0), (0, 0)))
    quat = pose[:, 0:4]
    quat = quat / jnp.maximum(
        jnp.sqrt(jnp.sum(quat * quat, axis=1, keepdims=True)), 1e-12)
    trans = pose[:, 4:7]
    hc = jax.nn.relu(conv(x, tp["w1c"], tp["b1c"], ((1, 1), (1, 1))))
    conf = jax.nn.sigmoid(conv(hc, tp["w2c"], tp["b2c"], ((0, 0), (0, 0))))[:, 0]
    return quat, trans, conf


if __name__ == "__main__":
    # feature_dim = 8; grid = B*nJ = 2 parallel steps -> both v7x TCs get work.
    B, C, H, W = 2, 8, 16, 16
    key = jax.random.PRNGKey(0)
    k_x, k_p = jax.random.split(key)
    feat_map = jax.random.normal(k_x, (B, C, H, W), jnp.float32)
    kparams, tparams = init_params(k_p, C)

    quat, trans, conf = cosypose_detection_head(feat_map, kparams)
    jax.block_until_ready((quat, trans, conf))

    rq, rt, rc = reference_forward(feat_map, tparams)
    assert quat.shape == (B, 4, H, W)
    assert trans.shape == (B, 3, H, W)
    assert conf.shape == (B, H, W)
    # bf16 streamed activations / 3x3 weights (f32 accumulate) -> tolerances
    # loosened vs the pure-f32 reference, per the perf review.
    assert jnp.allclose(quat, rq, atol=5e-2, rtol=5e-2)
    assert jnp.allclose(trans, rt, atol=5e-2, rtol=5e-2)
    assert jnp.allclose(conf, rc, atol=5e-2, rtol=5e-2)

    print("KERNEL_OK")
</pallas_src>

<mosaic_0001>
module attributes {stable_mosaic.version = 11 : i64} {
  func.func @_head_kernel(%arg0: i32, %arg1: memref<1x342x8xbf16, #tpu.memory_space<vmem>>, %arg2: memref<9x8x256xbf16, #tpu.memory_space<vmem>>, %arg3: memref<1x256xf32, #tpu.memory_space<vmem>>, %arg4: memref<256x8xf32, #tpu.memory_space<vmem>>, %arg5: memref<1x8xf32, #tpu.memory_space<vmem>>, %arg6: memref<1x288x8xf32, #tpu.memory_space<vmem>>) attributes {dimension_semantics = [#tpu.dimension_semantics<parallel>], iteration_bounds = array<i64: 2>, scalar_prefetch = 0 : i64, scratch_operands = 0 : i64, tpu.core_type = #tpu.core_type<tc>, window_params = [{transform_indices = @transform_0, window_bounds = array<i64: 1, 342, 8>}, {pipeline_mode = #tpu.pipeline_mode<synchronous>, transform_indices = @transform_1, window_bounds = array<i64: 9, 8, 256>}, {pipeline_mode = #tpu.pipeline_mode<synchronous>, transform_indices = @transform_2, window_bounds = array<i64: 1, 256>}, {pipeline_mode = #tpu.pipeline_mode<synchronous>, transform_indices = @transform_3, window_bounds = array<i64: 256, 8>}, {pipeline_mode = #tpu.pipeline_mode<synchronous>, transform_indices = @transform_4, window_bounds = array<i64: 1, 8>}, {transform_indices = @transform_5, window_bounds = array<i64: 1, 288, 8>}]} {
    %c0 = arith.constant 0 : index
    %c0_0 = arith.constant 0 : index
    %c0_1 = arith.constant 0 : index
    %0 = vector.load %arg1[%c0, %c0_0, %c0_1] : memref<1x342x8xbf16, #tpu.memory_space<vmem>>, vector<1x288x8xbf16>
    %1 = vector.shape_cast %0 : vector<1x288x8xbf16> to vector<288x8xbf16>
    %c0_2 = arith.constant 0 : index
    %c0_3 = arith.constant 0 : index
    %c0_4 = arith.constant 0 : index
    %2 = vector.load %arg2[%c0_2, %c0_3, %c0_4] : memref<9x8x256xbf16, #tpu.memory_space<vmem>>, vector<1x8x256xbf16>
    %3 = vector.shape_cast %2 : vector<1x8x256xbf16> to vector<8x256xbf16>
    %cst = arith.constant dense<0.000000e+00> : vector<288x256xf32>
    %4 = tpu.matmul %1, %3, %cst {dimension_numbers = #tpu.dot_dimension_numbers<[1], [0], [0], [1], [0, 0, 1, 1], [], []>} : vector<288x8xbf16>, vector<8x256xbf16>, vector<288x256xf32> -> vector<288x256xf32>
    %c0_5 = arith.constant 0 : index
    %c1 = arith.constant 1 : index
    %c0_6 = arith.constant 0 : index
    %5 = vector.load %arg1[%c0_5, %c1, %c0_6] : memref<1x342x8xbf16, #tpu.memory_space<vmem>>, vector<1x288x8xbf16>
    %6 = vector.shape_cast %5 : vector<1x288x8xbf16> to vector<288x8xbf16>
    %c1_7 = arith.constant 1 : index
    %c0_8 = arith.constant 0 : index
    %c0_9 = arith.constant 0 : index
    %7 = vector.load %arg2[%c1_7, %c0_8, %c0_9] : memref<9x8x256xbf16, #tpu.memory_space<vmem>>, vector<1x8x256xbf16>
    %8 = vector.shape_cast %7 : vector<1x8x256xbf16> to vector<8x256xbf16>
    %cst_10 = arith.constant dense<0.000000e+00> : vector<288x256xf32>
    %9 = tpu.matmul %6, %8, %cst_10 {dimension_numbers = #tpu.dot_dimension_numbers<[1], [0], [0], [1], [0, 0, 1, 1], [], []>} : vector<288x8xbf16>, vector<8x256xbf16>, vector<288x256xf32> -> vector<288x256xf32>
    %10 = arith.addf %4, %9 : vector<288x256xf32>
    %c0_11 = arith.constant 0 : index
    %c2 = arith.constant 2 : index
    %c0_12 = arith.constant 0 : index
    %11 = vector.load %arg1[%c0_11, %c2, %c0_12] : memref<1x342x8xbf16, #tpu.memory_space<vmem>>, vector<1x288x8xbf16>
    %12 = vector.shape_cast %11 : vector<1x288x8xbf16> to vector<288x8xbf16>
    %c2_13 = arith.constant 2 : index
    %c0_14 = arith.constant 0 : index
    %c0_15 = arith.constant 0 : index
    %13 = vector.load %arg2[%c2_13, %c0_14, %c0_15] : memref<9x8x256xbf16, #tpu.memory_space<vmem>>, vector<1x8x256xbf16>
    %14 = vector.shape_cast %13 : vector<1x8x256xbf16> to vector<8x256xbf16>
    %cst_16 = arith.constant dense<0.000000e+00> : vector<288x256xf32>
    %15 = tpu.matmul %12, %14, %cst_16 {dimension_numbers = #tpu.dot_dimension_numbers<[1], [0], [0], [1], [0, 0, 1, 1], [], []>} : vector<288x8xbf16>, vector<8x256xbf16>, vector<288x256xf32> -> vector<288x256xf32>
    %16 = arith.addf %10, %15 : vector<288x256xf32>
    %c0_17 = arith.constant 0 : index
    %c18 = arith.constant 18 : index
    %c0_18 = arith.constant 0 : index
    %17 = vector.load %arg1[%c0_17, %c18, %c0_18] : memref<1x342x8xbf16, #tpu.memory_space<vmem>>, vector<1x288x8xbf16>
    %18 = vector.shape_cast %17 : vector<1x288x8xbf16> to vector<288x8xbf16>
    %c3 = arith.constant 3 : index
    %c0_19 = arith.constant 0 : index
    %c0_20 = arith.constant 0 : index
    %19 = vector.load %arg2[%c3, %c0_19, %c0_20] : memref<9x8x256xbf16, #tpu.memory_space<vmem>>, vector<1x8x256xbf16>
    %20 = vector.shape_cast %19 : vector<1x8x256xbf16> to vector<8x256xbf16>
    %cst_21 = arith.constant dense<0.000000e+00> : vector<288x256xf32>
    %21 = tpu.matmul %18, %20, %cst_21 {dimension_numbers = #tpu.dot_dimension_numbers<[1], [0], [0], [1], [0, 0, 1, 1], [], []>} : vector<288x8xbf16>, vector<8x256xbf16>, vector<288x256xf32> -> vector<288x256xf32>
    %22 = arith.addf %16, %21 : vector<288x256xf32>
    %c0_22 = arith.constant 0 : index
    %c19 = arith.constant 19 : index
    %c0_23 = arith.constant 0 : index
    %23 = vector.load %arg1[%c0_22, %c19, %c0_23] : memref<1x342x8xbf16, #tpu.memory_space<vmem>>, vector<1x288x8xbf16>
    %24 = vector.shape_cast %23 : vector<1x288x8xbf16> to vector<288x8xbf16>
    %c4 = arith.constant 4 : index
    %c0_24 = arith.constant 0 : index
    %c0_25 = arith.constant 0 : index
    %25 = vector.load %arg2[%c4, %c0_24, %c0_25] : memref<9x8x256xbf16, #tpu.memory_space<vmem>>, vector<1x8x256xbf16>
    %26 = vector.shape_cast %25 : vector<1x8x256xbf16> to vector<8x256xbf16>
    %cst_26 = arith.constant dense<0.000000e+00> : vector<288x256xf32>
    %27 = tpu.matmul %24, %26, %cst_26 {dimension_numbers = #tpu.dot_dimension_numbers<[1], [0], [0], [1], [0, 0, 1, 1], [], []>} : vector<288x8xbf16>, vector<8x256xbf16>, vector<288x256xf32> -> vector<288x256xf32>
    %28 = arith.addf %22, %27 : vector<288x256xf32>
    %c0_27 = arith.constant 0 : index
    %c20 = arith.constant 20 : index
    %c0_28 = arith.constant 0 : index
    %29 = vector.load %arg1[%c0_27, %c20, %c0_28] : memref<1x342x8xbf16, #tpu.memory_space<vmem>>, vector<1x288x8xbf16>
    %30 = vector.shape_cast %29 : vector<1x288x8xbf16> to vector<288x8xbf16>
    %c5 = arith.constant 5 : index
    %c0_29 = arith.constant 0 : index
    %c0_30 = arith.constant 0 : index
    %31 = vector.load %arg2[%c5, %c0_29, %c0_30] : memref<9x8x256xbf16, #tpu.memory_space<vmem>>, vector<1x8x256xbf16>
    %32 = vector.shape_cast %31 : vector<1x8x256xbf16> to vector<8x256xbf16>
    %cst_31 = arith.constant dense<0.000000e+00> : vector<288x256xf32>
    %33 = tpu.matmul %30, %32, %cst_31 {dimension_numbers = #tpu.dot_dimension_numbers<[1], [0], [0], [1], [0, 0, 1, 1], [], []>} : vector<288x8xbf16>, vector<8x256xbf16>, vector<288x256xf32> -> vector<288x256xf32>
    %34 = arith.addf %28, %33 : vector<288x256xf32>
    %c0_32 = arith.constant 0 : index
    %c36 = arith.constant 36 : index
    %c0_33 = arith.constant 0 : index
    %35 = vector.load %arg1[%c0_32, %c36, %c0_33] : memref<1x342x8xbf16, #tpu.memory_space<vmem>>, vector<1x288x8xbf16>
    %36 = vector.shape_cast %35 : vector<1x288x8xbf16> to vector<288x8xbf16>
    %c6 = arith.constant 6 : index
    %c0_34 = arith.constant 0 : index
    %c0_35 = arith.constant 0 : index
    %37 = vector.load %arg2[%c6, %c0_34, %c0_35] : memref<9x8x256xbf16, #tpu.memory_space<vmem>>, vector<1x8x256xbf16>
    %38 = vector.shape_cast %37 : vector<1x8x256xbf16> to vector<8x256xbf16>
    %cst_36 = arith.constant dense<0.000000e+00> : vector<288x256xf32>
    %39 = tpu.matmul %36, %38, %cst_36 {dimension_numbers = #tpu.dot_dimension_numbers<[1], [0], [0], [1], [0, 0, 1, 1], [], []>} : vector<288x8xbf16>, vector<8x256xbf16>, vector<288x256xf32> -> vector<288x256xf32>
    %40 = arith.addf %34, %39 : vector<288x256xf32>
    %c0_37 = arith.constant 0 : index
    %c37 = arith.constant 37 : index
    %c0_38 = arith.constant 0 : index
    %41 = vector.load %arg1[%c0_37, %c37, %c0_38] : memref<1x342x8xbf16, #tpu.memory_space<vmem>>, vector<1x288x8xbf16>
    %42 = vector.shape_cast %41 : vector<1x288x8xbf16> to vector<288x8xbf16>
    %c7 = arith.constant 7 : index
    %c0_39 = arith.constant 0 : index
    %c0_40 = arith.constant 0 : index
    %43 = vector.load %arg2[%c7, %c0_39, %c0_40] : memref<9x8x256xbf16, #tpu.memory_space<vmem>>, vector<1x8x256xbf16>
    %44 = vector.shape_cast %43 : vector<1x8x256xbf16> to vector<8x256xbf16>
    %cst_41 = arith.constant dense<0.000000e+00> : vector<288x256xf32>
    %45 = tpu.matmul %42, %44, %cst_41 {dimension_numbers = #tpu.dot_dimension_numbers<[1], [0], [0], [1], [0, 0, 1, 1], [], []>} : vector<288x8xbf16>, vector<8x256xbf16>, vector<288x256xf32> -> vector<288x256xf32>
    %46 = arith.addf %40, %45 : vector<288x256xf32>
    %c0_42 = arith.constant 0 : index
    %c38 = arith.constant 38 : index
    %c0_43 = arith.constant 0 : index
    %47 = vector.load %arg1[%c0_42, %c38, %c0_43] : memref<1x342x8xbf16, #tpu.memory_space<vmem>>, vector<1x288x8xbf16>
    %48 = vector.shape_cast %47 : vector<1x288x8xbf16> to vector<288x8xbf16>
    %c8 = arith.constant 8 : index
    %c0_44 = arith.constant 0 : index
    %c0_45 = arith.constant 0 : index
    %49 = vector.load %arg2[%c8, %c0_44, %c0_45] : memref<9x8x256xbf16, #tpu.memory_space<vmem>>, vector<1x8x256xbf16>
    %50 = vector.shape_cast %49 : vector<1x8x256xbf16> to vector<8x256xbf16>
    %cst_46 = arith.constant dense<0.000000e+00> : vector<288x256xf32>
    %51 = tpu.matmul %48, %50, %cst_46 {dimension_numbers = #tpu.dot_dimension_numbers<[1], [0], [0], [1], [0, 0, 1, 1], [], []>} : vector<288x8xbf16>, vector<8x256xbf16>, vector<288x256xf32> -> vector<288x256xf32>
    %52 = arith.addf %46, %51 : vector<288x256xf32>
    %c0_47 = arith.constant 0 : index
    %c0_48 = arith.constant 0 : index
    %53 = vector.load %arg3[%c0_47, %c0_48] : memref<1x256xf32, #tpu.memory_space<vmem>>, vector<1x256xf32>
    %54 = vector.broadcast %53 : vector<1x256xf32> to vector<288x256xf32>
    %55 = arith.addf %52, %54 : vector<288x256xf32>
    %cst_49 = arith.constant 0.000000e+00 : f32
    %56 = vector.broadcast %cst_49 : f32 to vector<288x256xf32>
    %57 = arith.maximumf %55, %56 : vector<288x256xf32>
    %c0_50 = arith.constant 0 : index
    %c0_51 = arith.constant 0 : index
    %58 = vector.load %arg4[%c0_50, %c0_51] : memref<256x8xf32, #tpu.memory_space<vmem>>, vector<256x8xf32>
    %cst_52 = arith.constant dense<0.000000e+00> : vector<288x8xf32>
    %59 = tpu.matmul %57, %58, %cst_52 {dimension_numbers = #tpu.dot_dimension_numbers<[1], [0], [0], [1], [0, 0, 1, 1], [], []>} : vector<288x256xf32>, vector<256x8xf32>, vector<288x8xf32> -> vector<288x8xf32>
    %c0_53 = arith.constant 0 : index
    %c0_54 = arith.constant 0 : index
    %60 = vector.load %arg5[%c0_53, %c0_54] : memref<1x8xf32, #tpu.memory_space<vmem>>, vector<1x8xf32>
    %61 = vector.broadcast %60 : vector<1x8xf32> to vector<288x8xf32>
    %62 = arith.addf %59, %61 : vector<288x8xf32>
    %63 = tpu.iota {dimensions = array<i32: 1>} : vector<288x8xi32>
    %c4_i32 = arith.constant 4 : i32
    %64 = vector.broadcast %c4_i32 : i32 to vector<288x8xi32>
    %65 = arith.cmpi slt, %63, %64 : vector<288x8xi32>
    %66 = arith.mulf %62, %62 : vector<288x8xf32>
    %cst_55 = arith.constant 0.000000e+00 : f32
    %67 = vector.broadcast %cst_55 : f32 to vector<288x8xf32>
    %68 = arith.select %65, %66, %67 : vector<288x8xi1>, vector<288x8xf32>
    %cst_56 = arith.constant dense<0.000000e+00> : vector<288xf32>
    %69 = vector.multi_reduction <add>, %68, %cst_56 [1] : vector<288x8xf32> to vector<288xf32>
    %70 = vector.shape_cast %69 : vector<288xf32> to vector<288x1xf32>
    %cst_57 = arith.constant 1.000000e-24 : f32
    %71 = vector.broadcast %cst_57 : f32 to vector<288x1xf32>
    %72 = arith.maximumf %70, %71 : vector<288x1xf32>
    %73 = math.rsqrt %72 : vector<288x1xf32>
    %c4_i32_58 = arith.constant 4 : i32
    %74 = vector.broadcast %c4_i32_58 : i32 to vector<288x8xi32>
    %75 = arith.cmpi slt, %63, %74 : vector<288x8xi32>
    %cst_59 = arith.constant 1.000000e+00 : f32
    %76 = vector.shape_cast %73 : vector<288x1xf32> to vector<288x1xf32>
    %77 = vector.broadcast %76 : vector<288x1xf32> to vector<288x8xf32>
    %78 = vector.broadcast %cst_59 : f32 to vector<288x8xf32>
    %79 = arith.select %75, %77, %78 : vector<288x8xi1>, vector<288x8xf32>
    %80 = arith.mulf %62, %79 : vector<288x8xf32>
    %c7_i32 = arith.constant 7 : i32
    %81 = vector.broadcast %c7_i32 : i32 to vector<288x8xi32>
    %82 = arith.cmpi eq, %63, %81 : vector<288x8xi32>
    %83 = arith.negf %62 : vector<288x8xf32>
    %84 = math.exp %83 : vector<288x8xf32>
    %cst_60 = arith.constant 1.000000e+00 : f32
    %85 = vector.broadcast %cst_60 : f32 to vector<288x8xf32>
    %86 = arith.addf %85, %84 : vector<288x8xf32>
    %87 = arith.divf %85, %86 : vector<288x8xf32>
    %88 = arith.select %82, %87, %80 : vector<288x8xi1>, vector<288x8xf32>
    %c0_61 = arith.constant 0 : index
    %c0_62 = arith.constant 0 : index
    %c0_63 = arith.constant 0 : index
    %89 = vector.load %arg6[%c0_61, %c0_62, %c0_63] : memref<1x288x8xf32, #tpu.memory_space<vmem>>, vector<1x288x8xf32>
    %90 = vector.shape_cast %89 : vector<1x288x8xf32> to vector<288x8xf32>
    %91 = vector.shape_cast %88 : vector<288x8xf32> to vector<1x288x8xf32>
    tpu.vector_store %arg6[%c0_61, %c0_62, %c0_63], %91 {strides = array<i32>} : memref<1x288x8xf32, #tpu.memory_space<vmem>>, vector<1x288x8xf32>,
    return
  }
  func.func @transform_0(%arg0: i32) -> (i32, i32, i32) {
    %c0_i32 = arith.constant 0 : i32
    %c0_i32_0 = arith.constant 0 : i32
    %c0_i32_1 = arith.constant 0 : i32
    return %arg0, %c0_i32, %c0_i32_0 : i32, i32, i32
  }
  func.func @transform_1(%arg0: i32) -> (i32, i32, i32) {
    %c0_i32 = arith.constant 0 : i32
    %c0_i32_0 = arith.constant 0 : i32
    %c0_i32_1 = arith.constant 0 : i32
    %c0_i32_2 = arith.constant 0 : i32
    return %c0_i32, %c0_i32_0, %c0_i32_1 : i32, i32, i32
  }
  func.func @transform_2(%arg0: i32) -> (i32, i32) {
    %c0_i32 = arith.constant 0 : i32
    %c0_i32_0 = arith.constant 0 : i32
    %c0_i32_1 = arith.constant 0 : i32
    return %c0_i32, %c0_i32_0 : i32, i32
  }
  func.func @transform_3(%arg0: i32) -> (i32, i32) {
    %c0_i32 = arith.constant 0 : i32
    %c0_i32_0 = arith.constant 0 : i32
    %c0_i32_1 = arith.constant 0 : i32
    return %c0_i32, %c0_i32_0 : i32, i32
  }
  func.func @transform_4(%arg0: i32) -> (i32, i32) {
    %c0_i32 = arith.constant 0 : i32
    %c0_i32_0 = arith.constant 0 : i32
    %c0_i32_1 = arith.constant 0 : i32
    return %c0_i32, %c0_i32_0 : i32, i32
  }
  func.func @transform_5(%arg0: i32) -> (i32, i32, i32) {
    %c0_i32 = arith.constant 0 : i32
    %c0_i32_0 = arith.constant 0 : i32
    %c0_i32_1 = arith.constant 0 : i32
    return %arg0, %c0_i32, %c0_i32_0 : i32, i32, i32
  }
}

</mosaic_0001>

<bundles_post_ra>
// kernel: cosypose_detection_head.1
= control target key start
LH: loop header
LB: loop body
LE: loop exit
PB: predicated region body
PF: predicated region fallthrough
CT: control target
= control target key end

     0   :  { %s6732_s18 = smov 0   ;;  %s8691_s0 = inlined_call_operand.vmem [shape: bf16[2,342,8], index: 0, kind: input, shape index: {}]   ;;  %s8692_s1 = inlined_call_operand.vmem [shape: bf16[9,8,256], index: 1, kind: input, shape index: {}]   ;;  %s8693_s2 = inlined_call_operand.vmem [shape: f32[1,256], index: 2, kind: input, shape index: {}]   ;;  %s8694_s3 = inlined_call_operand.vmem [shape: f32[256,8], index: 3, kind: input, shape index: {}]   ;;  %s8695_s4 = inlined_call_operand.vmem [shape: f32[1,8], index: 4, kind: input, shape index: {}]   ;;  %s8696_s5 = inlined_call_operand.vmem [shape: f32[2,288,8], index: 5, kind: output, shape index: {}]  }
   0x1 LB: > { %s5433_s19 = sadd.s32 4294967295, %s6698_s18   ;;  %p5437_p0 = scmp.ge.s32.totalorder %s6698_s18, 1  ;;  %s6698_s18 = sphi %s6732_s18, %s15_s18  }
   0x2   : > { %p187_p1 = scmp.lt.s32.totalorder %s6698_s18, 3 }
   0x4   : > { %p188_p2 = pnand %p5437_p0, %p187_p1 }
   0x6   : > { %191 = sbr.rel (%p188_p2) target bundleno = 1344 (0x540), region = 40 }
   0xd   : > { %vm568_vm0 = vcmask 1043456   ;;  %v5566_v0 = vld [vmem:[%s8692_s1 + $0x20] sm:$0xff]  ;;  %v5440_v1 = vld [vmem:[%s8692_s1 + $0x8] sm:$0xff]  ;;  %p215_p3 = scmp.lt.s32.totalorder %s5433_s19, 1  ;;  %v6700_v7 = vmov 0   ;;  %vm513_vm3 = vcmask 64512  }
   0xe   : > { %v5589_v2 = vld [vmem:[%s8692_s1 + $0x28] sm:$0xff]  ;;  %v5569_v3 = vcombine.high %v5566_v0, %v5566_v0  ;;  %v5461_v4 = vcombine.high %v5440_v1, %v5440_v1  ;;  %v5568_v5 = vcombine.low %v5566_v0, %v5566_v0  ;;  %v5460_v6 = vcombine.low %v5440_v1, %v5440_v1  ;;  %607 = vmatprep.mubr.bf16.mxu1 %v6700_v7 }
   0xf   : > { %2235 = vmatprep.mubr.bf16.mxu0 %v6700_v7  ;;  %v5592_v8 = vcombine.high %v5589_v2, %v5589_v2  ;;  %s8748_s19 = smov (!%p215_p3, %s5433_s19), 1  ;;  %vm359_vm1 = vsmask.f32 7424  ;;  %vm1967_vm2 = vsmask.f32 6400  ;;  %v5591_v29 = vcombine.low %v5589_v2, %v5589_v2 }
  0x10   : > { %5570 = vmatprep.subr.msk.bf16.mxu0 %vm568_vm0, %v5569_v3  ;;  %5462 = vmatprep.subr.msk.bf16.mxu1 %vm568_vm0, %v5461_v4  ;;  %v2198_v9 = vsel %vm568_vm0, %v5568_v5, 0  ;;  %v570_v10 = vsel %vm568_vm0, %v5460_v6, 0  ;;  %s6362_s26 = smul.u32 172, %s8748_s19  ;;  %vm2494_vm4 = vcmask 1045504   ;;  %vm1054_vm5 = vcmask 1046528  }
  0x11   : > { %2204 = vmatpush1.bf16.msra.mxu0 %v2198_v9  ;;  %576 = vmatpush1.bf16.msra.mxu1 %v570_v10  ;;  %v2592_v45 = vsel %vm568_vm0, %v5591_v29, 0  ;;  %vm3407_vm6 = vsmask.f32 5376  ;;  %vm3934_vm7 = vcmask 1044480   ;;  %s6363_s17 = smul.u32 288, %s8748_s19 }
  0x12   : > { %5593 = vmatprep.subr.msk.bf16.mxu0 %vm568_vm0, %v5592_v8  ;;  %s6762_s29 = scalar_lea.vmem %s8691_s0, %s6362_s26 }
  0x13   : > { %v226_v11 = vld [vmem:[%s6762_s29] sm:$0xf]  ;;  %v227_v12 = vld [vmem:[%s6762_s29 + $0x4] sm:$0xf]  ;;  %v6769_v14 = vld [vmem:[%s6762_s29 + $0x8] sm:$0xff]   ;;  %s8408_s21 = scalar_lea.vmem %s8696_s5, %s6363_s17 }
  0x14   : > { %v6766_v13 = vcombine.low %v226_v11, %v227_v12  ;;  %v1442_v15 = vld [vmem:[%s6762_s29 + $0x8] sm:$0xe]  ;;  %v6773_v16 = vld [vmem:[%s6762_s29 + $0xc] sm:$0xf]  ;;  %v368_v19 = vshll.u32 %v6769_v14, 16  ;;  %v6782_v21 = vld [vmem:[%s6762_s29 + $0x10] sm:$0xff]  }
  0x15   : > { %v6779_v20 = vcombine.low %v1442_v15, %v6773_v16  ;;  %v6785_v22 = vld [vmem:[%s6762_s29 + $0x10] sm:$0xff]   ;;  %v1977_v27 = vshrl.u32 %v6782_v21, 16  ;;  %v1980_v28 = vshll.u32 %v6782_v21, 16  ;;  %v372_v30 = vshrl.u32 %v6769_v14, 16  ;;  %v6793_v31 = vld [vmem:[%s6762_s29 + $0x18] sm:$0xff]   ;;  %v6801_v44 = vld [vmem:[%s6762_s29 + $0x20] sm:$0xff]  }
  0x16   : > { %v361_v17 = vshrl.u32 %v6766_v13, 16  ;;  %v363_v18 = vshll.u32 %v6766_v13, 16  ;;  %v370_v24 = vrot.slane %v368_v19, 1  ;;  %v376_v35 = vshll.u32 %v6785_v22, 16  ;;  %v6806_v49 = vld [vmem:[%s6762_s29 + $0x18] sm:$0xff]   ;;  %v6819_v60 = vld [vmem:[%s6762_s29 + $0x28] sm:$0xff]  }
  0x17   : > { %v1969_v25 = vshrl.u32 %v6779_v20, 16  ;;  %v1972_v26 = vshll.u32 %v6779_v20, 16  ;;  %v1979_v36 = vrot.slane %v1977_v27, 1  ;;  %v1982_v37 = vrot.slane %v1980_v28, 2  ;;  %v6823_v63 = vld [vmem:[%s6762_s29 + $0x20] sm:$0xff]   ;;  %v6835_v10 = vld [vmem:[%s6762_s29 + $0x30] sm:$0xff]  }
  0x18   : > { %v365_v23 = vrot.slane %v363_v18, 1  ;;  %v1986_v38 = vshrl.u32 %v6793_v31, 16  ;;  %v1989_v41 = vshll.u32 %v6793_v31, 16  ;;  %v374_v46 = vor.u32 %v372_v30, %v370_v24  ;;  %v6839_v15 = vld [vmem:[%s6762_s29 + $0x28] sm:$0xff]  }
  0x19   : > { %v1971_v33 = vrot.slane %v1969_v25, 1  ;;  %v1974_v34 = vrot.slane %v1972_v26, 2  ;;  %v1983_v42 = vor.u32 %v1982_v37, %v1979_v36  ;;  %v378_v47 = vrot.slane %v376_v35, 1  ;;  %v6849_v26 = vld [vmem:[%s6762_s29 + $0x38] sm:$0xff]  }
  0x1a   : > { %v366_v32 = vor.u32 %v365_v23, %v361_v17  ;;  %v1988_v43 = vrot.slane %v1986_v38, 1  ;;  %v1991_v48 = vrot.slane %v1989_v41, 2  ;;  %v1995_v52 = vshrl.u32 %v6801_v44, 16 }
  0x1b   : > { %v1975_v40 = vor.u32 %v1974_v34, %v1971_v33  ;;  %v1998_v53 = vshll.u32 %v6801_v44, 16  ;;  %v379_v54 = vsel %vm359_vm1, %v374_v46, %v378_v47  ;;  %v380_v55 = vshrl.u32 %v6785_v22, 16  ;;  %v6855_v33 = vld [vmem:[%s6762_s29 + $0x30] sm:$0xff]  }
  0x1c   : > { %v371_v39 = vsel %vm359_vm1, %v366_v32, %v370_v24  ;;  %v1992_v51 = vor.u32 %v1991_v48, %v1988_v43  ;;  %v384_v56 = vshll.u32 %v6806_v49, 16  ;;  %v1997_v58 = vrot.slane %v1995_v52, 1 }
  0x1d   : > { %5463 = vmatmul.mubr.msk.bf16.vlgmr.msra.gmra.mrb[0].mxu1 %vm513_vm3, %v371_v39  ;;  %v1984_v50 = vsel %vm1967_vm2, %v1975_v40, %v1983_v42  ;;  %v2000_v59 = vrot.slane %v1998_v53, 2  ;;  %v382_v61 = vor.u32 %v380_v55, %v378_v47  ;;  %v2004_v1 = vshrl.u32 %v6819_v60, 16  ;;  %v6865_v40 = vld [vmem:[%s6762_s29 + $0x40] sm:$0xff]   ;;  %v6871_v47 = vld [vmem:[%s6762_s29 + $0x38] sm:$0xff]  }
  0x1e   : > { %617 = vmatprep.mubr.bf16.mxu1 %v6700_v7  ;;  %5571 = vmatmul.mubr.msk.bf16.vlgmr.msra.gmra.mrb[0].mxu0 %vm513_vm3, %v1984_v50  ;;  %v1993_v57 = vsel %vm1967_vm2, %v1983_v42, %v1992_v51  ;;  %v386_v62 = vrot.slane %v384_v56, 1  ;;  %v2007_v2 = vshll.u32 %v6819_v60, 16  ;;  %v388_v4 = vshrl.u32 %v6806_v49, 16 }
  0x1f   : > { %2598 = vmatpush1.bf16.msra.mxu0 %v2592_v45  ;;  %2245 = vmatprep.mubr.bf16.mxu0 %v6700_v7  ;;  %v2001_v0 = vor.u32 %v2000_v59, %v1997_v58  ;;  %v392_v5 = vshll.u32 %v6823_v63, 16  ;;  %v2006_v8 = vrot.slane %v2004_v1, 1  ;;  %v2013_v18 = vshrl.u32 %v6835_v10, 16  ;;  %v6883_v58 = vld [vmem:[%s6762_s29 + $0x48] sm:$0xff]   ;;  %v262_v59 = vld [vmem:[%s8692_s1] sm:$0xff] }
  0x20   : > { %v387_v3 = vsel %vm359_vm1, %v382_v61, %v386_v62  ;;  %v2009_v9 = vrot.slane %v2007_v2, 2  ;;  %v390_v11 = vor.u32 %v388_v4, %v386_v62  ;;  %v2016_v19 = vshll.u32 %v6835_v10, 16  ;;  %v6893_v1 = vld [vmem:[%s6762_s29 + $0x48] sm:$0xff]   ;;  %v6898_v2 = vld [vmem:[%s8692_s1 + $0x30] sm:$0xff] }
  0x21   : > { %v2002_v6 = vsel %vm1967_vm2, %v1992_v51, %v2001_v0  ;;  %v394_v12 = vrot.slane %v392_v5, 1  ;;  %v396_v24 = vshrl.u32 %v6823_v63, 16  ;;  %v400_v25 = vshll.u32 %v6839_v15, 16 }
  0x22   : > { %v2010_v17 = vor.u32 %v2009_v9, %v2006_v8  ;;  %v2015_v28 = vrot.slane %v2013_v18, 1  ;;  %v2018_v29 = vrot.slane %v2016_v19, 2  ;;  %v2022_v35 = vshrl.u32 %v6849_v26, 16 }
  0x23   : > { %v395_v23 = vsel %vm359_vm1, %v390_v11, %v394_v12  ;;  %v398_v30 = vor.u32 %v396_v24, %v394_v12  ;;  %v402_v32 = vrot.slane %v400_v25, 1  ;;  %v2025_v36 = vshll.u32 %v6849_v26, 16  ;;  %v6908_v12 = vld [vmem:[%s6762_s29 + $0x50] sm:$0xff]  }
  0x24   : > { %v2011_v27 = vsel %vm1967_vm2, %v2001_v0, %v2010_v17  ;;  %v2019_v34 = vor.u32 %v2018_v29, %v2015_v28  ;;  %v404_v38 = vshrl.u32 %v6839_v15, 16  ;;  %v408_v39 = vshll.u32 %v6855_v33, 16  ;;  %v6890_v0 = vld [vmem:[%s6762_s29 + $0x40] sm:$0xff]  }
  0x25   : > { %5464 = vmatmul.mubr.msk.bf16.gmra.mrb[4].mxu1 %vm513_vm3, %v379_v54  ;;  %v403_v37 = vsel %vm359_vm1, %v398_v30, %v402_v32  ;;  %v2024_v42 = vrot.slane %v2022_v35, 1  ;;  %v2027_v43 = vrot.slane %v2025_v36, 2  ;;  %v2031_v50 = vshrl.u32 %v6865_v40, 16 }
  0x26   : > { %627 = vmatprep.mubr.bf16.mxu1 %v6700_v7  ;;  %5572 = vmatmul.mubr.msk.bf16.gmra.mrb[4].mxu0 %vm513_vm3, %v1993_v57  ;;  %v2020_v41 = vsel %vm1967_vm2, %v2010_v17, %v2019_v34  ;;  %v406_v45 = vor.u32 %v404_v38, %v402_v32  ;;  %v410_v46 = vrot.slane %v408_v39, 1  ;;  %v2034_v51 = vshll.u32 %v6865_v40, 16  ;;  %v6926_v38 = vld [vmem:[%s6762_s29 + $0x58] sm:$0xff]   ;;  %v6929_v39 = vld [vmem:[%s6762_s29 + $0x50] sm:$0xff]  }
  0x27   : > { %2255 = vmatprep.mubr.bf16.mxu0 %v6700_v7  ;;  %v2028_v48 = vor.u32 %v2027_v43, %v2024_v42  ;;  %v412_v53 = vshrl.u32 %v6855_v33, 16  ;;  %v416_v54 = vshll.u32 %v6871_v47, 16  ;;  %v2033_v56 = vrot.slane %v2031_v50, 1 }
  0x28   : > { %v411_v52 = vsel %vm359_vm1, %v406_v45, %v410_v46  ;;  %v2036_v57 = vrot.slane %v2034_v51, 2  ;;  %v5482_v4 = vcombine.high %v262_v59, %v262_v59  ;;  %v2043_v8 = vshll.u32 %v6883_v58, 16 }
  0x29   : > { %v2029_v55 = vsel %vm1967_vm2, %v2019_v34, %v2028_v48  ;;  %v414_v61 = vor.u32 %v412_v53, %v410_v46  ;;  %v418_v62 = vrot.slane %v416_v54, 1  ;;  %v424_v11 = vshll.u32 %v6890_v0, 16 }
  0x2a   : > { %v2037_v5 = vor.u32 %v2036_v57, %v2033_v56  ;;  %5483 = vmatprep.subr.msk.bf16.mxu1 %vm568_vm0, %v5482_v4  ;;  %v5481_v17 = vcombine.low %v262_v59, %v262_v59  ;;  %v5633_v18 = vcombine.high %v6898_v2, %v6898_v2  ;;  %v432_v19 = vshll.u32 %v6893_v1, 16  ;;  %v6944_v57 = vld [vmem:[%s6762_s29 + $0x60] sm:$0xff]  }
  0x2b   : > { %v419_v9 = vsel %vm359_vm1, %v414_v61, %v418_v62  ;;  %v426_v29 = vrot.slane %v424_v11, 1  ;;  %v428_v30 = vshrl.u32 %v6890_v0, 16  ;;  %v2049_v32 = vshrl.u32 %v6908_v12, 16 }
  0x2c   : > { %5634 = vmatprep.subr.msk.bf16.mxu0 %vm568_vm0, %v5633_v18  ;;  %v2038_v24 = vsel %vm1967_vm2, %v2028_v48, %v2037_v5  ;;  %v434_v34 = vrot.slane %v432_v19, 1  ;;  %v2052_v35 = vshll.u32 %v6908_v12, 16  ;;  %v2058_v48 = vshrl.u32 %v6926_v38, 16  ;;  %v6960_v19 = vld [vmem:[%s6762_s29 + $0x68] sm:$0xff]  }
  0x2d   : > { %5465 = vmatmul.mubr.msk.bf16.gmra.mrb[8].mxu1 %vm513_vm3, %v387_v3  ;;  %v420_v3 = vshrl.u32 %v6871_v47, 16  ;;  %v2051_v42 = vrot.slane %v2049_v32, 1  ;;  %v430_v45 = vor.u32 %v428_v30, %v426_v29  ;;  %v2061_v50 = vshll.u32 %v6926_v38, 16 }
  0x2e   : > { %637 = vmatprep.mubr.bf16.mxu1 %v6700_v7  ;;  %5573 = vmatmul.mubr.msk.bf16.gmra.mrb[8].mxu0 %vm513_vm3, %v2002_v6  ;;  %v2040_v6 = vshrl.u32 %v6883_v58, 16  ;;  %v2054_v43 = vrot.slane %v2052_v35, 2  ;;  %v440_v53 = vshll.u32 %v6929_v39, 16  ;;  %v2067_v4 = vshrl.u32 %v6944_v57, 16 }
  0x2f   : > { %2265 = vmatprep.mubr.bf16.mxu0 %v6700_v7  ;;  %v422_v28 = vor.u32 %v420_v3, %v418_v62  ;;  %v435_v51 = vsel %vm359_vm1, %v430_v45, %v434_v34  ;;  %v2063_v56 = vrot.slane %v2061_v50, 2  ;;  %v6948_v62 = vld [vmem:[%s6762_s29 + $0x58] sm:$0xff]   ;;  %v6980_v45 = vld [vmem:[%s6762_s29 + $0x68] sm:$0xff]  }
  0x30   : > { %v2042_v25 = vrot.slane %v2040_v6, 1  ;;  %v2055_v46 = vor.u32 %v2054_v43, %v2051_v42  ;;  %v442_v61 = vrot.slane %v440_v53, 1  ;;  %v452_v32 = vshrl.u32 %v6948_v62, 16 }
  0x31   : > { %v464_v53 = vshll.u32 %v6980_v45, 16 }
  0x35   : > { %5466 = vmatmul.mubr.msk.bf16.gmra.mrb[12].mxu1 %vm513_vm3, %v395_v23  ;;  %v830_v23 = vsel %vm568_vm0, %v5481_v17, 0  ;;  %v2069_v17 = vrot.slane %v2067_v4, 1  ;;  %v6996_v4 = vld [vmem:[%s6762_s29 + $0x70] sm:$0xff]  }
  0x36   : > { %647 = vmatprep.mubr.bf16.mxu1 %v6700_v7  ;;  %5574 = vmatmul.mubr.msk.bf16.gmra.mrb[12].mxu0 %vm513_vm3, %v2011_v27  ;;  %v2045_v27 = vrot.slane %v2043_v8, 2  ;;  %v444_v8 = vshrl.u32 %v6929_v39, 16 }
  0x37   : > { %2275 = vmatprep.mubr.bf16.mxu0 %v6700_v7  ;;  %836 = vmatpush1.bf16.msra.mxu1 %v830_v23 }
  0x38   : > { %v2046_v36 = vor.u32 %v2045_v27, %v2042_v25  ;;  %v446_v23 = vor.u32 %v444_v8, %v442_v61  ;;  %v6964_v25 = vld [vmem:[%s6762_s29 + $0x60] sm:$0xff]  }
  0x3a   : > { %v2056_v54 = vsel %vm1967_vm2, %v2046_v36, %v2055_v46 }
  0x3d   : > { %5467 = vmatmul.mubr.msk.bf16.gmra.mrb[16].mxu1 %vm513_vm3, %v403_v37  ;;  %v427_v37 = vsel %vm359_vm1, %v422_v28, %v426_v29  ;;  %v2076_v28 = vshrl.u32 %v6960_v19, 16  ;;  %v2079_v29 = vshll.u32 %v6960_v19, 16 }
  0x3e   : > { %657 = vmatprep.mubr.bf16.mxu1 %v6700_v7  ;;  %5575 = vmatmul.mubr.msk.bf16.gmra.mrb[16].mxu0 %vm513_vm3, %v2020_v41  ;;  %v2047_v41 = vsel %vm1967_vm2, %v2037_v5, %v2046_v36  ;;  %v2070_v5 = vshll.u32 %v6944_v57, 16 }
  0x3f   : > { %2285 = vmatprep.mubr.bf16.mxu0 %v6700_v7  ;;  %v2078_v36 = vrot.slane %v2076_v28, 1 }
  0x40   : > { %v2072_v18 = vrot.slane %v2070_v5, 2 }
  0x42   : > { %v2073_v27 = vor.u32 %v2072_v18, %v2069_v17  ;;  %v472_v17 = vshll.u32 %v6996_v4, 16 }
  0x45   : > { %5468 = vmatmul.mubr.msk.bf16.gmra.mrb[20].mxu1 %vm513_vm3, %v411_v52  ;;  %v436_v52 = vshrl.u32 %v6893_v1, 16 }
  0x46   : > { %667 = vmatprep.mubr.bf16.mxu1 %v6700_v7  ;;  %5576 = vmatmul.mubr.msk.bf16.gmra.mrb[20].mxu0 %vm513_vm3, %v2029_v55  ;;  %v2060_v55 = vrot.slane %v2058_v48, 1 }
  0x47   : > { %2295 = vmatprep.mubr.bf16.mxu0 %v6700_v7  ;;  %v438_v59 = vor.u32 %v436_v52, %v434_v34  ;;  %v456_v34 = vshll.u32 %v6964_v25, 16  ;;  %v460_v52 = vshrl.u32 %v6964_v25, 16 }
  0x48   : > { %v2064_v3 = vor.u32 %v2063_v56, %v2060_v55 }
  0x49   : > { %v443_v6 = vsel %vm359_vm1, %v438_v59, %v442_v61  ;;  %v458_v43 = vrot.slane %v456_v34, 1  ;;  %v6992_v59 = vld [vmem:[%s6762_s29 + $0x78] sm:$0xff]  }
  0x4a   : > { %v2065_v11 = vsel %vm1967_vm2, %v2055_v46, %v2064_v3  ;;  %v2074_v35 = vsel %vm1967_vm2, %v2064_v3, %v2073_v27  ;;  %v466_v3 = vrot.slane %v464_v53, 1  ;;  %v2097_v8 = vshll.u32 %v6992_v59, 16  ;;  %v7028_v53 = vld [vmem:[%s6762_s29 + $0x80] sm:$0xff]  }
  0x4b   : > { %v462_v61 = vor.u32 %v460_v52, %v458_v43 }
  0x4d   : > { %5469 = vmatmul.mubr.msk.bf16.gmra.mrb[24].mxu1 %vm513_vm3, %v419_v9  ;;  %v448_v9 = vshll.u32 %v6948_v62, 16 }
  0x4e   : > { %677 = vmatprep.mubr.bf16.mxu1 %v6700_v7  ;;  %5577 = vmatmul.mubr.msk.bf16.gmra.mrb[24].mxu0 %vm513_vm3, %v2038_v24 }
  0x4f   : > { %2305 = vmatprep.mubr.bf16.mxu0 %v6700_v7  ;;  %v450_v24 = vrot.slane %v448_v9, 1  ;;  %v467_v9 = vsel %vm359_vm1, %v462_v61, %v466_v3 }
  0x51   : > { %v451_v30 = vsel %vm359_vm1, %v446_v23, %v450_v24  ;;  %v454_v42 = vor.u32 %v452_v32, %v450_v24  ;;  %v2099_v24 = vrot.slane %v2097_v8, 2 }
  0x55   : > { %5470 = vmatmul.mubr.msk.bf16.gmra.mrb[28].mxu1 %vm513_vm3, %v427_v37  ;;  %v2081_v37 = vrot.slane %v2079_v29, 2  ;;  %v474_v29 = vrot.slane %v472_v17, 1 }
  0x56   : > { %687 = vmatprep.mubr.bf16.mxu1 %v6700_v7  ;;  %5578 = vmatmul.mubr.msk.bf16.gmra.mrb[28].mxu0 %vm513_vm3, %v2047_v41  ;;  %v6976_v41 = vld [vmem:[%s6762_s29 + $0x70] sm:$0xff]  }
  0x57   : > { %2315 = vmatprep.mubr.bf16.mxu0 %v6700_v7  ;;  %v2082_v46 = vor.u32 %v2081_v37, %v2078_v36  ;;  %v2085_v48 = vshrl.u32 %v6976_v41, 16  ;;  %v2088_v50 = vshll.u32 %v6976_v41, 16  ;;  %v476_v37 = vshrl.u32 %v6996_v4, 16 }
  0x59   : > { %v2087_v55 = vrot.slane %v2085_v48, 1  ;;  %v2090_v56 = vrot.slane %v2088_v50, 2  ;;  %v7024_v50 = vld [vmem:[%s6762_s29 + $0x88] sm:$0xff]  }
  0x5b   : > { %v2091_v5 = vor.u32 %v2090_v56, %v2087_v55  ;;  %v2112_v55 = vshrl.u32 %v7024_v50, 16  ;;  %v2115_v56 = vshll.u32 %v7024_v50, 16 }
  0x5d   : > { %5471 = vmatmul.mubr.msk.bf16.gmra.mrb[32].mxu1 %vm513_vm3, %v435_v51  ;;  %v459_v51 = vsel %vm359_vm1, %v454_v42, %v458_v43  ;;  %v2092_v18 = vsel %vm1967_vm2, %v2082_v46, %v2091_v5  ;;  %v2114_v8 = vrot.slane %v2112_v55, 1 }
  0x5e   : > { %697 = vmatprep.mubr.bf16.mxu1 %v6700_v7  ;;  %5579 = vmatmul.mubr.msk.bf16.gmra.mrb[32].mxu0 %vm513_vm3, %v2056_v54  ;;  %v2083_v54 = vsel %vm1967_vm2, %v2073_v27, %v2082_v46  ;;  %v7008_v27 = vld [vmem:[%s6762_s29 + $0x80] sm:$0xff]  }
  0x5f   : > { %2325 = vmatprep.mubr.bf16.mxu0 %v6700_v7  ;;  %v2103_v34 = vshrl.u32 %v7008_v27, 16 }
  0x61   : > { %v2105_v46 = vrot.slane %v2103_v34, 1  ;;  %v492_v34 = vshrl.u32 %v7028_v53, 16 }
  0x65   : > { %5472 = vmatmul.mubr.msk.bf16.gmra.mrb[36].mxu1 %vm513_vm3, %v443_v6  ;;  %v2094_v6 = vshrl.u32 %v6992_v59, 16 }
  0x66   : > { %707 = vmatprep.mubr.bf16.mxu1 %v6700_v7  ;;  %5580 = vmatmul.mubr.msk.bf16.gmra.mrb[36].mxu0 %vm513_vm3, %v2065_v11  ;;  %v468_v11 = vshrl.u32 %v6980_v45, 16 }
  0x67   : > { %2335 = vmatprep.mubr.bf16.mxu0 %v6700_v7  ;;  %v2096_v23 = vrot.slane %v2094_v6, 1 }
  0x68   : > { %v470_v28 = vor.u32 %v468_v11, %v466_v3  ;;  %v7040_v11 = vld [vmem:[%s6762_s29 + $0x90] sm:$0xff]  }
  0x69   : > { %v2100_v32 = vor.u32 %v2099_v24, %v2096_v23  ;;  %v7044_v23 = vld [vmem:[%s6762_s29 + $0x88] sm:$0xff]  }
  0x6a   : > { %v475_v36 = vsel %vm359_vm1, %v470_v28, %v474_v29  ;;  %v2121_v28 = vshrl.u32 %v7040_v11, 16 }
  0x6b   : > { %v2101_v43 = vsel %vm1967_vm2, %v2091_v5, %v2100_v32  ;;  %v488_v5 = vshll.u32 %v7028_v53, 16 }
  0x6d   : > { %5473 = vmatmul.mubr.msk.bf16.gmra.mrb[40].mxu1 %vm513_vm3, %v451_v30  ;;  %v7012_v30 = vld [vmem:[%s6762_s29 + $0x78] sm:$0xff]  }
  0x6e   : > { %717 = vmatprep.mubr.bf16.mxu1 %v6700_v7  ;;  %5581 = vmatmul.mubr.msk.bf16.gmra.mrb[40].mxu0 %vm513_vm3, %v2074_v35  ;;  %v2106_v35 = vshll.u32 %v7008_v27, 16  ;;  %v480_v42 = vshll.u32 %v7012_v30, 16  ;;  %v484_v3 = vshrl.u32 %v7012_v30, 16 }
  0x6f   : > { %2345 = vmatprep.mubr.bf16.mxu0 %v6700_v7 }
  0x70   : > { %v2108_v48 = vrot.slane %v2106_v35, 2  ;;  %v482_v52 = vrot.slane %v480_v42, 1  ;;  %v496_v35 = vshll.u32 %v7044_v23, 16 }
  0x72   : > { %v486_v17 = vor.u32 %v484_v3, %v482_v52 }
  0x75   : > { %5474 = vmatmul.mubr.msk.bf16.gmra.mrb[44].mxu1 %vm513_vm3, %v459_v51  ;;  %v478_v51 = vor.u32 %v476_v37, %v474_v29  ;;  %v2124_v29 = vshll.u32 %v7040_v11, 16  ;;  %v2123_v37 = vrot.slane %v2121_v28, 1 }
  0x76   : > { %727 = vmatprep.mubr.bf16.mxu1 %v6700_v7  ;;  %5582 = vmatmul.mubr.msk.bf16.gmra.mrb[44].mxu0 %vm513_vm3, %v2083_v54  ;;  %v2109_v54 = vor.u32 %v2108_v48, %v2105_v46  ;;  %v498_v48 = vrot.slane %v496_v35, 1  ;;  %v2496_v35 = vrot.slane %v6782_v21, 2  ;;  %v2498_v21 = vrot.slane %v6793_v31, 2 }
  0x77   : > { %2355 = vmatprep.mubr.bf16.mxu0 %v6700_v7  ;;  %v483_v61 = vsel %vm359_vm1, %v478_v51, %v482_v52  ;;  %v2126_v42 = vrot.slane %v2124_v29, 2  ;;  %v7060_v51 = vld [vmem:[%s6762_s29 + $0x90] ss:$0 sps:$4 sm:$0x11]   ;;  %v2488_v29 = vld [vmem:[%s6762_s29 + $0x8] sm:$0xc] }
  0x78   : > { %v2110_v6 = vsel %vm1967_vm2, %v2100_v32, %v2109_v54  ;;  %v504_v3 = vshll.u32 %v7060_v51, 16 }
  0x79   : > { %v2127_v52 = vor.u32 %v2126_v42, %v2123_v37  ;;  %v2500_v42 = vrot.slane %v6801_v44, 2 }
  0x7b   : > { %v2501_v44 = vsel %vm2494_vm4, %v2498_v21, %v2500_v42 }
  0x7d   : > { %5475 = vmatmul.mubr.msk.bf16.gmra.mrb[48].mxu1 %vm513_vm3, %v467_v9  ;;  %v2117_v9 = vrot.slane %v2115_v56, 2 }
  0x7e   : > { %737 = vmatprep.mubr.bf16.mxu1 %v6700_v7  ;;  %5583 = vmatmul.mubr.msk.bf16.gmra.mrb[48].mxu0 %vm513_vm3, %v2092_v18  ;;  %v490_v18 = vrot.slane %v488_v5, 1 }
  0x7f   : > { %2365 = vmatprep.mubr.bf16.mxu0 %v6700_v7  ;;  %v2118_v24 = vor.u32 %v2117_v9, %v2114_v8 }
  0x80   : > { %v491_v32 = vsel %vm359_vm1, %v486_v17, %v490_v18  ;;  %v494_v46 = vor.u32 %v492_v34, %v490_v18  ;;  %v506_v17 = vrot.slane %v504_v3, 1 }
  0x81   : > { %v2128_v5 = vsel %vm1967_vm2, %v2118_v24, %v2127_v52 }
  0x82   : > { %v499_v56 = vsel %vm359_vm1, %v494_v46, %v498_v48 }
  0x85   : > { %5476 = vmatmul.mubr.msk.bf16.gmra.mrb[52].mxu1 %vm513_vm3, %v475_v36  ;;  %v2119_v36 = vsel %vm1967_vm2, %v2109_v54, %v2118_v24  ;;  %v5590_v24 = vcombine.low %v2488_v29, %v6773_v16  ;;  %v1048_v29 = vld [vmem:[%s6762_s29] sm:$0xe] }
  0x86   : > { %747 = vmatprep.mubr.bf16.mxu1 %v6700_v7  ;;  %5584 = vmatmul.mubr.msk.bf16.gmra.mrb[52].mxu0 %vm513_vm3, %v2101_v43  ;;  %v7056_v43 = vld [vmem:[%s6762_s29 + $0x98] ss:$0 sps:$4 sm:$0x33]  }
  0x87   : > { %2375 = vmatprep.mubr.bf16.mxu0 %v6700_v7  ;;  %v2130_v55 = vshrl.u32 %v7056_v43, 16  ;;  %v2133_v54 = vshll.u32 %v7056_v43, 16  ;;  %v2495_v34 = vrot.slane %v5590_v24, 2  ;;  %v6670_v24 = vld [vmem:[%s6762_s29 + $0x4] sm:$0xf] }
  0x89   : > { %v2135_v8 = vrot.slane %v2133_v54, 2  ;;  %v2497_v37 = vsel %vm2494_vm4, %v2495_v34, %v2496_v35  ;;  %v5503_v34 = vcombine.low %v1048_v29, %v6670_v24  ;;  %v1066_v29 = vrot.slane %v6855_v33, 1 }
  0x8d   : > { %5477 = vmatmul.mubr.msk.bf16.gmra.mrb[56].mxu1 %vm513_vm3, %v483_v61  ;;  %v500_v61 = vshrl.u32 %v7044_v23, 16 }
  0x8e   : > { %757 = vmatprep.mubr.bf16.mxu1 %v6700_v7  ;;  %5585 = vmatmul.mubr.msk.bf16.gmra.mrb[56].mxu0 %vm513_vm3, %v2110_v6  ;;  %v2132_v6 = vrot.slane %v2130_v55, 1  ;;  %v2502_v55 = vrot.slane %v6819_v60, 2 }
  0x8f   : > { %2385 = vmatprep.mubr.bf16.mxu0 %v6700_v7  ;;  %v502_v9 = vor.u32 %v500_v61, %v498_v48 }
  0x90   : > { %v2136_v18 = vor.u32 %v2135_v8, %v2132_v6  ;;  %v2503_v54 = vsel %vm2494_vm4, %v2500_v42, %v2502_v55 }
  0x91   : > { %v507_v28 = vsel %vm359_vm1, %v502_v9, %v506_v17 }
  0x95   : > { %5478 = vmatmul.mubr.msk.bf16.gmra.mrb[60].mxu1 %vm513_vm3, %v491_v32  ;;  %v2137_v32 = vsel %vm1967_vm2, %v2127_v52, %v2136_v18 }
  0x96   : > { %767 = vmatprep.mubr.bf16.mxu1 %v6700_v7  ;;  %5586 = vmatmul.mubr.msk.bf16.gmra.mrb[60].mxu0 %vm513_vm3, %v2119_v36  ;;  %v5632_v36 = vcombine.low %v6898_v2, %v6898_v2  ;;  %v2499_v2 = vsel %vm2494_vm4, %v2496_v35, %v2498_v21  ;;  %v2882_v35 = vld [vmem:[%s6762_s29 + $0x10] sm:$0xc]  ;;  %v6671_v21 = vld [vmem:[%s6762_s29 + $0x8] sm:$0xff]  }
  0x97   : > { %2395 = vmatprep.mubr.bf16.mxu0 %v6700_v7 }
  0x98   : > { %v3111_v16 = vsel %vm568_vm0, %v5632_v36, 0  ;;  %v7222_v36 = vld [vmem:[%s6762_s29 + $0x14] sm:$0xf] }
  0x9d   : > { %5479 = vmatmul.mubr.msk.bf16.gmra.mrb[64].mxu1 %vm513_vm3, %v499_v56 }
  0x9e   : > { %777 = vmatprep.mubr.bf16.mxu1 %v6700_v7  ;;  %5587 = vmatmul.mubr.msk.bf16.gmra.mrb[64].mxu0 %vm513_vm3, %v2128_v5 }
  0x9f   : > { %2405 = vmatprep.mubr.bf16.mxu0 %v6700_v7 }
  0xa5   : > { %5480 = vmatmul.mubr.msk.bf16.gmra.mrb[68].mxu1 %vm513_vm3, %v507_v28  ;;  %v2528_v28 = vrot.slane %v7040_v11, 2 }
  0xa6   : > { %867 = vmatprep.mubr.bf16.mxu1 %v6700_v7  ;;  %5588 = vmatmul.mubr.msk.bf16.gmra.mrb[68].mxu0 %vm513_vm3, %v2137_v32  ;;  %v2530_v32 = vrot.slane %v7056_v43, 2  ;;  %v1055_v43 = vrot.slane %v5503_v34, 1  ;;  %v7314_v34 = vld [vmem:[%s6762_s29 + $0x48] sm:$0xff]  }
  0xa7   : > { %2629 = vmatprep.mubr.bf16.mxu0 %v6700_v7 }
  0xa8   : > { %v2531_v11 = vsel %vm2494_vm4, %v2528_v28, %v2530_v32 }
  0xad   : > { %5484 = vmatmul.mubr.msk.bf16.vlgmr.msra.gmra.mrb[0].mxu1 %vm513_vm3, %v6766_v13  ;;  %v5502_v13 = vld [vmem:[%s8692_s1 + $0x10] sm:$0xff] }
  0xae   : > { %877 = vmatprep.mubr.bf16.mxu1 %v6700_v7  ;;  %5594 = vmatmul.mubr.msk.bf16.vlgmr.msra.gmra.mrb[0].mxu0 %vm513_vm3, %v2497_v37  ;;  %v5505_v46 = vcombine.high %v5502_v13, %v5502_v13  ;;  %v5504_v48 = vcombine.low %v5502_v13, %v5502_v13  ;;  %v7228_v37 = vcombine.low %v2882_v35, %v7222_v36  ;;  %v1068_v35 = vrot.slane %v6871_v47, 1 }
  0xaf   : > { %3117 = vmatpush1.bf16.msra.mxu0 %v3111_v16  ;;  %2639 = vmatprep.mubr.bf16.mxu0 %v6700_v7  ;;  %v7231_v16 = vld [vmem:[%s6762_s29 + $0x18] sm:$0xff]  }
  0xb0   : > { %5506 = vmatprep.subr.msk.bf16.mxu1 %vm568_vm0, %v5505_v46  ;;  %v1152_v52 = vsel %vm568_vm0, %v5504_v48, 0  ;;  %v3014_v13 = vrot.slane %v7228_v37, 2  ;;  %v3015_v42 = vrot.slane %v7231_v16, 2 }
  0xb1   : > { %1158 = vmatpush1.bf16.msra.mxu1 %v1152_v52  ;;  %v7245_v52 = vld [vmem:[%s6762_s29 + $0x20] sm:$0xff]  }
  0xb5   : > { %5485 = vmatmul.mubr.msk.bf16.gmra.mrb[4].mxu1 %vm513_vm3, %v6769_v14  ;;  %v7106_v14 = vld [vmem:[%s8692_s1 + $0x38] sm:$0xff] }
  0xb6   : > { %887 = vmatprep.mubr.bf16.mxu1 %v6700_v7  ;;  %5595 = vmatmul.mubr.msk.bf16.gmra.mrb[4].mxu0 %vm513_vm3, %v2499_v2  ;;  %v5656_v31 = vcombine.high %v7106_v14, %v7106_v14  ;;  %v1056_v2 = vrot.slane %v6671_v21, 1  ;;  %v5655_v48 = vcombine.low %v7106_v14, %v7106_v14  ;;  %v3017_v14 = vrot.slane %v7245_v52, 2  ;;  %v7325_v21 = vld [vmem:[%s6762_s29 + $0x50] sm:$0xff]  }
  0xb7   : > { %2649 = vmatprep.mubr.bf16.mxu0 %v6700_v7 }
  0xb8   : > { %5657 = vmatprep.subr.msk.bf16.mxu0 %vm568_vm0, %v5656_v31  ;;  %v1057_v46 = vsel %vm1054_vm5, %v1055_v43, %v1056_v2  ;;  %v3016_v31 = vsel %vm2494_vm4, %v3014_v13, %v3015_v42 }
  0xbd   : > { %5486 = vmatmul.mubr.msk.bf16.gmra.mrb[8].mxu1 %vm513_vm3, %v6785_v22  ;;  %v2504_v22 = vrot.slane %v6835_v10, 2 }
  0xbe   : > { %897 = vmatprep.mubr.bf16.mxu1 %v6700_v7  ;;  %5596 = vmatmul.mubr.msk.bf16.gmra.mrb[8].mxu0 %vm513_vm3, %v2501_v44  ;;  %v3638_v44 = vsel %vm568_vm0, %v5655_v48, 0  ;;  %v1072_v48 = vrot.slane %v6893_v1, 1 }
  0xbf   : > { %2659 = vmatprep.mubr.bf16.mxu0 %v6700_v7  ;;  %v2505_v56 = vsel %vm2494_vm4, %v2502_v55, %v2504_v22  ;;  %v6672_v55 = vld [vmem:[%s6762_s29 + $0x10] sm:$0xff]  }
  0xc5   : > { %5487 = vmatmul.mubr.msk.bf16.gmra.mrb[12].mxu1 %vm513_vm3, %v6806_v49  ;;  %v2506_v49 = vrot.slane %v6849_v26, 2  ;;  %v2510_v26 = vrot.slane %v6883_v58, 2  ;;  %v2514_v58 = vrot.slane %v6926_v38, 2  ;;  %v2518_v38 = vrot.slane %v6960_v19, 2 }
  0xc6   : > { %907 = vmatprep.mubr.bf16.mxu1 %v6700_v7  ;;  %5597 = vmatmul.mubr.msk.bf16.gmra.mrb[12].mxu0 %vm513_vm3, %v2503_v54  ;;  %v2522_v19 = vrot.slane %v6992_v59, 2  ;;  %v2526_v59 = vrot.slane %v7024_v50, 2  ;;  %v1058_v54 = vrot.slane %v6672_v55, 1  ;;  %v7347_v55 = vld [vmem:[%s6762_s29 + $0x60] sm:$0xff]  }
  0xc7   : > { %2669 = vmatprep.mubr.bf16.mxu0 %v6700_v7  ;;  %v2507_v60 = vsel %vm2494_vm4, %v2504_v22, %v2506_v49 }
  0xc8   : > { %v2529_v50 = vsel %vm2494_vm4, %v2526_v59, %v2528_v28  ;;  %v1059_v22 = vsel %vm1054_vm5, %v1056_v2, %v1058_v54  ;;  %v1070_v2 = vrot.slane %v6890_v0, 1 }
  0xca   : > { %v1071_v13 = vsel %vm1054_vm5, %v1068_v35, %v1070_v2 }
  0xcd   : > { %5488 = vmatmul.mubr.msk.bf16.gmra.mrb[16].mxu1 %vm513_vm3, %v6823_v63  ;;  %v2508_v63 = vrot.slane %v6865_v40, 2  ;;  %v2512_v40 = vrot.slane %v6908_v12, 2  ;;  %v2516_v12 = vrot.slane %v6944_v57, 2  ;;  %v2520_v57 = vrot.slane %v6976_v41, 2 }
  0xce   : > { %917 = vmatprep.mubr.bf16.mxu1 %v6700_v7  ;;  %5598 = vmatmul.mubr.msk.bf16.gmra.mrb[16].mxu0 %vm513_vm3, %v2505_v56  ;;  %v2524_v41 = vrot.slane %v7008_v27, 2  ;;  %v3018_v56 = vsel %vm2494_vm4, %v3015_v42, %v3017_v14 }
  0xcf   : > { %2679 = vmatprep.mubr.bf16.mxu0 %v6700_v7  ;;  %v2509_v10 = vsel %vm2494_vm4, %v2506_v49, %v2508_v63  ;;  %v2511_v61 = vsel %vm2494_vm4, %v2508_v63, %v2510_v26  ;;  %v2513_v3 = vsel %vm2494_vm4, %v2510_v26, %v2512_v40  ;;  %v2515_v5 = vsel %vm2494_vm4, %v2512_v40, %v2514_v58  ;;  %v7257_v49 = vld [vmem:[%s6762_s29 + $0x28] sm:$0xff]  }
  0xd0   : > { %v2517_v6 = vsel %vm2494_vm4, %v2514_v58, %v2516_v12  ;;  %v2519_v8 = vsel %vm2494_vm4, %v2516_v12, %v2518_v38  ;;  %v2521_v9 = vsel %vm2494_vm4, %v2518_v38, %v2520_v57  ;;  %v2523_v17 = vsel %vm2494_vm4, %v2520_v57, %v2522_v19  ;;  %v7281_v38 = vld [vmem:[%s6762_s29 + $0x30] sm:$0xff]  }
  0xd1   : > { %v2525_v18 = vsel %vm2494_vm4, %v2522_v19, %v2524_v41  ;;  %v2527_v27 = vsel %vm2494_vm4, %v2524_v41, %v2526_v59  ;;  %v3019_v26 = vrot.slane %v7257_v49, 2  ;;  %v7292_v41 = vld [vmem:[%s6762_s29 + $0x38] sm:$0xff]  }
  0xd2   : > { %v3023_v59 = vrot.slane %v7292_v41, 2 }
  0xd5   : > { %5489 = vmatmul.mubr.msk.bf16.gmra.mrb[20].mxu1 %vm513_vm3, %v6839_v15 }
  0xd6   : > { %927 = vmatprep.mubr.bf16.mxu1 %v6700_v7  ;;  %5599 = vmatmul.mubr.msk.bf16.gmra.mrb[20].mxu0 %vm513_vm3, %v2507_v60  ;;  %v6673_v60 = vld [vmem:[%s6762_s29 + $0x18] sm:$0xff]  }
  0xd7   : > { %2689 = vmatprep.mubr.bf16.mxu0 %v6700_v7  ;;  %v1060_v63 = vrot.slane %v6673_v60, 1  ;;  %v1076_v60 = vrot.slane %v6948_v62, 1 }
  0xd9   : > { %v1061_v58 = vsel %vm1054_vm5, %v1058_v54, %v1060_v63  ;;  %v1074_v54 = vrot.slane %v6929_v39, 1 }
  0xdd   : > { %5490 = vmatmul.mubr.msk.bf16.gmra.mrb[24].mxu1 %vm513_vm3, %v6855_v33  ;;  %v3027_v33 = vrot.slane %v7314_v34, 2 }
  0xde   : > { %937 = vmatprep.mubr.bf16.mxu1 %v6700_v7  ;;  %5600 = vmatmul.mubr.msk.bf16.gmra.mrb[24].mxu0 %vm513_vm3, %v2509_v10  ;;  %v5525_v10 = vld [vmem:[%s8692_s1 + $0x18] sm:$0xff] }
  0xdf   : > { %2699 = vmatprep.mubr.bf16.mxu0 %v6700_v7  ;;  %v5545_v40 = vcombine.low %v5525_v10, %v5525_v10 }
  0xe1   : > { %v1671_v12 = vsel %vm568_vm0, %v5545_v40, 0 }
  0xe5   : > { %5491 = vmatmul.mubr.msk.bf16.gmra.mrb[28].mxu1 %vm513_vm3, %v6871_v47  ;;  %v3029_v47 = vrot.slane %v7325_v21, 2 }
  0xe6   : > { %947 = vmatprep.mubr.bf16.mxu1 %v6700_v7  ;;  %5601 = vmatmul.mubr.msk.bf16.gmra.mrb[28].mxu0 %vm513_vm3, %v2511_v61  ;;  %v5546_v61 = vcombine.high %v5525_v10, %v5525_v10 }
  0xe7   : > { %2709 = vmatprep.mubr.bf16.mxu0 %v6700_v7  ;;  %v3030_v42 = vsel %vm2494_vm4, %v3027_v33, %v3029_v47 }
  0xe8   : > { %5547 = vmatprep.subr.msk.bf16.mxu1 %vm568_vm0, %v5546_v61  ;;  %v1078_v61 = vrot.slane %v6964_v25, 1 }
  0xea   : > { %v1079_v40 = vsel %vm1054_vm5, %v1076_v60, %v1078_v61 }
  0xed   : > { %5492 = vmatmul.mubr.msk.bf16.gmra.mrb[32].mxu1 %vm513_vm3, %v6890_v0 }
  0xee   : > { %957 = vmatprep.mubr.bf16.mxu1 %v6700_v7  ;;  %5602 = vmatmul.mubr.msk.bf16.gmra.mrb[32].mxu0 %vm513_vm3, %v2513_v3  ;;  %v7270_v3 = vld [vmem:[%s8692_s1 + $0x40] sm:$0xff] }
  0xef   : > { %2719 = vmatprep.mubr.bf16.mxu0 %v6700_v7 }
  0xf5   : > { %5493 = vmatmul.mubr.msk.bf16.gmra.mrb[36].mxu1 %vm513_vm3, %v6893_v1  ;;  %v3033_v1 = vrot.slane %v7347_v55, 2 }
  0xf6   : > { %967 = vmatprep.mubr.bf16.mxu1 %v6700_v7  ;;  %5603 = vmatmul.mubr.msk.bf16.gmra.mrb[36].mxu0 %vm513_vm3, %v2515_v5  ;;  %v5679_v5 = vcombine.high %v7270_v3, %v7270_v3 }
  0xf7   : > { %2729 = vmatprep.mubr.bf16.mxu0 %v6700_v7 }
  0xfd   : > { %5494 = vmatmul.mubr.msk.bf16.gmra.mrb[40].mxu1 %vm513_vm3, %v6929_v39 }
  0xfe   : > { %977 = vmatprep.mubr.bf16.mxu1 %v6700_v7  ;;  %5604 = vmatmul.mubr.msk.bf16.gmra.mrb[40].mxu0 %vm513_vm3, %v2517_v6  ;;  %v3020_v6 = vsel %vm2494_vm4, %v3017_v14, %v3019_v26  ;;  %v1075_v14 = vsel %vm1054_vm5, %v1072_v48, %v1074_v54 }
  0xff   : > { %2739 = vmatprep.mubr.bf16.mxu0 %v6700_v7 }
 0x105   : > { %5495 = vmatmul.mubr.msk.bf16.gmra.mrb[44].mxu1 %vm513_vm3, %v6948_v62 }
 0x106   : > { %987 = vmatprep.mubr.bf16.mxu1 %v6700_v7  ;;  %5605 = vmatmul.mubr.msk.bf16.gmra.mrb[44].mxu0 %vm513_vm3, %v2519_v8  ;;  %v6674_v8 = vld [vmem:[%s6762_s29 + $0x20] sm:$0xff]  }
 0x107   : > { %2749 = vmatprep.mubr.bf16.mxu0 %v6700_v7  ;;  %v1062_v57 = vrot.slane %v6674_v8, 1 }
 0x109   : > { %v1063_v19 = vsel %vm1054_vm5, %v1060_v63, %v1062_v57  ;;  %v1077_v63 = vsel %vm1054_vm5, %v1074_v54, %v1076_v60  ;;  %v6675_v60 = vld [vmem:[%s6762_s29 + $0x10] sm:$0xff]  }
 0x10d   : > { %5496 = vmatmul.mubr.msk.bf16.gmra.mrb[48].mxu1 %vm513_vm3, %v6964_v25 }
 0x10e   : > { %997 = vmatprep.mubr.bf16.mxu1 %v6700_v7  ;;  %5606 = vmatmul.mubr.msk.bf16.gmra.mrb[48].mxu0 %vm513_vm3, %v2521_v9  ;;  %v3021_v9 = vrot.slane %v7281_v38, 2 }
 0x10f   : > { %2759 = vmatprep.mubr.bf16.mxu0 %v6700_v7 }
 0x110   : > { %v3024_v28 = vsel %vm2494_vm4, %v3021_v9, %v3023_v59 }
 0x115   : > { %5497 = vmatmul.mubr.msk.bf16.gmra.mrb[52].mxu1 %vm513_vm3, %v6980_v45 }
 0x116   : > { %1007 = vmatprep.mubr.bf16.mxu1 %v6700_v7  ;;  %5607 = vmatmul.mubr.msk.bf16.gmra.mrb[52].mxu0 %vm513_vm3, %v2523_v17  ;;  %v3022_v17 = vsel %vm2494_vm4, %v3019_v26, %v3021_v9  ;;  %v7369_v26 = vld [vmem:[%s6762_s29 + $0x70] sm:$0xff]   ;;  %v1082_v9 = vrot.slane %v6996_v4, 1 }
 0x117   : > { %2769 = vmatprep.mubr.bf16.mxu0 %v6700_v7  ;;  %v3037_v62 = vrot.slane %v7369_v26, 2 }
 0x11d   : > { %5498 = vmatmul.mubr.msk.bf16.gmra.mrb[56].mxu1 %vm513_vm3, %v6996_v4 }
 0x11e   : > { %1017 = vmatprep.mubr.bf16.mxu1 %v6700_v7  ;;  %5608 = vmatmul.mubr.msk.bf16.gmra.mrb[56].mxu0 %vm513_vm3, %v2525_v18  ;;  %v1064_v18 = vrot.slane %v6839_v15, 1 }
 0x11f   : > { %2779 = vmatprep.mubr.bf16.mxu0 %v6700_v7 }
 0x120   : > { %v1067_v32 = vsel %vm1054_vm5, %v1064_v18, %v1066_v29 }
 0x125   : > { %5499 = vmatmul.mubr.msk.bf16.gmra.mrb[60].mxu1 %vm513_vm3, %v7012_v30 }
 0x126   : > { %1027 = vmatprep.mubr.bf16.mxu1 %v6700_v7  ;;  %5609 = vmatmul.mubr.msk.bf16.gmra.mrb[60].mxu0 %vm513_vm3, %v2527_v27  ;;  %v1065_v27 = vsel %vm1054_vm5, %v1062_v57, %v1064_v18  ;;  %v7391_v57 = vld [vmem:[%s6762_s29 + $0x80] sm:$0xff]   ;;  %v7402_v18 = vld [vmem:[%s6762_s29 + $0x88] sm:$0xff]  }
 0x127   : > { %2789 = vmatprep.mubr.bf16.mxu0 %v6700_v7  ;;  %v3043_v4 = vrot.slane %v7402_v18, 2 }
 0x12d   : > { %5500 = vmatmul.mubr.msk.bf16.gmra.mrb[64].mxu1 %vm513_vm3, %v7028_v53 }
 0x12e   : > { %1037 = vmatprep.mubr.bf16.mxu1 %v6700_v7  ;;  %5610 = vmatmul.mubr.msk.bf16.gmra.mrb[64].mxu0 %vm513_vm3, %v2529_v50  ;;  %v7303_v50 = vld [vmem:[%s6762_s29 + $0x40] sm:$0xff]  }
 0x12f   : > { %2799 = vmatprep.mubr.bf16.mxu0 %v6700_v7  ;;  %v3025_v15 = vrot.slane %v7303_v50, 2 }
 0x131   : > { %v3026_v24 = vsel %vm2494_vm4, %v3023_v59, %v3025_v15  ;;  %v3028_v43 = vsel %vm2494_vm4, %v3025_v15, %v3027_v33  ;;  %v1084_v59 = vrot.slane %v7012_v30, 1  ;;  %v1086_v30 = vrot.slane %v7028_v53, 1 }
 0x132   : > { %v1088_v33 = vrot.slane %v7044_v23, 1 }
 0x135   : > { %5501 = vmatmul.mubr.msk.bf16.gmra.mrb[68].mxu1 %vm513_vm3, %v7044_v23 }
 0x136   : > { %1189 = vmatprep.mubr.bf16.mxu1 %v6700_v7  ;;  %5611 = vmatmul.mubr.msk.bf16.gmra.mrb[68].mxu0 %vm513_vm3, %v2531_v11  ;;  %v1069_v11 = vsel %vm1054_vm5, %v1066_v29, %v1068_v35  ;;  %v7413_v29 = vld [vmem:[%s6762_s29 + $0x90] sm:$0xff]   ;;  %v7424_v35 = vld [vmem:[%s6762_s29 + $0x98] sm:$0xff]  }
 0x137   : > { %3148 = vmatprep.mubr.bf16.mxu0 %v6700_v7  ;;  %v3045_v15 = vrot.slane %v7413_v29, 2  ;;  %v3047_v53 = vrot.slane %v7424_v35, 2 }
 0x13d   : > { %5507 = vmatmul.mubr.msk.bf16.vlgmr.msra.gmra.mrb[0].mxu1 %vm513_vm3, %v1057_v46  ;;  %v7336_v46 = vld [vmem:[%s6762_s29 + $0x58] sm:$0xff]  }
 0x13e   : > { %1199 = vmatprep.mubr.bf16.mxu1 %v6700_v7  ;;  %5635 = vmatmul.mubr.msk.bf16.vlgmr.msra.gmra.mrb[0].mxu0 %vm513_vm3, %v3016_v31  ;;  %v3031_v0 = vrot.slane %v7336_v46, 2  ;;  %v1073_v31 = vsel %vm1054_vm5, %v1070_v2, %v1072_v48  ;;  %v3048_v2 = vsel %vm2494_vm4, %v3045_v15, %v3047_v53  ;;  %v3417_v48 = vshrl.u32 %v7231_v16, 16 }
 0x13f   : > { %3644 = vmatpush1.bf16.msra.mxu0 %v3638_v44  ;;  %3158 = vmatprep.mubr.bf16.mxu0 %v6700_v7 }
 0x140   : > { %1677 = vmatpush1.bf16.msra.mxu1 %v1671_v12  ;;  %5680 = vmatprep.subr.msk.bf16.mxu0 %vm568_vm0, %v5679_v5  ;;  %v3032_v44 = vsel %vm2494_vm4, %v3029_v47, %v3031_v0  ;;  %v7380_v5 = vld [vmem:[%s6762_s29 + $0x78] sm:$0xff]   ;;  %v1080_v12 = vrot.slane %v6980_v45, 1  ;;  %v3041_v45 = vrot.slane %v7391_v57, 2  ;;  %v1090_v47 = vrot.slane %v7060_v51, 1 }
 0x141   : > { %v3039_v25 = vrot.slane %v7380_v5, 2 }
 0x143   : > { %v3040_v8 = vsel %vm2494_vm4, %v3037_v62, %v3039_v25 }
 0x145   : > { %5508 = vmatmul.mubr.msk.bf16.gmra.mrb[4].mxu1 %vm513_vm3, %v1059_v22  ;;  %v3034_v22 = vsel %vm2494_vm4, %v3031_v0, %v3033_v1  ;;  %v3420_v0 = vshll.u32 %v7231_v16, 16 }
 0x146   : > { %1209 = vmatprep.mubr.bf16.mxu1 %v6700_v7  ;;  %5636 = vmatmul.mubr.msk.bf16.gmra.mrb[4].mxu0 %vm513_vm3, %v3018_v56  ;;  %v7358_v56 = vld [vmem:[%s6762_s29 + $0x68] sm:$0xff]  }
 0x147   : > { %3168 = vmatprep.mubr.bf16.mxu0 %v6700_v7  ;;  %v3035_v39 = vrot.slane %v7358_v56, 2 }
 0x149   : > { %v3036_v10 = vsel %vm2494_vm4, %v3033_v1, %v3035_v39  ;;  %v3419_v1 = vrot.slane %v3417_v48, 2 }
 0x14d   : > { %5509 = vmatmul.mubr.msk.bf16.gmra.mrb[8].mxu1 %vm513_vm3, %v1061_v58  ;;  %v3038_v58 = vsel %vm2494_vm4, %v3035_v39, %v3037_v62 }
 0x14e   : > { %1219 = vmatprep.mubr.bf16.mxu1 %v6700_v7  ;;  %5637 = vmatmul.mubr.msk.bf16.gmra.mrb[8].mxu0 %vm513_vm3, %v3020_v6  ;;  %v1081_v6 = vsel %vm1054_vm5, %v1078_v61, %v1080_v12  ;;  %v3429_v61 = vshll.u32 %v7245_v52, 16 }
 0x14f   : > { %3178 = vmatprep.mubr.bf16.mxu0 %v6700_v7 }
 0x155   : > { %5510 = vmatmul.mubr.msk.bf16.gmra.mrb[12].mxu1 %vm513_vm3, %v1063_v19  ;;  %v1083_v19 = vsel %vm1054_vm5, %v1080_v12, %v1082_v9  ;;  %v3431_v12 = vrot.slane %v3429_v61, 3 }
 0x156   : > { %1229 = vmatprep.mubr.bf16.mxu1 %v6700_v7  ;;  %5638 = vmatmul.mubr.msk.bf16.gmra.mrb[12].mxu0 %vm513_vm3, %v3022_v17  ;;  %v3042_v17 = vsel %vm2494_vm4, %v3039_v25, %v3041_v45 }
 0x157   : > { %3188 = vmatprep.mubr.bf16.mxu0 %v6700_v7 }
 0x15d   : > { %5511 = vmatmul.mubr.msk.bf16.gmra.mrb[16].mxu1 %vm513_vm3, %v1065_v27  ;;  %v1085_v27 = vsel %vm1054_vm5, %v1082_v9, %v1084_v59 }
 0x15e   : > { %1239 = vmatprep.mubr.bf16.mxu1 %v6700_v7  ;;  %5639 = vmatmul.mubr.msk.bf16.gmra.mrb[16].mxu0 %vm513_vm3, %v3024_v28  ;;  %v3044_v28 = vsel %vm2494_vm4, %v3041_v45, %v3043_v4  ;;  %v3438_v45 = vshll.u32 %v7257_v49, 16 }
 0x15f   : > { %3198 = vmatprep.mubr.bf16.mxu0 %v6700_v7 }
 0x165   : > { %5512 = vmatmul.mubr.msk.bf16.gmra.mrb[20].mxu1 %vm513_vm3, %v1067_v32  ;;  %v1087_v32 = vsel %vm1054_vm5, %v1084_v59, %v1086_v30 }
 0x166   : > { %1249 = vmatprep.mubr.bf16.mxu1 %v6700_v7  ;;  %5640 = vmatmul.mubr.msk.bf16.gmra.mrb[20].mxu0 %vm513_vm3, %v3026_v24  ;;  %v3046_v24 = vsel %vm2494_vm4, %v3043_v4, %v3045_v15  ;;  %v3440_v4 = vrot.slane %v3438_v45, 3  ;;  %v3444_v15 = vshrl.u32 %v7281_v38, 16  ;;  %v3483_v45 = vshll.u32 %v7325_v21, 16 }
 0x167   : > { %3208 = vmatprep.mubr.bf16.mxu0 %v6700_v7 }
 0x16d   : > { %5513 = vmatmul.mubr.msk.bf16.gmra.mrb[24].mxu1 %vm513_vm3, %v1069_v11  ;;  %v1089_v11 = vsel %vm1054_vm5, %v1086_v30, %v1088_v33 }
 0x16e   : > { %1259 = vmatprep.mubr.bf16.mxu1 %v6700_v7  ;;  %5641 = vmatmul.mubr.msk.bf16.gmra.mrb[24].mxu0 %vm513_vm3, %v3028_v43  ;;  %v6446_v43 = vld [vmem:[%s6762_s29 + $0xa0] ss:$0 sps:$4 sm:$0x33]  }
 0x16f   : > { %3218 = vmatprep.mubr.bf16.mxu0 %v6700_v7  ;;  %v3049_v23 = vrot.slane %v6446_v43, 2  ;;  %v6678_v43 = vld [vmem:[%s6762_s29 + $0x28] sm:$0xff]  }
 0x175   : > { %5514 = vmatmul.mubr.msk.bf16.gmra.mrb[28].mxu1 %vm513_vm3, %v1071_v13  ;;  %v3409_v13 = vshrl.u32 %v7228_v37, 16 }
 0x176   : > { %1269 = vmatprep.mubr.bf16.mxu1 %v6700_v7  ;;  %5642 = vmatmul.mubr.msk.bf16.gmra.mrb[28].mxu0 %vm513_vm3, %v3030_v42  ;;  %v3412_v42 = vshll.u32 %v7228_v37, 16  ;;  %v1575_v37 = vrot.slane %v6675_v60, 1 }
 0x177   : > { %3228 = vmatprep.mubr.bf16.mxu0 %v6700_v7  ;;  %v3411_v51 = vrot.slane %v3409_v13, 2  ;;  %v3456_v13 = vshll.u32 %v7292_v41, 16 }
 0x178   : > { %v3414_v54 = vrot.slane %v3412_v42, 3 }
 0x17a   : > { %v3415_v39 = vor.u32 %v3414_v54, %v3411_v51 }
 0x17d   : > { %5515 = vmatmul.mubr.msk.bf16.gmra.mrb[32].mxu1 %vm513_vm3, %v1073_v31  ;;  %v1091_v31 = vsel %vm1054_vm5, %v1088_v33, %v1090_v47 }
 0x17e   : > { %1279 = vmatprep.mubr.bf16.mxu1 %v6700_v7  ;;  %5643 = vmatmul.mubr.msk.bf16.gmra.mrb[32].mxu0 %vm513_vm3, %v3032_v44  ;;  %v3050_v44 = vsel %vm2494_vm4, %v3047_v53, %v3049_v23  ;;  %v3446_v53 = vrot.slane %v3444_v15, 2  ;;  %v3453_v23 = vshrl.u32 %v7292_v41, 16  ;;  %v3489_v15 = vshrl.u32 %v7336_v46, 16 }
 0x17f   : > { %3238 = vmatprep.mubr.bf16.mxu0 %v6700_v7 }
 0x185   : > { %5516 = vmatmul.mubr.msk.bf16.gmra.mrb[36].mxu1 %vm513_vm3, %v1075_v14  ;;  %v3422_v14 = vrot.slane %v3420_v0, 3  ;;  %v3455_v0 = vrot.slane %v3453_v23, 2  ;;  %v3498_v23 = vshrl.u32 %v7347_v55, 16 }
 0x186   : > { %1289 = vmatprep.mubr.bf16.mxu1 %v6700_v7  ;;  %5644 = vmatmul.mubr.msk.bf16.gmra.mrb[36].mxu0 %vm513_vm3, %v3034_v22  ;;  %v1574_v22 = vrot.slane %v6779_v20, 1 }
 0x187   : > { %3248 = vmatprep.mubr.bf16.mxu0 %v6700_v7 }
 0x188   : > { %v1576_v62 = vsel %vm1054_vm5, %v1574_v22, %v1575_v37 }
 0x18d   : > { %5517 = vmatmul.mubr.msk.bf16.gmra.mrb[40].mxu1 %vm513_vm3, %v1077_v63  ;;  %v3423_v63 = vor.u32 %v3422_v14, %v3419_v1  ;;  %v3462_v1 = vshrl.u32 %v7303_v50, 16  ;;  %v3465_v14 = vshll.u32 %v7303_v50, 16 }
 0x18e   : > { %1299 = vmatprep.mubr.bf16.mxu1 %v6700_v7  ;;  %5645 = vmatmul.mubr.msk.bf16.gmra.mrb[40].mxu0 %vm513_vm3, %v3036_v10  ;;  %v3426_v10 = vshrl.u32 %v7245_v52, 16 }
 0x18f   : > { %3258 = vmatprep.mubr.bf16.mxu0 %v6700_v7  ;;  %v3424_v20 = vsel %vm3407_vm6, %v3415_v39, %v3423_v63  ;;  %v3467_v39 = vrot.slane %v3465_v14, 3  ;;  %v3510_v14 = vshll.u32 %v7358_v56, 16 }
 0x195   : > { %5518 = vmatmul.mubr.msk.bf16.gmra.mrb[44].mxu1 %vm513_vm3, %v1079_v40  ;;  %v5678_v40 = vcombine.low %v7270_v3, %v7270_v3  ;;  %v3435_v3 = vshrl.u32 %v7257_v49, 16 }
 0x196   : > { %1309 = vmatprep.mubr.bf16.mxu1 %v6700_v7  ;;  %5646 = vmatmul.mubr.msk.bf16.gmra.mrb[44].mxu0 %vm513_vm3, %v3038_v58  ;;  %v3428_v58 = vrot.slane %v3426_v10, 2 }
 0x197   : > { %3268 = vmatprep.mubr.bf16.mxu0 %v6700_v7  ;;  %v4032_v25 = vsel %vm568_vm0, %v5678_v40, 0  ;;  %v3437_v59 = vrot.slane %v3435_v3, 2  ;;  %v3474_v40 = vshll.u32 %v7314_v34, 16  ;;  %v3480_v3 = vshrl.u32 %v7325_v21, 16 }
 0x198   : > { %v3432_v9 = vor.u32 %v3431_v12, %v3428_v58 }
 0x199   : > { %v3441_v30 = vor.u32 %v3440_v4, %v3437_v59  ;;  %v3482_v59 = vrot.slane %v3480_v3, 2  ;;  %v3485_v4 = vrot.slane %v3483_v45, 3  ;;  %v3525_v3 = vshrl.u32 %v7380_v5, 16 }
 0x19a   : > { %v3528_v45 = vshll.u32 %v7380_v5, 16 }
 0x19b   : > { %v3442_v33 = vsel %vm3407_vm6, %v3432_v9, %v3441_v30 }
 0x19d   : > { %5519 = vmatmul.mubr.msk.bf16.gmra.mrb[48].mxu1 %vm513_vm3, %v1081_v6  ;;  %v6676_v6 = vld [vmem:[%s6762_s29 + $0x18] sm:$0xff]  }
 0x19e   : > { %1319 = vmatprep.mubr.bf16.mxu1 %v6700_v7  ;;  %5647 = vmatmul.mubr.msk.bf16.gmra.mrb[48].mxu0 %vm513_vm3, %v3040_v8  ;;  %v1577_v8 = vrot.slane %v6676_v6, 1  ;;  %v6681_v6 = vld [vmem:[%s6762_s29 + $0x40] sm:$0xff]  }
 0x19f   : > { %3278 = vmatprep.mubr.bf16.mxu0 %v6700_v7 }
 0x1a5   : > { %5520 = vmatmul.mubr.msk.bf16.gmra.mrb[52].mxu1 %vm513_vm3, %v1083_v19  ;;  %v1578_v19 = vsel %vm1054_vm5, %v1575_v37, %v1577_v8  ;;  %v3464_v37 = vrot.slane %v3462_v1, 2  ;;  %v3507_v1 = vshrl.u32 %v7358_v56, 16 }
 0x1a6   : > { %1329 = vmatprep.mubr.bf16.mxu1 %v6700_v7  ;;  %5648 = vmatmul.mubr.msk.bf16.gmra.mrb[52].mxu0 %vm513_vm3, %v3042_v17  ;;  %v3433_v17 = vsel %vm3407_vm6, %v3423_v63, %v3432_v9  ;;  %v6680_v63 = vld [vmem:[%s6762_s29 + $0x38] sm:$0xff]  }
 0x1a7   : > { %3288 = vmatprep.mubr.bf16.mxu0 %v6700_v7  ;;  %v1585_v10 = vrot.slane %v6680_v63, 1  ;;  %v3468_v61 = vor.u32 %v3467_v39, %v3464_v37  ;;  %v3509_v37 = vrot.slane %v3507_v1, 2  ;;  %v3512_v39 = vrot.slane %v3510_v14, 3  ;;  %v6685_v63 = vld [vmem:[%s6762_s29 + $0x60] sm:$0xff]  }
 0x1ad   : > { %5521 = vmatmul.mubr.msk.bf16.gmra.mrb[56].mxu1 %vm513_vm3, %v1085_v27  ;;  %v6677_v27 = vld [vmem:[%s6762_s29 + $0x20] sm:$0xff]  }
 0x1ae   : > { %1339 = vmatprep.mubr.bf16.mxu1 %v6700_v7  ;;  %5649 = vmatmul.mubr.msk.bf16.gmra.mrb[56].mxu0 %vm513_vm3, %v3044_v28  ;;  %v1579_v28 = vrot.slane %v6677_v27, 1  ;;  %v6682_v27 = vld [vmem:[%s6762_s29 + $0x48] sm:$0xff]  }
 0x1af   : > { %3298 = vmatprep.mubr.bf16.mxu0 %v6700_v7 }
 0x1b5   : > { %5522 = vmatmul.mubr.msk.bf16.gmra.mrb[60].mxu1 %vm513_vm3, %v1087_v32  ;;  %v3447_v32 = vshll.u32 %v7281_v38, 16 }
 0x1b6   : > { %1349 = vmatprep.mubr.bf16.mxu1 %v6700_v7  ;;  %5650 = vmatmul.mubr.msk.bf16.gmra.mrb[60].mxu0 %vm513_vm3, %v3046_v24  ;;  %v1580_v24 = vsel %vm1054_vm5, %v1577_v8, %v1579_v28  ;;  %v1587_v8 = vrot.slane %v6681_v6, 1  ;;  %v6686_v6 = vld [vmem:[%s6762_s29 + $0x68] sm:$0xff]  }
 0x1b7   : > { %3308 = vmatprep.mubr.bf16.mxu0 %v6700_v7 }
 0x1bd   : > { %5523 = vmatmul.mubr.msk.bf16.gmra.mrb[64].mxu1 %vm513_vm3, %v1089_v11  ;;  %v3449_v11 = vrot.slane %v3447_v32, 3  ;;  %v3492_v32 = vshll.u32 %v7336_v46, 16 }
 0x1be   : > { %1359 = vmatprep.mubr.bf16.mxu1 %v6700_v7  ;;  %5651 = vmatmul.mubr.msk.bf16.gmra.mrb[64].mxu0 %vm513_vm3, %v3048_v2  ;;  %v1581_v2 = vrot.slane %v6678_v43, 1  ;;  %v6683_v43 = vld [vmem:[%s6762_s29 + $0x50] sm:$0xff]  }
 0x1bf   : > { %3318 = vmatprep.mubr.bf16.mxu0 %v6700_v7  ;;  %v3450_v47 = vor.u32 %v3449_v11, %v3446_v53  ;;  %v3491_v53 = vrot.slane %v3489_v15, 2  ;;  %v3494_v11 = vrot.slane %v3492_v32, 3  ;;  %v3534_v15 = vshrl.u32 %v7391_v57, 16 }
 0x1c0   : > { %v1582_v42 = vsel %vm1054_vm5, %v1579_v28, %v1581_v2  ;;  %v1589_v28 = vrot.slane %v6682_v27, 1  ;;  %v6687_v27 = vld [vmem:[%s6762_s29 + $0x70] sm:$0xff]   ;;  %v3537_v32 = vshll.u32 %v7391_v57, 16 }
 0x1c1   : > { %v3451_v48 = vsel %vm3407_vm6, %v3441_v30, %v3450_v47  ;;  %v3486_v30 = vor.u32 %v3485_v4, %v3482_v59  ;;  %v3527_v59 = vrot.slane %v3525_v3, 2  ;;  %v3530_v4 = vrot.slane %v3528_v45, 3 }
 0x1c2   : > { %v3561_v45 = vshrl.u32 %v7424_v35, 16 }
 0x1c5   : > { %5524 = vmatmul.mubr.msk.bf16.gmra.mrb[68].mxu1 %vm513_vm3, %v1091_v31  ;;  %v3458_v31 = vrot.slane %v3456_v13, 3  ;;  %v3501_v13 = vshll.u32 %v7347_v55, 16 }
 0x1c6   : > { %1708 = vmatprep.mubr.bf16.mxu1 %v6700_v7  ;;  %5652 = vmatmul.mubr.msk.bf16.gmra.mrb[68].mxu0 %vm513_vm3, %v3050_v44  ;;  %v6679_v44 = vld [vmem:[%s6762_s29 + $0x30] sm:$0xff]  }
 0x1c7   : > { %3675 = vmatprep.mubr.bf16.mxu0 %v6700_v7  ;;  %v1583_v51 = vrot.slane %v6679_v44, 1  ;;  %v3459_v54 = vor.u32 %v3458_v31, %v3455_v0  ;;  %v3500_v0 = vrot.slane %v3498_v23, 2  ;;  %v3503_v31 = vrot.slane %v3501_v13, 3  ;;  %v6684_v44 = vld [vmem:[%s6762_s29 + $0x58] sm:$0xff]  }
 0x1c8   : > { %v3539_v23 = vrot.slane %v3537_v32, 3  ;;  %v6688_v13 = vld [vmem:[%s6762_s29 + $0x78] sm:$0xff]   ;;  %v7623_v32 = vld [vmem:[%s6762_s29 + $0xa0] ss:$0 sps:$4 sm:$0x77]  }
 0x1c9   : > { %v1584_v22 = vsel %vm1054_vm5, %v1581_v2, %v1583_v51  ;;  %v3460_v60 = vsel %vm3407_vm6, %v3450_v47, %v3459_v54  ;;  %v3469_v58 = vsel %vm3407_vm6, %v3459_v54, %v3468_v61  ;;  %v1591_v2 = vrot.slane %v6683_v43, 1 }
 0x1ca   : > { %v3495_v47 = vor.u32 %v3494_v11, %v3491_v53  ;;  %v3504_v54 = vor.u32 %v3503_v31, %v3500_v0  ;;  %v4479_v53 = vld [vmem:[%s8694_s3 + $0x8] sm:$0xff]  ;;  %v3543_v0 = vshrl.u32 %v7402_v18, 16  ;;  %v3546_v31 = vshll.u32 %v7402_v18, 16 }
 0x1cd   : > { %5548 = vmatmul.mubr.msk.bf16.vlgmr.msra.gmra.mrb[0].mxu1 %vm513_vm3, %v1576_v62  ;;  %v3471_v62 = vshrl.u32 %v7314_v34, 16 }
 0x1ce   : > { %1718 = vmatprep.mubr.bf16.mxu1 %v6700_v7  ;;  %5658 = vmatmul.mubr.msk.bf16.vlgmr.msra.gmra.mrb[0].mxu0 %vm513_vm3, %v3424_v20  ;;  %v1586_v20 = vsel %vm1054_vm5, %v1583_v51, %v1585_v10  ;;  %v1593_v51 = vrot.slane %v6684_v44, 1 }
 0x1cf   : > { %4038 = vmatpush1.bf16.msra.mxu0 %v4032_v25  ;;  %3685 = vmatprep.mubr.bf16.mxu0 %v6700_v7  ;;  %v3473_v12 = vrot.slane %v3471_v62, 2  ;;  %v3476_v25 = vrot.slane %v3474_v40, 3  ;;  %v3516_v62 = vshrl.u32 %v7369_v26, 16  ;;  %v3519_v40 = vshll.u32 %v7369_v26, 16 }
 0x1d1   : > { %v3477_v9 = vor.u32 %v3476_v25, %v3473_v12  ;;  %v3518_v12 = vrot.slane %v3516_v62, 2  ;;  %v3521_v25 = vrot.slane %v3519_v40, 3  ;;  %v4482_v40 = vld [vmem:[%s8694_s3 + $0x20] sm:$0xff] }
 0x1d5   : > { %5549 = vmatmul.mubr.msk.bf16.gmra.mrb[4].mxu1 %vm513_vm3, %v1578_v19  ;;  %v1588_v19 = vsel %vm1054_vm5, %v1585_v10, %v1587_v8  ;;  %v1595_v10 = vrot.slane %v6685_v63, 1 }
 0x1d6   : > { %1728 = vmatprep.mubr.bf16.mxu1 %v6700_v7  ;;  %5659 = vmatmul.mubr.msk.bf16.gmra.mrb[4].mxu0 %vm513_vm3, %v3433_v17  ;;  %v3478_v17 = vsel %vm3407_vm6, %v3468_v61, %v3477_v9  ;;  %v3513_v61 = vor.u32 %v3512_v39, %v3509_v37  ;;  %v6689_v37 = vld [vmem:[%s6762_s29 + $0x80] sm:$0xff]  }
 0x1d7   : > { %3695 = vmatprep.mubr.bf16.mxu0 %v6700_v7  ;;  %v1603_v39 = vrot.slane %v6689_v37, 1  ;;  %v4488_v37 = vld [vmem:[%s8694_s3 + $0x50] sm:$0xff] }
 0x1dd   : > { %5550 = vmatmul.mubr.msk.bf16.gmra.mrb[8].mxu1 %vm513_vm3, %v1580_v24  ;;  %v1590_v24 = vsel %vm1054_vm5, %v1587_v8, %v1589_v28  ;;  %v1597_v8 = vrot.slane %v6686_v6, 1 }
 0x1de   : > { %1738 = vmatprep.mubr.bf16.mxu1 %v6700_v7  ;;  %5660 = vmatmul.mubr.msk.bf16.gmra.mrb[8].mxu0 %vm513_vm3, %v3442_v33  ;;  %v3487_v33 = vsel %vm3407_vm6, %v3477_v9, %v3486_v30  ;;  %v3522_v9 = vor.u32 %v3521_v25, %v3518_v12 }
 0x1df   : > { %3705 = vmatprep.mubr.bf16.mxu0 %v6700_v7 }
 0x1e5   : > { %5551 = vmatmul.mubr.msk.bf16.gmra.mrb[12].mxu1 %vm513_vm3, %v1582_v42  ;;  %v1592_v42 = vsel %vm1054_vm5, %v1589_v28, %v1591_v2  ;;  %v1599_v28 = vrot.slane %v6687_v27, 1 }
 0x1e6   : > { %1748 = vmatprep.mubr.bf16.mxu1 %v6700_v7  ;;  %5661 = vmatmul.mubr.msk.bf16.gmra.mrb[12].mxu0 %vm513_vm3, %v3451_v48  ;;  %v3496_v48 = vsel %vm3407_vm6, %v3486_v30, %v3495_v47  ;;  %v3531_v30 = vor.u32 %v3530_v4, %v3527_v59  ;;  %v4484_v59 = vld [vmem:[%s8694_s3 + $0x30] sm:$0xff]  ;;  %v4485_v4 = vld [vmem:[%s8694_s3 + $0x38] sm:$0xff] }
 0x1e7   : > { %3715 = vmatprep.mubr.bf16.mxu0 %v6700_v7  ;;  %v1600_v11 = vsel %vm1054_vm5, %v1597_v8, %v1599_v28  ;;  %v5748_v27 = vpack.c.bf16 %v4485_v4, %v4484_v59  ;;  %v4497_v59 = vld [vmem:[%s8694_s3 + $0x98] sm:$0xff] }
 0x1ed   : > { %5552 = vmatmul.mubr.msk.bf16.gmra.mrb[16].mxu1 %vm513_vm3, %v1584_v22  ;;  %v1594_v22 = vsel %vm1054_vm5, %v1591_v2, %v1593_v51  ;;  %v3532_v2 = vsel %vm3407_vm6, %v3522_v9, %v3531_v30 }
 0x1ee   : > { %1758 = vmatprep.mubr.bf16.mxu1 %v6700_v7  ;;  %5662 = vmatmul.mubr.msk.bf16.gmra.mrb[16].mxu0 %vm513_vm3, %v3460_v60  ;;  %v3505_v60 = vsel %vm3407_vm6, %v3495_v47, %v3504_v54  ;;  %v3536_v47 = vrot.slane %v3534_v15, 2 }
 0x1ef   : > { %3725 = vmatprep.mubr.bf16.mxu0 %v6700_v7 }
 0x1f5   : > { %5553 = vmatmul.mubr.msk.bf16.gmra.mrb[20].mxu1 %vm513_vm3, %v1586_v20  ;;  %v1596_v20 = vsel %vm1054_vm5, %v1593_v51, %v1595_v10  ;;  %v4480_v51 = vld [vmem:[%s8694_s3 + $0x10] sm:$0xff] }
 0x1f6   : > { %1768 = vmatprep.mubr.bf16.mxu1 %v6700_v7  ;;  %5663 = vmatmul.mubr.msk.bf16.gmra.mrb[20].mxu0 %vm513_vm3, %v3469_v58  ;;  %v3514_v58 = vsel %vm3407_vm6, %v3504_v54, %v3513_v61  ;;  %v4481_v54 = vld [vmem:[%s8694_s3 + $0x18] sm:$0xff] }
 0x1f7   : > { %3735 = vmatprep.mubr.bf16.mxu0 %v6700_v7  ;;  %v5742_v1 = vpack.c.bf16 %v4481_v54, %v4480_v51 }
 0x1fd   : > { %5554 = vmatmul.mubr.msk.bf16.gmra.mrb[24].mxu1 %vm513_vm3, %v1588_v19  ;;  %v1598_v19 = vsel %vm1054_vm5, %v1595_v10, %v1597_v8  ;;  %v3552_v10 = vshrl.u32 %v7413_v29, 16  ;;  %v6690_v8 = vld [vmem:[%s6762_s29 + $0x88] sm:$0xff]  }
 0x1fe   : > { %1778 = vmatprep.mubr.bf16.mxu1 %v6700_v7  ;;  %5664 = vmatmul.mubr.msk.bf16.gmra.mrb[24].mxu0 %vm513_vm3, %v3478_v17  ;;  %v3523_v17 = vsel %vm3407_vm6, %v3513_v61, %v3522_v9  ;;  %v3555_v61 = vshll.u32 %v7413_v29, 16  ;;  %v1605_v9 = vrot.slane %v6690_v8, 1 }
 0x1ff   : > { %3745 = vmatprep.mubr.bf16.mxu0 %v6700_v7  ;;  %v3554_v25 = vrot.slane %v3552_v10, 2  ;;  %v3936_v10 = vrot.slane %v7231_v16, 3  ;;  %v3938_v16 = vrot.slane %v7245_v52, 3  ;;  %v3940_v52 = vrot.slane %v7257_v49, 3  ;;  %v4495_v49 = vld [vmem:[%s8694_s3 + $0x88] sm:$0xff] }
 0x200   : > { %v3557_v6 = vrot.slane %v3555_v61, 3 }
 0x201   : > { %v3941_v8 = vsel %vm3934_vm7, %v3938_v16, %v3940_v52 }
 0x202   : > { %v3558_v3 = vor.u32 %v3557_v6, %v3554_v25  ;;  %v4493_v25 = vld [vmem:[%s8694_s3 + $0x78] sm:$0xff] }
 0x205   : > { %5555 = vmatmul.mubr.msk.bf16.gmra.mrb[28].mxu1 %vm513_vm3, %v1590_v24  ;;  %v6701_v24 = vmov 0.0|0.0  }
 0x206   : > { %1788 = vmatprep.mubr.bf16.mxu1 %v6700_v7  ;;  %5665 = vmatmul.mubr.msk.bf16.gmra.mrb[28].mxu0 %vm513_vm3, %v3487_v33  ;;  %v4478_v33 = vld [vmem:[%s8694_s3] sm:$0xff] }
 0x207   : > { %3755 = vmatprep.mubr.bf16.mxu0 %v6700_v7  ;;  %5738 = vmatprep.subr.bf16.mxu1 %v6701_v24  ;;  %v5739_v43 = vpack.c.bf16 %v4479_v53, %v4478_v33  ;;  %v6691_v33 = vld [vmem:[%s6762_s29 + $0x90] sm:$0xff]  }
 0x208   : > { %v1607_v53 = vrot.slane %v6691_v33, 1 }
 0x209   : > { %5740 = vmatpush1.bf16.msra.mxu1 %v5739_v43  ;;  %v3570_v43 = vshrl.u32 %v7623_v32, 16 }
 0x20a   : > { %5741 = vmatprep.subr.bf16.mxu1 %v6701_v24 }
 0x20d   : > { %5556 = vmatmul.mubr.msk.bf16.gmra.mrb[32].mxu1 %vm513_vm3, %v1592_v42  ;;  %v1601_v42 = vrot.slane %v6688_v13, 1 }
 0x20e   : > { %1798 = vmatprep.mubr.bf16.mxu1 %v6700_v7  ;;  %5666 = vmatmul.mubr.msk.bf16.gmra.mrb[32].mxu0 %vm513_vm3, %v3496_v48  ;;  %v3540_v48 = vor.u32 %v3539_v23, %v3536_v47  ;;  %v1608_v47 = vsel %vm1054_vm5, %v1605_v9, %v1607_v53  ;;  %v6451_v23 = vld [vmem:[%s6762_s29 + $0x98] ss:$0 sps:$4 sm:$0x11]  }
 0x20f   : > { %3765 = vmatprep.mubr.bf16.mxu0 %v6700_v7  ;;  %v1602_v44 = vsel %vm1054_vm5, %v1599_v28, %v1601_v42  ;;  %5743 = vmatpush1.bf16.msra.mxu1 %v5742_v1  ;;  %v1604_v62 = vsel %vm1054_vm5, %v1601_v42, %v1603_v39  ;;  %v3572_v42 = vrot.slane %v3570_v43, 2 }
 0x210   : > { %v3541_v14 = vsel %vm3407_vm6, %v3531_v30, %v3540_v48  ;;  %5744 = vmatprep.subr.bf16.mxu1 %v6701_v24  ;;  %v3563_v30 = vrot.slane %v3561_v45, 2 }
 0x215   : > { %5557 = vmatmul.mubr.msk.bf16.gmra.mrb[36].mxu1 %vm513_vm3, %v1594_v22  ;;  %v3545_v22 = vrot.slane %v3543_v0, 2  ;;  %v1609_v0 = vrot.slane %v6451_v23, 1  ;;  %v4503_v23 = vld [vmem:[%s8694_s3 + $0xc8] sm:$0xff] }
 0x216   : > { %1808 = vmatprep.mubr.bf16.mxu1 %v6700_v7  ;;  %5667 = vmatmul.mubr.msk.bf16.gmra.mrb[36].mxu0 %vm513_vm3, %v3505_v60  ;;  %v3548_v60 = vrot.slane %v3546_v31, 3  ;;  %v4486_v31 = vld [vmem:[%s8694_s3 + $0x40] sm:$0xff] }
 0x217   : > { %3775 = vmatprep.mubr.bf16.mxu0 %v6700_v7  ;;  %v1610_v1 = vsel %vm1054_vm5, %v1607_v53, %v1609_v0  ;;  %v4500_v53 = vld [vmem:[%s8694_s3 + $0xb0] sm:$0xff]  ;;  %v4505_v0 = vld [vmem:[%s8694_s3 + $0xd8] sm:$0xff] }
 0x218   : > { %v3549_v63 = vor.u32 %v3548_v60, %v3545_v22 }
 0x21a   : > { %v3550_v12 = vsel %vm3407_vm6, %v3540_v48, %v3549_v63  ;;  %v3559_v28 = vsel %vm3407_vm6, %v3549_v63, %v3558_v3 }
 0x21d   : > { %5558 = vmatmul.mubr.msk.bf16.gmra.mrb[40].mxu1 %vm513_vm3, %v1596_v20  ;;  %v4483_v20 = vld [vmem:[%s8694_s3 + $0x28] sm:$0xff] }
 0x21e   : > { %1818 = vmatprep.mubr.bf16.mxu1 %v6700_v7  ;;  %5668 = vmatmul.mubr.msk.bf16.gmra.mrb[40].mxu0 %vm513_vm3, %v3514_v58  ;;  %v5745_v58 = vpack.c.bf16 %v4483_v20, %v4482_v40  ;;  %v4491_v40 = vld [vmem:[%s8694_s3 + $0x68] sm:$0xff] }
 0x21f   : > { %3785 = vmatprep.mubr.bf16.mxu0 %v6700_v7 }
 0x220   : > { %5746 = vmatpush1.bf16.msra.mxu1 %v5745_v58  ;;  %v3939_v58 = vsel %vm3934_vm7, %v3936_v10, %v3938_v16  ;;  %v3958_v16 = vrot.slane %v7369_v26, 3 }
 0x221   : > { %5747 = vmatprep.subr.bf16.mxu1 %v6701_v24 }
 0x224   : > { %5749 = vmatpush1.bf16.msra.mxu1 %v5748_v27 }
 0x225   : > { %5559 = vmatmul.mubr.msk.bf16.gmra.mrb[44].mxu1 %vm513_vm3, %v1598_v19  ;;  %v3564_v19 = vshll.u32 %v7424_v35, 16  ;;  %5750 = vmatprep.subr.bf16.mxu1 %v6701_v24 }
 0x226   : > { %1828 = vmatprep.mubr.bf16.mxu1 %v6700_v7  ;;  %5669 = vmatmul.mubr.msk.bf16.gmra.mrb[44].mxu0 %vm513_vm3, %v3523_v17  ;;  %v1606_v17 = vsel %vm1054_vm5, %v1603_v39, %v1605_v9  ;;  %v4489_v39 = vld [vmem:[%s8694_s3 + $0x58] sm:$0xff]  ;;  %v3942_v9 = vrot.slane %v7281_v38, 3  ;;  %v3944_v38 = vrot.slane %v7292_v41, 3  ;;  %v3946_v41 = vrot.slane %v7303_v50, 3 }
 0x227   : > { %3795 = vmatprep.mubr.bf16.mxu0 %v6700_v7  ;;  %v3566_v15 = vrot.slane %v3564_v19, 3  ;;  %v5754_v61 = vpack.c.bf16 %v4489_v39, %v4488_v37  ;;  %v3948_v50 = vrot.slane %v7314_v34, 3  ;;  %v3950_v34 = vrot.slane %v7325_v21, 3 }
 0x228   : > { %v3943_v19 = vsel %vm3934_vm7, %v3940_v52, %v3942_v9  ;;  %v3945_v27 = vsel %vm3934_vm7, %v3942_v9, %v3944_v38  ;;  %v3947_v33 = vsel %vm3934_vm7, %v3944_v38, %v3946_v41  ;;  %v3952_v21 = vrot.slane %v7336_v46, 3 }
 0x229   : > { %v3954_v46 = vrot.slane %v7347_v55, 3  ;;  %v3962_v38 = vrot.slane %v7391_v57, 3 }
 0x22b   : > { %v3955_v39 = vsel %vm3934_vm7, %v3952_v21, %v3954_v46 }
 0x22d   : > { %5560 = vmatmul.mubr.msk.bf16.gmra.mrb[48].mxu1 %vm513_vm3, %v1600_v11  ;;  %v3567_v11 = vor.u32 %v3566_v15, %v3563_v30  ;;  %v4499_v30 = vld [vmem:[%s8694_s3 + $0xa8] sm:$0xff] }
 0x22e   : > { %1838 = vmatprep.mubr.bf16.mxu1 %v6700_v7  ;;  %5670 = vmatmul.mubr.msk.bf16.gmra.mrb[48].mxu0 %vm513_vm3, %v3532_v2  ;;  %v3573_v2 = vshll.u32 %v7623_v32, 16 }
 0x22f   : > { %3805 = vmatprep.mubr.bf16.mxu0 %v6700_v7  ;;  %v3568_v13 = vsel %vm3407_vm6, %v3558_v3, %v3567_v11  ;;  %v4494_v3 = vld [vmem:[%s8694_s3 + $0x80] sm:$0xff] }
 0x230   : > { %v3575_v48 = vrot.slane %v3573_v2, 3  ;;  %v5763_v45 = vpack.c.bf16 %v4495_v49, %v4494_v3  ;;  %v3949_v2 = vsel %vm3934_vm7, %v3946_v41, %v3948_v50  ;;  %v3964_v41 = vrot.slane %v7402_v18, 3 }
 0x232   : > { %v3576_v51 = vor.u32 %v3575_v48, %v3572_v42  ;;  %v3951_v42 = vsel %vm3934_vm7, %v3948_v50, %v3950_v34  ;;  %v4504_v48 = vld [vmem:[%s8694_s3 + $0xd0] sm:$0xff]  ;;  %v3965_v57 = vsel %vm3934_vm7, %v3962_v38, %v3964_v41  ;;  %v3966_v50 = vrot.slane %v7413_v29, 3 }
 0x234   : > { %v3577_v22 = vsel %vm3407_vm6, %v3567_v11, %v3576_v51  ;;  %v4501_v11 = vld [vmem:[%s8694_s3 + $0xb8] sm:$0xff]  ;;  %v3967_v18 = vsel %vm3934_vm7, %v3964_v41, %v3966_v50 }
 0x235   : > { %5561 = vmatmul.mubr.msk.bf16.gmra.mrb[52].mxu1 %vm513_vm3, %v1602_v44  ;;  %v4487_v44 = vld [vmem:[%s8694_s3 + $0x48] sm:$0xff]  ;;  %v5772_v43 = vpack.c.bf16 %v4501_v11, %v4500_v53 }
 0x236   : > { %1848 = vmatprep.mubr.bf16.mxu1 %v6700_v7  ;;  %5671 = vmatmul.mubr.msk.bf16.gmra.mrb[52].mxu0 %vm513_vm3, %v3541_v14  ;;  %v5751_v54 = vpack.c.bf16 %v4487_v44, %v4486_v31  ;;  %v3928_v14 = vld [vmem:[%s6762_s29 + $0x10] sm:$0x8]  ;;  %v5778_v31 = vpack.c.bf16 %v4505_v0, %v4504_v48  ;;  %v3953_v44 = vsel %vm3934_vm7, %v3950_v34, %v3952_v21  ;;  %v3968_v34 = vrot.slane %v7424_v35, 3 }
 0x237   : > { %3815 = vmatprep.mubr.bf16.mxu0 %v6700_v7  ;;  %v5677_v60 = vcombine.low %v3928_v14, %v7222_v36  ;;  %v3970_v21 = vrot.slane %v7623_v32, 3 }
 0x238   : > { %5752 = vmatpush1.bf16.msra.mxu1 %v5751_v54  ;;  %v3969_v29 = vsel %vm3934_vm7, %v3966_v50, %v3968_v34 }
 0x239   : > { %5753 = vmatprep.subr.bf16.mxu1 %v6701_v24  ;;  %v3935_v63 = vrot.slane %v5677_v60, 3  ;;  %v4507_v60 = vld [vmem:[%s8694_s3 + $0xe8] sm:$0xff]  ;;  %v3971_v35 = vsel %vm3934_vm7, %v3968_v34, %v3970_v21 }
 0x23b   : > { %v3937_v36 = vsel %vm3934_vm7, %v3935_v63, %v3936_v10  ;;  %v3956_v10 = vrot.slane %v7358_v56, 3 }
 0x23c   : > { %5755 = vmatpush1.bf16.msra.mxu1 %v5754_v61 }
 0x23d   : > { %5562 = vmatmul.mubr.msk.bf16.gmra.mrb[56].mxu1 %vm513_vm3, %v1604_v62  ;;  %5756 = vmatprep.subr.bf16.mxu1 %v6701_v24  ;;  %v4490_v62 = vld [vmem:[%s8694_s3 + $0x60] sm:$0xff]  ;;  %v3959_v56 = vsel %vm3934_vm7, %v3956_v10, %v3958_v16 }
 0x23e   : > { %1858 = vmatprep.mubr.bf16.mxu1 %v6700_v7  ;;  %5672 = vmatmul.mubr.msk.bf16.gmra.mrb[56].mxu0 %vm513_vm3, %v3550_v12  ;;  %v5757_v20 = vpack.c.bf16 %v4491_v40, %v4490_v62  ;;  %v4492_v12 = vld [vmem:[%s8694_s3 + $0x70] sm:$0xff]  ;;  %v3957_v62 = vsel %vm3934_vm7, %v3954_v46, %v3956_v10 }
 0x23f   : > { %3825 = vmatprep.mubr.bf16.mxu0 %v6700_v7  ;;  %v5760_v6 = vpack.c.bf16 %v4493_v25, %v4492_v12  ;;  %v4508_v12 = vld [vmem:[%s8694_s3 + $0xf0] sm:$0xff]  ;;  %v4509_v25 = vld [vmem:[%s8694_s3 + $0xf8] sm:$0xff] }
 0x240   : > { %5758 = vmatpush1.bf16.msra.mxu1 %v5757_v20  ;;  %v5784_v52 = vpack.c.bf16 %v4509_v25, %v4508_v12 }
 0x241   : > { %5759 = vmatprep.subr.bf16.mxu1 %v6701_v24 }
 0x244   : > { %5761 = vmatpush1.bf16.msra.mxu1 %v5760_v6 }
 0x245   : > { %5563 = vmatmul.mubr.msk.bf16.gmra.mrb[60].mxu1 %vm513_vm3, %v1606_v17  ;;  %5762 = vmatprep.subr.bf16.mxu1 %v6701_v24  ;;  %v4496_v17 = vld [vmem:[%s8694_s3 + $0x90] sm:$0xff] }
 0x246   : > { %1868 = vmatprep.mubr.bf16.mxu1 %v6700_v7  ;;  %5673 = vmatmul.mubr.msk.bf16.gmra.mrb[60].mxu0 %vm513_vm3, %v3559_v28  ;;  %v5766_v4 = vpack.c.bf16 %v4497_v59, %v4496_v17  ;;  %v4498_v28 = vld [vmem:[%s8694_s3 + $0xa0] sm:$0xff] }
 0x247   : > { %3835 = vmatprep.mubr.bf16.mxu0 %v6700_v7  ;;  %v5769_v15 = vpack.c.bf16 %v4499_v30, %v4498_v28 }
 0x248   : > { %5764 = vmatpush1.bf16.msra.mxu1 %v5763_v45 }
 0x249   : > { %5765 = vmatprep.subr.bf16.mxu1 %v6701_v24 }
 0x24c   : > { %5767 = vmatpush1.bf16.msra.mxu1 %v5766_v4 }
 0x24d   : > { %5564 = vmatmul.mubr.msk.bf16.gmra.mrb[64].mxu1 %vm513_vm3, %v1608_v47  ;;  %5768 = vmatprep.subr.bf16.mxu1 %v6701_v24  ;;  %v4502_v47 = vld [vmem:[%s8694_s3 + $0xc0] sm:$0xff] }
 0x24e   : > { %1878 = vmatprep.mubr.bf16.mxu1 %v6700_v7  ;;  %5674 = vmatmul.mubr.msk.bf16.gmra.mrb[64].mxu0 %vm513_vm3, %v3568_v13  ;;  %v5775_v13 = vpack.c.bf16 %v4503_v23, %v4502_v47 }
 0x24f   : > { %3845 = vmatprep.mubr.bf16.mxu0 %v6700_v7 }
 0x250   : > { %5770 = vmatpush1.bf16.msra.mxu1 %v5769_v15 }
 0x251   : > { %5771 = vmatprep.subr.bf16.mxu1 %v6701_v24 }
 0x254   : > { %5773 = vmatpush1.bf16.msra.mxu1 %v5772_v43 }
 0x255   : > { %5565 = vmatmul.mubr.msk.bf16.gmra.mrb[68].mxu1 %vm513_vm3, %v1610_v1  ;;  %5774 = vmatprep.subr.bf16.mxu1 %v6701_v24 }
 0x256   : > { %5675 = vmatmul.mubr.msk.bf16.gmra.mrb[68].mxu0 %vm513_vm3, %v3577_v22  ;;  %v4506_v22 = vld [vmem:[%s8694_s3 + $0xe0] sm:$0xff] }
 0x257   : > { %4069 = vmatprep.mubr.bf16.mxu0 %v6700_v7  ;;  %v5781_v37 = vpack.c.bf16 %v4507_v60, %v4506_v22 }
 0x258   : > { %5776 = vmatpush1.bf16.msra.mxu1 %v5775_v13 }
 0x259   : > { %5777 = vmatprep.subr.bf16.mxu1 %v6701_v24 }
 0x25c   : > { %5779 = vmatpush1.bf16.msra.mxu1 %v5778_v31 }
 0x25d   : > { %5780 = vmatprep.subr.bf16.mxu1 %v6701_v24 }
 0x25e   : > { %5681 = vmatmul.mubr.msk.bf16.vlgmr.msra.gmra.mrb[0].mxu0 %vm513_vm3, %v3937_v36 }
 0x25f   : > { %4079 = vmatprep.mubr.bf16.mxu0 %v6700_v7 }
 0x260   : > { %5782 = vmatpush1.bf16.msra.mxu1 %v5781_v37 }
 0x261   : > { %5783 = vmatprep.subr.bf16.mxu1 %v6701_v24 }
 0x264   : > { %5785 = vmatpush1.bf16.msra.mxu1 %v5784_v52 }
 0x266   : > { %5682 = vmatmul.mubr.msk.bf16.gmra.mrb[4].mxu0 %vm513_vm3, %v3939_v58 }
 0x267   : > { %4089 = vmatprep.mubr.bf16.mxu0 %v6700_v7 }
 0x26e   : > { %5683 = vmatmul.mubr.msk.bf16.gmra.mrb[8].mxu0 %vm513_vm3, %v3941_v8  ;;  %v3960_v8 = vrot.slane %v7380_v5, 3 }
 0x26f   : > { %4099 = vmatprep.mubr.bf16.mxu0 %v6700_v7 }
 0x270   : > { %v3961_v49 = vsel %vm3934_vm7, %v3958_v16, %v3960_v8  ;;  %v3963_v59 = vsel %vm3934_vm7, %v3960_v8, %v3962_v38 }
 0x276   : > { %5684 = vmatmul.mubr.msk.bf16.gmra.mrb[12].mxu0 %vm513_vm3, %v3943_v19 }
 0x277   : > { %4109 = vmatprep.mubr.bf16.mxu0 %v6700_v7 }
 0x27e   : > { %5685 = vmatmul.mubr.msk.bf16.gmra.mrb[16].mxu0 %vm513_vm3, %v3945_v27 }
 0x27f   : > { %4119 = vmatprep.mubr.bf16.mxu0 %v6700_v7 }
 0x286   : > { %5686 = vmatmul.mubr.msk.bf16.gmra.mrb[20].mxu0 %vm513_vm3, %v3947_v33 }
 0x287   : > { %4129 = vmatprep.mubr.bf16.mxu0 %v6700_v7 }
 0x28e   : > { %5687 = vmatmul.mubr.msk.bf16.gmra.mrb[24].mxu0 %vm513_vm3, %v3949_v2 }
 0x28f   : > { %4139 = vmatprep.mubr.bf16.mxu0 %v6700_v7 }
 0x296   : > { %5688 = vmatmul.mubr.msk.bf16.gmra.mrb[28].mxu0 %vm513_vm3, %v3951_v42 }
 0x297   : > { %4149 = vmatprep.mubr.bf16.mxu0 %v6700_v7 }
 0x29e   : > { %5689 = vmatmul.mubr.msk.bf16.gmra.mrb[32].mxu0 %vm513_vm3, %v3953_v44 }
 0x29f   : > { %4159 = vmatprep.mubr.bf16.mxu0 %v6700_v7 }
 0x2a0   : > { %v7751_v51 = vpop.f32.mrb[0].mxu1 }
 0x2a1   : > { %v7753_v54 = vpop.f32.mrb[1].mxu1 }
 0x2a2   : > { %v7757_v1 = vpop.f32.mrb[2].mxu1 }
 0x2a3   : > { %v7759_v14 = vpop.f32.mrb[3].mxu1 }
 0x2a6   : > { %5690 = vmatmul.mubr.msk.bf16.gmra.mrb[36].mxu0 %vm513_vm3, %v3955_v39 }
 0x2a7   : > { %4169 = vmatprep.mubr.bf16.mxu0 %v6700_v7 }
 0x2a8   : > { %v7770_v55 = vpop.f32.mrb[4].mxu1 }
 0x2a9   : > { %v7772_v63 = vpop.f32.mrb[5].mxu1 }
 0x2aa   : > { %v7776_v61 = vpop.f32.mrb[6].mxu1 }
 0x2ab   : > { %v7778_v36 = vpop.f32.mrb[7].mxu1 }
 0x2ae   : > { %5691 = vmatmul.mubr.msk.bf16.gmra.mrb[40].mxu0 %vm513_vm3, %v3957_v62 }
 0x2af   : > { %4179 = vmatprep.mubr.bf16.mxu0 %v6700_v7 }
 0x2b0   : > { %v7782_v40 = vpop.f32.mrb[8].mxu1 }
 0x2b1   : > { %v7784_v24 = vpop.f32.mrb[9].mxu1 }
 0x2b2   : > { %v7788_v20 = vpop.f32.mrb[10].mxu1 }
 0x2b3   : > { %v7790_v58 = vpop.f32.mrb[11].mxu1 }
 0x2b6   : > { %5692 = vmatmul.mubr.msk.bf16.gmra.mrb[44].mxu0 %vm513_vm3, %v3959_v56 }
 0x2b7   : > { %4189 = vmatprep.mubr.bf16.mxu0 %v6700_v7 }
 0x2b8   : > { %v7800_v6 = vpop.f32.mrb[12].mxu1 }
 0x2b9   : > { %v7802_v26 = vpop.f32.mrb[13].mxu1 }
 0x2ba   : > { %v7806_v9 = vpop.f32.mrb[14].mxu1 }
 0x2bb   : > { %v7808_v3 = vpop.f32.mrb[15].mxu1 }
 0x2be   : > { %5693 = vmatmul.mubr.msk.bf16.gmra.mrb[48].mxu0 %vm513_vm3, %v3961_v49 }
 0x2bf   : > { %4199 = vmatprep.mubr.bf16.mxu0 %v6700_v7 }
 0x2c0   : > { %v7812_v45 = vpop.f32.mrb[16].mxu1 }
 0x2c1   : > { %v7814_v19 = vpop.f32.mrb[17].mxu1 }
 0x2c2   : > { %v7818_v17 = vpop.f32.mrb[18].mxu1 }
 0x2c3   : > { %v7820_v5 = vpop.f32.mrb[19].mxu1 }
 0x2c6   : > { %5694 = vmatmul.mubr.msk.bf16.gmra.mrb[52].mxu0 %vm513_vm3, %v3963_v59 }
 0x2c7   : > { %4209 = vmatprep.mubr.bf16.mxu0 %v6700_v7 }
 0x2c8   : > { %v7824_v4 = vpop.f32.mrb[20].mxu1 }
 0x2c9   : > { %v7826_v27 = vpop.f32.mrb[21].mxu1 }
 0x2ca   : > { %v7830_v28 = vpop.f32.mrb[22].mxu1 }
 0x2cb   : > { %v7832_v30 = vpop.f32.mrb[23].mxu1 }
 0x2ce   : > { %5695 = vmatmul.mubr.msk.bf16.gmra.mrb[56].mxu0 %vm513_vm3, %v3965_v57 }
 0x2cf   : > { %4219 = vmatprep.mubr.bf16.mxu0 %v6700_v7 }
 0x2d0   : > { %v7836_v15 = vpop.f32.mrb[24].mxu1 }
 0x2d1   : > { %v7838_v33 = vpop.f32.mrb[25].mxu1 }
 0x2d2   : > { %v7842_v53 = vpop.f32.mrb[26].mxu1 }
 0x2d3   : > { %v7844_v11 = vpop.f32.mrb[27].mxu1 }
 0x2d6   : > { %5696 = vmatmul.mubr.msk.bf16.gmra.mrb[60].mxu0 %vm513_vm3, %v3967_v18 }
 0x2d7   : > { %4229 = vmatprep.mubr.bf16.mxu0 %v6700_v7 }
 0x2d8   : > { %v7848_v43 = vpop.f32.mrb[28].mxu1 }
 0x2d9   : > { %v7850_v2 = vpop.f32.mrb[29].mxu1 }
 0x2da   : > { %v7854_v47 = vpop.f32.mrb[30].mxu1 }
 0x2db   : > { %v7856_v23 = vpop.f32.mrb[31].mxu1 }
 0x2de   : > { %5697 = vmatmul.mubr.msk.bf16.gmra.mrb[64].mxu0 %vm513_vm3, %v3969_v29 }
 0x2df   : > { %4239 = vmatprep.mubr.bf16.mxu0 %v6700_v7 }
 0x2e0   : > { %v7860_v13 = vpop.f32.mrb[32].mxu1 }
 0x2e1   : > { %v7862_v42 = vpop.f32.mrb[33].mxu1 }
 0x2e2   : > { %v7866_v48 = vpop.f32.mrb[34].mxu1 }
 0x2e3   : > { %v7868_v0 = vpop.f32.mrb[35].mxu1 }
 0x2e6   : > { %5698 = vmatmul.mubr.msk.bf16.gmra.mrb[68].mxu0 %vm513_vm3, %v3971_v35 }
 0x2e8   : > { %v7872_v31 = vpop.f32.mrb[36].mxu1 }
 0x2e9   : > { %v7874_v44 = vpop.f32.mrb[37].mxu1 }
 0x2ea   : > { %v7876_v46 = vpop.f32.mrb[38].mxu1 }
 0x2eb   : > { %v7878_v22 = vpop.f32.mrb[39].mxu1 }
 0x2f0   : > { %v7880_v60 = vpop.f32.mrb[40].mxu1 }
 0x2f1   : > { %v7882_v7 = vpop.f32.mrb[41].mxu1 }
 0x2f2   : > { %v7884_v32 = vpop.f32.mrb[42].mxu1 }
 0x2f3   : > { %v7886_v37 = vpop.f32.mrb[43].mxu1 }
 0x2f8   : > { %v7888_v39 = vpop.f32.mrb[44].mxu1 }
 0x2f9   : > { %v7890_v10 = vpop.f32.mrb[45].mxu1 }
 0x2fa   : > { %v7892_v62 = vpop.f32.mrb[46].mxu1 }
 0x2fb   : > { %v7894_v16 = vpop.f32.mrb[47].mxu1 }
 0x300   : > { %v7896_v56 = vpop.f32.mrb[48].mxu1 }
 0x301   : > { %8698 = vst [vmem:[#allocation2_spill] sm:$0xff] %v7896_v56  ;;  %v7898_v12 = vpop.f32.mrb[49].mxu1 }
 0x302   : > { %8699 = vst [vmem:[#allocation3_spill] sm:$0xff] %v7898_v12  ;;  %v7900_v25 = vpop.f32.mrb[50].mxu1 }
 0x303   : > { %8700 = vst [vmem:[#allocation4_spill] sm:$0xff] %v7900_v25  ;;  %v7902_v52 = vpop.f32.mrb[51].mxu1 }
 0x304   : > { %8701 = vst [vmem:[#allocation5_spill] sm:$0xff] %v7902_v52 }
 0x308   : > { %v7904_v8 = vpop.f32.mrb[52].mxu1 }
 0x309   : > { %8702 = vst [vmem:[#allocation6_spill] sm:$0xff] %v7904_v8  ;;  %v7906_v49 = vpop.f32.mrb[53].mxu1 }
 0x30a   : > { %8703 = vst [vmem:[#allocation7_spill] sm:$0xff] %v7906_v49  ;;  %v7908_v38 = vpop.f32.mrb[54].mxu1 }
 0x30b   : > { %8704 = vst [vmem:[#allocation8_spill] sm:$0xff] %v7908_v38  ;;  %v7910_v59 = vpop.f32.mrb[55].mxu1 }
 0x30c   : > { %8705 = vst [vmem:[#allocation9_spill] sm:$0xff] %v7910_v59 }
 0x310   : > { %v7912_v41 = vpop.f32.mrb[56].mxu1 }
 0x311   : > { %8706 = vst [vmem:[#allocation10_spill] sm:$0xff] %v7912_v41  ;;  %v7914_v57 = vpop.f32.mrb[57].mxu1 }
 0x312   : > { %8707 = vst [vmem:[#allocation11_spill] sm:$0xff] %v7914_v57  ;;  %v7916_v50 = vpop.f32.mrb[58].mxu1  ;;  %v8697_v57 = vlaneseq }
 0x313   : > { %8708 = vst [vmem:[#allocation12_spill] sm:$0xff] %v7916_v50  ;;  %v7918_v18 = vpop.f32.mrb[59].mxu1 }
 0x314   : > { %8709 = vst [vmem:[#allocation13_spill] sm:$0xff] %v7918_v18 }
 0x318   : > { %v7920_v34 = vpop.f32.mrb[60].mxu1 }
 0x319   : > { %8710 = vst [vmem:[#allocation14_spill] sm:$0xff] %v7920_v34  ;;  %v7922_v29 = vpop.f32.mrb[61].mxu1 }
 0x31a   : > { %8711 = vst [vmem:[#allocation15_spill] sm:$0xff] %v7922_v29  ;;  %v7924_v21 = vpop.f32.mrb[62].mxu1  ;;  %v4325_v29 = vshrl.u32 %v8697_v57, 7 }
 0x31b   : > { %8712 = vst [vmem:[#allocation16_spill] sm:$0xff] %v7924_v21  ;;  %v7926_v35 = vpop.f32.mrb[63].mxu1 }
 0x31c   : > { %8713 = vst [vmem:[#allocation17_spill] sm:$0xff] %v7926_v35  ;;  %v4326_v35 = vsub.s32 0, %v4325_v29 }
 0x320   : > { %v7928_v49 = vpop.f32.mrb[64].mxu1 }
 0x321   : > { %8714 = vst [vmem:[#allocation18_spill] sm:$0xff] %v7928_v49  ;;  %v7930_v38 = vpop.f32.mrb[65].mxu1  ;;  %v4330_v49 = vsub.s32 1, %v4325_v29 }
 0x322   : > { %8715 = vst [vmem:[#allocation19_spill] sm:$0xff] %v7930_v38  ;;  %v7932_v59 = vpop.f32.mrb[66].mxu1  ;;  %v4322_v38 = vld [vmem:[%s8693_s2] sm:$0x3] }
 0x323   : > { %8716 = vst [vmem:[#allocation20_spill] sm:$0xff] %v7932_v59  ;;  %v7934_v41 = vpop.f32.mrb[67].mxu1  ;;  %v7948_v59 = vrot.slane %v4322_v38, %v4326_v35  ;;  %v7950_v8 = vrot.slane %v4322_v38, %v4330_v49 }
 0x324   : > { %8717 = vst [vmem:[#allocation21_spill] sm:$0xff] %v7934_v41 }
 0x328   : > { %v7936_v50 = vpop.f32.mrb[68].mxu1 }
 0x329   : > { %8718 = vst [vmem:[#allocation22_spill] sm:$0xff] %v7936_v50  ;;  %v7938_v18 = vpop.f32.mrb[69].mxu1 }
 0x32a   : > { %8719 = vst [vmem:[#allocation23_spill] sm:$0xff] %v7938_v18  ;;  %v7940_v34 = vpop.f32.mrb[70].mxu1 }
 0x32b   : > { %8720 = vst [vmem:[#allocation24_spill] sm:$0xff] %v7940_v34  ;;  %v7943_v21 = vpop.f32.mrb[71].mxu1 }
 0x32c   : > { %8721 = vst [vmem:[#allocation25_spill] sm:$0xff] %v7943_v21 }
 0x331   : > { %v4071_v41 = vpop.f32.mrb[0].mxu0 }
 0x332   : > { %v5786_v50 = vadd.f32 %v4071_v41, %v7751_v51  ;;  %v4073_v18 = vpop.f32.mrb[1].mxu0 }
 0x333   : > { %v5787_v34 = vadd.f32 %v4073_v18, %v7753_v54  ;;  %v4075_v52 = vpop.f32.mrb[2].mxu0 }
 0x334   : > { %v4334_v57 = vadd.f32 %v5786_v50, %v7948_v59  ;;  %v5788_v21 = vadd.f32 %v4075_v52, %v7757_v1  ;;  %v4077_v25 = vpop.f32.mrb[3].mxu0 }
 0x335   : > { %v4335_v12 = vadd.f32 %v5787_v34, %v7950_v8  ;;  %v5789_v29 = vadd.f32 %v4077_v25, %v7759_v14 }
 0x336   : > { %v4406_v49 = vmax.f32 %v4334_v57, 0.0  ;;  %v4336_v38 = vadd.f32 %v5788_v21, %v7948_v59 }
 0x337   : > { %v4407_v35 = vmax.f32 %v4335_v12, 0.0  ;;  %v4337_v56 = vadd.f32 %v5789_v29, %v7950_v8 }
 0x338   : > { %v4408_v50 = vmax.f32 %v4336_v38, 0.0 }
 0x339   : > { %v4409_v51 = vmax.f32 %v4337_v56, 0.0  ;;  %v4081_v41 = vpop.f32.mrb[4].mxu0  ;;  %4581 = vmatprep.mubr.f32.mxu1 %v4407_v35 }
 0x33a   : > { %v5790_v54 = vadd.f32 %v4081_v41, %v7770_v55  ;;  %v4083_v18 = vpop.f32.mrb[5].mxu0  ;;  %4582 = vmatmul.mubr.f32.vlgmr.msra.gmra.mrb[72].mxu1 %v4406_v49 }
 0x33b   : > { %v5791_v1 = vadd.f32 %v4083_v18, %v7772_v63  ;;  %v4085_v52 = vpop.f32.mrb[6].mxu0  ;;  %4586 = vmatprep.mubr.f32.mxu1 %v4409_v51 }
 0x33c   : > { %v4338_v14 = vadd.f32 %v5790_v54, %v7948_v59  ;;  %v5792_v12 = vadd.f32 %v4085_v52, %v7776_v61  ;;  %v4087_v25 = vpop.f32.mrb[7].mxu0 }
 0x33d   : > { %v4339_v57 = vadd.f32 %v5791_v1, %v7950_v8  ;;  %v5793_v56 = vadd.f32 %v4087_v25, %v7778_v36 }
 0x33e   : > { %4587 = vmatmul.mubr.f32.gmra.mrb[74].mxu1 %v4408_v50  ;;  %v4410_v21 = vmax.f32 %v4338_v14, 0.0  ;;  %v4340_v29 = vadd.f32 %v5792_v12, %v7948_v59 }
 0x33f   : > { %v4411_v34 = vmax.f32 %v4339_v57, 0.0  ;;  %v4341_v55 = vadd.f32 %v5793_v56, %v7950_v8 }
 0x340   : > { %v4412_v41 = vmax.f32 %v4340_v29, 0.0 }
 0x341   : > { %v4413_v63 = vmax.f32 %v4341_v55, 0.0  ;;  %v4091_v35 = vpop.f32.mrb[8].mxu0  ;;  %4591 = vmatprep.mubr.f32.mxu1 %v4411_v34 }
 0x342   : > { %v5794_v49 = vadd.f32 %v4091_v35, %v7782_v40  ;;  %v4093_v38 = vpop.f32.mrb[9].mxu0  ;;  %4592 = vmatmul.mubr.f32.gmra.mrb[76].mxu1 %v4410_v21 }
 0x343   : > { %v5795_v61 = vadd.f32 %v4093_v38, %v7784_v24  ;;  %v4095_v51 = vpop.f32.mrb[10].mxu0  ;;  %4596 = vmatprep.mubr.f32.mxu1 %v4413_v63 }
 0x344   : > { %v4342_v36 = vadd.f32 %v5794_v49, %v7948_v59  ;;  %v5796_v54 = vadd.f32 %v4095_v51, %v7788_v20  ;;  %v4097_v18 = vpop.f32.mrb[11].mxu0 }
 0x345   : > { %v4343_v1 = vadd.f32 %v5795_v61, %v7950_v8  ;;  %v5797_v52 = vadd.f32 %v4097_v18, %v7790_v58 }
 0x346   : > { %4597 = vmatmul.mubr.f32.gmra.mrb[78].mxu1 %v4412_v41  ;;  %v4414_v14 = vmax.f32 %v4342_v36, 0.0  ;;  %v4344_v12 = vadd.f32 %v5796_v54, %v7948_v59 }
 0x347   : > { %v4415_v50 = vmax.f32 %v4343_v1, 0.0  ;;  %v4345_v40 = vadd.f32 %v5797_v52, %v7950_v8 }
 0x348   : > { %v4416_v55 = vmax.f32 %v4344_v12, 0.0 }
 0x349   : > { %v4417_v24 = vmax.f32 %v4345_v40, 0.0  ;;  %v4101_v25 = vpop.f32.mrb[12].mxu0  ;;  %4601 = vmatprep.mubr.f32.mxu1 %v4415_v50 }
 0x34a   : > { %v5798_v57 = vadd.f32 %v4101_v25, %v7800_v6  ;;  %v4103_v56 = vpop.f32.mrb[13].mxu0  ;;  %4602 = vmatmul.mubr.f32.gmra.mrb[80].mxu1 %v4414_v14 }
 0x34b   : > { %v5799_v20 = vadd.f32 %v4103_v56, %v7802_v26  ;;  %v4105_v34 = vpop.f32.mrb[14].mxu0  ;;  %4606 = vmatprep.mubr.f32.mxu1 %v4417_v24 }
 0x34c   : > { %v4346_v58 = vadd.f32 %v5798_v57, %v7948_v59  ;;  %v5800_v21 = vadd.f32 %v4105_v34, %v7806_v9  ;;  %v4107_v29 = vpop.f32.mrb[15].mxu0 }
 0x34d   : > { %v4347_v63 = vadd.f32 %v5799_v20, %v7950_v8  ;;  %v5801_v35 = vadd.f32 %v4107_v29, %v7808_v3 }
 0x34e   : > { %4607 = vmatmul.mubr.f32.gmra.mrb[82].mxu1 %v4416_v55  ;;  %v4418_v38 = vmax.f32 %v4346_v58, 0.0  ;;  %v4348_v61 = vadd.f32 %v5800_v21, %v7948_v59 }
 0x34f   : > { %v4419_v49 = vmax.f32 %v4347_v63, 0.0  ;;  %v4349_v6 = vadd.f32 %v5801_v35, %v7950_v8 }
 0x350   : > { %v4420_v18 = vmax.f32 %v4348_v61, 0.0 }
 0x351   : > { %v4421_v26 = vmax.f32 %v4349_v6, 0.0  ;;  %v4111_v51 = vpop.f32.mrb[16].mxu0  ;;  %4611 = vmatprep.mubr.f32.mxu1 %v4419_v49 }
 0x352   : > { %v5802_v41 = vadd.f32 %v4111_v51, %v7812_v45  ;;  %v4113_v36 = vpop.f32.mrb[17].mxu0  ;;  %4612 = vmatmul.mubr.f32.gmra.mrb[84].mxu1 %v4418_v38 }
 0x353   : > { %v5803_v9 = vadd.f32 %v4113_v36, %v7814_v19  ;;  %v4115_v54 = vpop.f32.mrb[18].mxu0  ;;  %4616 = vmatprep.mubr.f32.mxu1 %v4421_v26 }
 0x354   : > { %v4350_v3 = vadd.f32 %v5802_v41, %v7948_v59  ;;  %v5804_v1 = vadd.f32 %v4115_v54, %v7818_v17  ;;  %v4117_v52 = vpop.f32.mrb[19].mxu0 }
 0x355   : > { %v4351_v50 = vadd.f32 %v5803_v9, %v7950_v8  ;;  %v5805_v40 = vadd.f32 %v4117_v52, %v7820_v5 }
 0x356   : > { %4617 = vmatmul.mubr.f32.gmra.mrb[86].mxu1 %v4420_v18  ;;  %v4422_v12 = vmax.f32 %v4350_v3, 0.0  ;;  %v4352_v24 = vadd.f32 %v5804_v1, %v7948_v59 }
 0x357   : > { %v4423_v14 = vmax.f32 %v4351_v50, 0.0  ;;  %v4353_v45 = vadd.f32 %v5805_v40, %v7950_v8 }
 0x358   : > { %v4424_v34 = vmax.f32 %v4352_v24, 0.0 }
 0x359   : > { %v4425_v19 = vmax.f32 %v4353_v45, 0.0  ;;  %v4121_v25 = vpop.f32.mrb[20].mxu0  ;;  %4621 = vmatprep.mubr.f32.mxu1 %v4423_v14 }
 0x35a   : > { %v5806_v57 = vadd.f32 %v4121_v25, %v7824_v4  ;;  %v4123_v56 = vpop.f32.mrb[21].mxu0  ;;  %4622 = vmatmul.mubr.f32.gmra.mrb[88].mxu1 %v4422_v12 }
 0x35b   : > { %v5807_v17 = vadd.f32 %v4123_v56, %v7826_v27  ;;  %v4125_v20 = vpop.f32.mrb[22].mxu0  ;;  %4626 = vmatprep.mubr.f32.mxu1 %v4425_v19 }
 0x35c   : > { %v4354_v5 = vadd.f32 %v5806_v57, %v7948_v59  ;;  %v5808_v55 = vadd.f32 %v4125_v20, %v7830_v28  ;;  %v4127_v58 = vpop.f32.mrb[23].mxu0 }
 0x35d   : > { %v4355_v21 = vadd.f32 %v5807_v17, %v7950_v8  ;;  %v5809_v29 = vadd.f32 %v4127_v58, %v7832_v30 }
 0x35e   : > { %4627 = vmatmul.mubr.f32.gmra.mrb[90].mxu1 %v4424_v34  ;;  %v4426_v35 = vmax.f32 %v4354_v5, 0.0  ;;  %v4356_v49 = vadd.f32 %v5808_v55, %v7948_v59 }
 0x35f   : > { %v4427_v63 = vmax.f32 %v4355_v21, 0.0  ;;  %v4357_v4 = vadd.f32 %v5809_v29, %v7950_v8 }
 0x360   : > { %v4428_v51 = vmax.f32 %v4356_v49, 0.0 }
 0x361   : > { %v4429_v27 = vmax.f32 %v4357_v4, 0.0  ;;  %v4131_v6 = vpop.f32.mrb[24].mxu0  ;;  %4631 = vmatprep.mubr.f32.mxu1 %v4427_v63 }
 0x362   : > { %v5810_v38 = vadd.f32 %v4131_v6, %v7836_v15  ;;  %v4133_v61 = vpop.f32.mrb[25].mxu0  ;;  %4632 = vmatmul.mubr.f32.gmra.mrb[92].mxu1 %v4426_v35 }
 0x363   : > { %v5811_v28 = vadd.f32 %v4133_v61, %v7838_v33  ;;  %v4135_v26 = vpop.f32.mrb[26].mxu0  ;;  %4636 = vmatprep.mubr.f32.mxu1 %v4429_v27 }
 0x364   : > { %v4358_v30 = vadd.f32 %v5810_v38, %v7948_v59  ;;  %v5812_v41 = vadd.f32 %v4135_v26, %v7842_v53  ;;  %v4137_v36 = vpop.f32.mrb[27].mxu0 }
 0x365   : > { %v4359_v9 = vadd.f32 %v5811_v28, %v7950_v8  ;;  %v5813_v54 = vadd.f32 %v4137_v36, %v7844_v11 }
 0x366   : > { %4637 = vmatmul.mubr.f32.gmra.mrb[94].mxu1 %v4428_v51  ;;  %v4430_v3 = vmax.f32 %v4358_v30, 0.0  ;;  %v4360_v1 = vadd.f32 %v5812_v41, %v7948_v59 }
 0x367   : > { %v4431_v18 = vmax.f32 %v4359_v9, 0.0  ;;  %v4361_v15 = vadd.f32 %v5813_v54, %v7950_v8 }
 0x368   : > { %v4432_v45 = vmax.f32 %v4360_v1, 0.0 }
 0x369   : > { %v4433_v33 = vmax.f32 %v4361_v15, 0.0  ;;  %v4141_v52 = vpop.f32.mrb[28].mxu0  ;;  %4641 = vmatprep.mubr.f32.mxu1 %v4431_v18 }
 0x36a   : > { %v5814_v50 = vadd.f32 %v4141_v52, %v7848_v43  ;;  %v4143_v40 = vpop.f32.mrb[29].mxu0  ;;  %4642 = vmatmul.mubr.f32.gmra.mrb[96].mxu1 %v4430_v3 }
 0x36b   : > { %v5815_v53 = vadd.f32 %v4143_v40, %v7850_v2  ;;  %v4145_v14 = vpop.f32.mrb[30].mxu0  ;;  %4646 = vmatprep.mubr.f32.mxu1 %v4433_v33 }
 0x36c   : > { %v4362_v11 = vadd.f32 %v5814_v50, %v7948_v59  ;;  %v5816_v12 = vadd.f32 %v4145_v14, %v7854_v47  ;;  %v4147_v24 = vpop.f32.mrb[31].mxu0 }
 0x36d   : > { %v4363_v19 = vadd.f32 %v5815_v53, %v7950_v8  ;;  %v5817_v25 = vadd.f32 %v4147_v24, %v7856_v23 }
 0x36e   : > { %4647 = vmatmul.mubr.f32.gmra.mrb[98].mxu1 %v4432_v45  ;;  %v4434_v56 = vmax.f32 %v4362_v11, 0.0  ;;  %v4364_v17 = vadd.f32 %v5816_v12, %v7948_v59 }
 0x36f   : > { %v4435_v57 = vmax.f32 %v4363_v19, 0.0  ;;  %v4365_v43 = vadd.f32 %v5817_v25, %v7950_v8 }
 0x370   : > { %v4436_v58 = vmax.f32 %v4364_v17, 0.0 }
 0x371   : > { %v4437_v2 = vmax.f32 %v4365_v43, 0.0  ;;  %v4151_v20 = vpop.f32.mrb[32].mxu0  ;;  %4651 = vmatprep.mubr.f32.mxu1 %v4435_v57 }
 0x372   : > { %v5818_v34 = vadd.f32 %v4151_v20, %v7860_v13  ;;  %v4153_v5 = vpop.f32.mrb[33].mxu0  ;;  %4652 = vmatmul.mubr.f32.gmra.mrb[100].mxu1 %v4434_v56 }
 0x373   : > { %v5819_v47 = vadd.f32 %v4153_v5, %v7862_v42  ;;  %v4155_v55 = vpop.f32.mrb[34].mxu0  ;;  %4656 = vmatprep.mubr.f32.mxu1 %v4437_v2 }
 0x374   : > { %v4366_v23 = vadd.f32 %v5818_v34, %v7948_v59  ;;  %v5820_v21 = vadd.f32 %v4155_v55, %v7866_v48  ;;  %v4157_v29 = vpop.f32.mrb[35].mxu0 }
 0x375   : > { %v4367_v63 = vadd.f32 %v5819_v47, %v7950_v8  ;;  %v5821_v4 = vadd.f32 %v4157_v29, %v7868_v0 }
 0x376   : > { %4657 = vmatmul.mubr.f32.gmra.mrb[102].mxu1 %v4436_v58  ;;  %v4438_v49 = vmax.f32 %v4366_v23, 0.0  ;;  %v4368_v27 = vadd.f32 %v5820_v21, %v7948_v59  ;;  %v8722_v58 = vld [vmem:[#allocation2_spill] sm:$0xff] }
 0x377   : > { %v4439_v35 = vmax.f32 %v4367_v63, 0.0  ;;  %v4369_v13 = vadd.f32 %v5821_v4, %v7950_v8 }
 0x378   : > { %v4440_v26 = vmax.f32 %v4368_v27, 0.0 }
 0x379   : > { %v4441_v42 = vmax.f32 %v4369_v13, 0.0  ;;  %v4161_v6 = vpop.f32.mrb[36].mxu0  ;;  %4661 = vmatprep.mubr.f32.mxu1 %v4439_v35  ;;  %v8724_v35 = vld [vmem:[#allocation4_spill] sm:$0xff] }
 0x37a   : > { %v5822_v38 = vadd.f32 %v4161_v6, %v7872_v31  ;;  %v4163_v61 = vpop.f32.mrb[37].mxu0  ;;  %4662 = vmatmul.mubr.f32.gmra.mrb[104].mxu1 %v4438_v49 }
 0x37b   : > { %v5823_v48 = vadd.f32 %v4163_v61, %v7874_v44  ;;  %v4165_v28 = vpop.f32.mrb[38].mxu0  ;;  %4666 = vmatprep.mubr.f32.mxu1 %v4441_v42  ;;  %v8725_v42 = vld [vmem:[#allocation5_spill] sm:$0xff] }
 0x37c   : > { %v4370_v0 = vadd.f32 %v5822_v38, %v7948_v59  ;;  %v5824_v51 = vadd.f32 %v4165_v28, %v7876_v46  ;;  %v4167_v30 = vpop.f32.mrb[39].mxu0 }
 0x37d   : > { %v4371_v41 = vadd.f32 %v5823_v48, %v7950_v8  ;;  %v5825_v36 = vadd.f32 %v4167_v30, %v7878_v22 }
 0x37e   : > { %4667 = vmatmul.mubr.f32.gmra.mrb[106].mxu1 %v4440_v26  ;;  %v4442_v54 = vmax.f32 %v4370_v0, 0.0  ;;  %v4372_v18 = vadd.f32 %v5824_v51, %v7948_v59  ;;  %v8726_v51 = vld [vmem:[#allocation6_spill] sm:$0xff] }
 0x37f   : > { %v4443_v9 = vmax.f32 %v4371_v41, 0.0  ;;  %v4373_v31 = vadd.f32 %v5825_v36, %v7950_v8  ;;  %v8727_v36 = vld [vmem:[#allocation7_spill] sm:$0xff] }
 0x380   : > { %v4444_v52 = vmax.f32 %v4372_v18, 0.0 }
 0x381   : > { %v4445_v44 = vmax.f32 %v4373_v31, 0.0  ;;  %v4171_v15 = vpop.f32.mrb[40].mxu0  ;;  %4671 = vmatprep.mubr.f32.mxu1 %v4443_v9 }
 0x382   : > { %v5826_v3 = vadd.f32 %v4171_v15, %v7880_v60  ;;  %v4173_v1 = vpop.f32.mrb[41].mxu0  ;;  %4672 = vmatmul.mubr.f32.gmra.mrb[108].mxu1 %v4442_v54 }
 0x383   : > { %v5827_v46 = vadd.f32 %v4173_v1, %v7882_v7  ;;  %v4175_v33 = vpop.f32.mrb[42].mxu0  ;;  %4676 = vmatprep.mubr.f32.mxu1 %v4445_v44  ;;  %v8728_v44 = vld [vmem:[#allocation8_spill] sm:$0xff] }
 0x384   : > { %v4374_v22 = vadd.f32 %v5826_v3, %v7948_v59  ;;  %v5828_v50 = vadd.f32 %v4175_v33, %v7884_v32  ;;  %v4177_v40 = vpop.f32.mrb[43].mxu0 }
 0x385   : > { %v4375_v53 = vadd.f32 %v5827_v46, %v7950_v8  ;;  %v5829_v14 = vadd.f32 %v4177_v40, %v7886_v37  ;;  %v8729_v46 = vld [vmem:[#allocation9_spill] sm:$0xff] }
 0x386   : > { %4677 = vmatmul.mubr.f32.gmra.mrb[110].mxu1 %v4444_v52  ;;  %v4446_v11 = vmax.f32 %v4374_v22, 0.0  ;;  %v4376_v12 = vadd.f32 %v5828_v50, %v7948_v59 }
 0x387   : > { %v4447_v45 = vmax.f32 %v4375_v53, 0.0  ;;  %v4377_v60 = vadd.f32 %v5829_v14, %v7950_v8 }
 0x388   : > { %v4448_v43 = vmax.f32 %v4376_v12, 0.0  ;;  %v8731_v12 = vld [vmem:[#allocation11_spill] sm:$0xff] }
 0x389   : > { %v4449_v7 = vmax.f32 %v4377_v60, 0.0  ;;  %v4181_v24 = vpop.f32.mrb[44].mxu0  ;;  %4681 = vmatprep.mubr.f32.mxu1 %v4447_v45  ;;  %v8730_v45 = vld [vmem:[#allocation10_spill] sm:$0xff] }
 0x38a   : > { %v5830_v19 = vadd.f32 %v4181_v24, %v7888_v39  ;;  %v4183_v25 = vpop.f32.mrb[45].mxu0  ;;  %4682 = vmatmul.mubr.f32.gmra.mrb[112].mxu1 %v4446_v11 }
 0x38b   : > { %v5831_v32 = vadd.f32 %v4183_v25, %v7890_v10  ;;  %v4185_v57 = vpop.f32.mrb[46].mxu0  ;;  %4686 = vmatprep.mubr.f32.mxu1 %v4449_v7 }
 0x38c   : > { %v4378_v37 = vadd.f32 %v5830_v19, %v7948_v59  ;;  %v5832_v56 = vadd.f32 %v4185_v57, %v7892_v62  ;;  %v4187_v17 = vpop.f32.mrb[47].mxu0  ;;  %v8723_v62 = vld [vmem:[#allocation3_spill] sm:$0xff] }
 0x38d   : > { %v4379_v2 = vadd.f32 %v5831_v32, %v7950_v8  ;;  %v5833_v20 = vadd.f32 %v4187_v17, %v7894_v16  ;;  %v8732_v32 = vld [vmem:[#allocation12_spill] sm:$0xff] }
 0x38e   : > { %4687 = vmatmul.mubr.f32.gmra.mrb[114].mxu1 %v4448_v43  ;;  %v4450_v5 = vmax.f32 %v4378_v37, 0.0  ;;  %v4380_v47 = vadd.f32 %v5832_v56, %v7948_v59  ;;  %v8733_v56 = vld [vmem:[#allocation13_spill] sm:$0xff] }
 0x38f   : > { %v4451_v34 = vmax.f32 %v4379_v2, 0.0  ;;  %v4381_v39 = vadd.f32 %v5833_v20, %v7950_v8 }
 0x390   : > { %v4452_v4 = vmax.f32 %v4380_v47, 0.0 }
 0x391   : > { %v4453_v10 = vmax.f32 %v4381_v39, 0.0  ;;  %v4191_v55 = vpop.f32.mrb[48].mxu0  ;;  %4691 = vmatprep.mubr.f32.mxu1 %v4451_v34 }
 0x392   : > { %v5834_v23 = vadd.f32 %v4191_v55, %v8722_v58  ;;  %v4193_v21 = vpop.f32.mrb[49].mxu0  ;;  %4692 = vmatmul.mubr.f32.gmra.mrb[116].mxu1 %v4450_v5 }
 0x393   : > { %v5835_v29 = vadd.f32 %v4193_v21, %v8723_v62  ;;  %v4195_v63 = vpop.f32.mrb[50].mxu0  ;;  %4696 = vmatprep.mubr.f32.mxu1 %v4453_v10  ;;  %v8734_v10 = vld [vmem:[#allocation14_spill] sm:$0xff] }
 0x394   : > { %v4382_v16 = vadd.f32 %v5834_v23, %v7948_v59  ;;  %v5836_v13 = vadd.f32 %v4195_v63, %v8724_v35  ;;  %v4197_v49 = vpop.f32.mrb[51].mxu0  ;;  %v8735_v23 = vld [vmem:[#allocation15_spill] sm:$0xff] }
 0x395   : > { %v4383_v27 = vadd.f32 %v5835_v29, %v7950_v8  ;;  %v5837_v6 = vadd.f32 %v4197_v49, %v8725_v42  ;;  %v8737_v49 = vld [vmem:[#allocation17_spill] sm:$0xff] }
 0x396   : > { %4697 = vmatmul.mubr.f32.gmra.mrb[118].mxu1 %v4452_v4  ;;  %v4454_v48 = vmax.f32 %v4382_v16, 0.0  ;;  %v4384_v28 = vadd.f32 %v5836_v13, %v7948_v59  ;;  %v8736_v4 = vld [vmem:[#allocation16_spill] sm:$0xff] }
 0x397   : > { %v4455_v38 = vmax.f32 %v4383_v27, 0.0  ;;  %v4385_v61 = vadd.f32 %v5837_v6, %v7950_v8 }
 0x398   : > { %v4456_v54 = vmax.f32 %v4384_v28, 0.0 }
 0x399   : > { %v4457_v26 = vmax.f32 %v4385_v61, 0.0  ;;  %v4201_v0 = vpop.f32.mrb[52].mxu0  ;;  %4701 = vmatprep.mubr.f32.mxu1 %v4455_v38 }
 0x39a   : > { %v5838_v30 = vadd.f32 %v4201_v0, %v8726_v51  ;;  %v4203_v41 = vpop.f32.mrb[53].mxu0  ;;  %4702 = vmatmul.mubr.f32.gmra.mrb[120].mxu1 %v4454_v48 }
 0x39b   : > { %v5839_v9 = vadd.f32 %v4203_v41, %v8727_v36  ;;  %v4205_v31 = vpop.f32.mrb[54].mxu0  ;;  %4706 = vmatprep.mubr.f32.mxu1 %v4457_v26  ;;  %v8738_v26 = vld [vmem:[#allocation18_spill] sm:$0xff] }
 0x39c   : > { %v4386_v18 = vadd.f32 %v5838_v30, %v7948_v59  ;;  %v5840_v15 = vadd.f32 %v4205_v31, %v8728_v44  ;;  %v4207_v3 = vpop.f32.mrb[55].mxu0  ;;  %v8739_v30 = vld [vmem:[#allocation19_spill] sm:$0xff] }
 0x39d   : > { %v4387_v1 = vadd.f32 %v5839_v9, %v7950_v8  ;;  %v5841_v33 = vadd.f32 %v4207_v3, %v8729_v46  ;;  %v8741_v3 = vld [vmem:[#allocation21_spill] sm:$0xff] }
 0x39e   : > { %4707 = vmatmul.mubr.f32.gmra.mrb[122].mxu1 %v4456_v54  ;;  %v4458_v50 = vmax.f32 %v4386_v18, 0.0  ;;  %v4388_v40 = vadd.f32 %v5840_v15, %v7948_v59  ;;  %v8740_v54 = vld [vmem:[#allocation20_spill] sm:$0xff] }
 0x39f   : > { %v4459_v52 = vmax.f32 %v4387_v1, 0.0  ;;  %v4389_v22 = vadd.f32 %v5841_v33, %v7950_v8 }
 0x3a0   : > { %v4460_v19 = vmax.f32 %v4388_v40, 0.0 }
 0x3a1   : > { %v4461_v53 = vmax.f32 %v4389_v22, 0.0  ;;  %v4211_v14 = vpop.f32.mrb[56].mxu0  ;;  %4711 = vmatprep.mubr.f32.mxu1 %v4459_v52 }
 0x3a2   : > { %v5842_v60 = vadd.f32 %v4211_v14, %v8730_v45  ;;  %v4213_v11 = vpop.f32.mrb[57].mxu0  ;;  %4712 = vmatmul.mubr.f32.gmra.mrb[124].mxu1 %v4458_v50 }
 0x3a3   : > { %v5843_v7 = vadd.f32 %v4213_v11, %v8731_v12  ;;  %v4215_v24 = vpop.f32.mrb[58].mxu0  ;;  %4716 = vmatprep.mubr.f32.mxu1 %v4461_v53  ;;  %v8742_v53 = vld [vmem:[#allocation22_spill] sm:$0xff] }
 0x3a4   : > { %v4390_v25 = vadd.f32 %v5842_v60, %v7948_v59  ;;  %v5844_v57 = vadd.f32 %v4215_v24, %v8732_v32  ;;  %v4217_v43 = vpop.f32.mrb[59].mxu0  ;;  %v8743_v60 = vld [vmem:[#allocation23_spill] sm:$0xff] }
 0x3a5   : > { %v4391_v37 = vadd.f32 %v5843_v7, %v7950_v8  ;;  %v5845_v17 = vadd.f32 %v4217_v43, %v8733_v56  ;;  %v8745_v43 = vld [vmem:[#allocation25_spill] sm:$0xff] }
 0x3a6   : > { %4717 = vmatmul.mubr.f32.gmra.mrb[126].mxu1 %v4460_v19  ;;  %v4462_v34 = vmax.f32 %v4390_v25, 0.0  ;;  %v4392_v39 = vadd.f32 %v5844_v57, %v7948_v59  ;;  %v8744_v19 = vld [vmem:[#allocation24_spill] sm:$0xff] }
 0x3a7   : > { %v4463_v2 = vmax.f32 %v4391_v37, 0.0  ;;  %v4393_v20 = vadd.f32 %v5845_v17, %v7950_v8 }
 0x3a8   : > { %v4464_v29 = vmax.f32 %v4392_v39, 0.0 }
 0x3a9   : > { %v4465_v5 = vmax.f32 %v4393_v20, 0.0  ;;  %v4221_v47 = vpop.f32.mrb[60].mxu0  ;;  %4721 = vmatprep.mubr.f32.mxu1 %v4463_v2 }
 0x3aa   : > { %v5846_v55 = vadd.f32 %v4221_v47, %v8734_v10  ;;  %v4223_v58 = vpop.f32.mrb[61].mxu0  ;;  %4722 = vmatmul.mubr.f32.gmra.mrb[128].mxu1 %v4462_v34  ;;  %v8102_v10 = vld [vmem:[%s8695_s4] ss:$0 sm:$0xff] }
 0x3ab   : > { %v5847_v21 = vadd.f32 %v4223_v58, %v8735_v23  ;;  %v4225_v62 = vpop.f32.mrb[62].mxu0  ;;  %4726 = vmatprep.mubr.f32.mxu1 %v4465_v5  ;;  %v8746_v5 = vlaneseq }
 0x3ac   : > { %v4394_v63 = vadd.f32 %v5846_v55, %v7948_v59  ;;  %v5848_v16 = vadd.f32 %v4225_v62, %v8736_v4  ;;  %v4227_v35 = vpop.f32.mrb[63].mxu0 }
 0x3ad   : > { %v4395_v13 = vadd.f32 %v5847_v21, %v7950_v8  ;;  %v5849_v27 = vadd.f32 %v4227_v35, %v8737_v49  ;;  %v8097_v47 = vand.u32 127, %v8746_v5 }
 0x3ae   : > { %4727 = vmatmul.mubr.f32.gmra.mrb[130].mxu1 %v4464_v29  ;;  %v4466_v38 = vmax.f32 %v4394_v63, 0.0  ;;  %v4396_v61 = vadd.f32 %v5848_v16, %v7948_v59 }
 0x3af   : > { %v4467_v42 = vmax.f32 %v4395_v13, 0.0  ;;  %v4397_v6 = vadd.f32 %v5849_v27, %v7950_v8  ;;  %vm4764_vm8 = vcmp.lt.s32.totalorder %v8097_v47, 4  ;;  %vm5089_vm9 = vcmp.eq.s32.totalorder %v8097_v47, 7 }
 0x3b0   : > { %v4468_v9 = vmax.f32 %v4396_v61, 0.0 }
 0x3b1   : > { %v4469_v48 = vmax.f32 %v4397_v6, 0.0  ;;  %v4231_v28 = vpop.f32.mrb[64].mxu0  ;;  %4731 = vmatprep.mubr.f32.mxu1 %v4467_v42 }
 0x3b2   : > { %v5850_v0 = vadd.f32 %v4231_v28, %v8738_v26  ;;  %v4233_v51 = vpop.f32.mrb[65].mxu0  ;;  %4732 = vmatmul.mubr.f32.gmra.mrb[132].mxu1 %v4466_v38 }
 0x3b3   : > { %v5851_v41 = vadd.f32 %v4233_v51, %v8739_v30  ;;  %v4235_v36 = vpop.f32.mrb[66].mxu0  ;;  %4736 = vmatprep.mubr.f32.mxu1 %v4469_v48 }
 0x3b4   : > { %v4398_v31 = vadd.f32 %v5850_v0, %v7948_v59  ;;  %v5852_v18 = vadd.f32 %v4235_v36, %v8740_v54  ;;  %v4237_v44 = vpop.f32.mrb[67].mxu0 }
 0x3b5   : > { %v4399_v15 = vadd.f32 %v5851_v41, %v7950_v8  ;;  %v5853_v1 = vadd.f32 %v4237_v44, %v8741_v3 }
 0x3b6   : > { %4737 = vmatmul.mubr.f32.gmra.mrb[134].mxu1 %v4468_v9  ;;  %v4470_v52 = vmax.f32 %v4398_v31, 0.0  ;;  %v4400_v22 = vadd.f32 %v5852_v18, %v7948_v59 }
 0x3b7   : > { %v4471_v46 = vmax.f32 %v4399_v15, 0.0  ;;  %v4401_v33 = vadd.f32 %v5853_v1, %v7950_v8 }
 0x3b8   : > { %v4472_v7 = vmax.f32 %v4400_v22, 0.0 }
 0x3b9   : > { %v4473_v50 = vmax.f32 %v4401_v33, 0.0  ;;  %v4241_v40 = vpop.f32.mrb[68].mxu0  ;;  %4741 = vmatprep.mubr.f32.mxu1 %v4471_v46 }
 0x3ba   : > { %v5854_v14 = vadd.f32 %v4241_v40, %v8742_v53  ;;  %v4243_v45 = vpop.f32.mrb[69].mxu0  ;;  %4742 = vmatmul.mubr.f32.gmra.mrb[136].mxu1 %v4470_v52 }
 0x3bb   : > { %v5855_v11 = vadd.f32 %v4243_v45, %v8743_v60  ;;  %v4245_v12 = vpop.f32.mrb[70].mxu0  ;;  %4746 = vmatprep.mubr.f32.mxu1 %v4473_v50 }
 0x3bc   : > { %v4402_v24 = vadd.f32 %v5854_v14, %v7948_v59  ;;  %v5856_v25 = vadd.f32 %v4245_v12, %v8744_v19  ;;  %v4247_v32 = vpop.f32.mrb[71].mxu0 }
 0x3bd   : > { %v4403_v57 = vadd.f32 %v5855_v11, %v7950_v8  ;;  %v5857_v37 = vadd.f32 %v4247_v32, %v8745_v43 }
 0x3be   : > { %4747 = vmatmul.mubr.f32.gmra.mrb[138].mxu1 %v4472_v7  ;;  %v4474_v2 = vmax.f32 %v4402_v24, 0.0  ;;  %v4404_v20 = vadd.f32 %v5856_v25, %v7948_v59 }
 0x3bf   : > { %v4475_v56 = vmax.f32 %v4403_v57, 0.0  ;;  %v4405_v17 = vadd.f32 %v5857_v37, %v7950_v8 }
 0x3c0   : > { %v4476_v39 = vmax.f32 %v4404_v20, 0.0 }
 0x3c1   : > { %v4477_v34 = vmax.f32 %v4405_v17, 0.0  ;;  %4751 = vmatprep.mubr.f32.mxu1 %v4475_v56 }
 0x3c2   : > { %4752 = vmatmul.mubr.f32.gmra.mrb[140].mxu1 %v4474_v2 }
 0x3c3   : > { %4756 = vmatprep.mubr.f32.mxu1 %v4477_v34 }
 0x3c6   : > { %4757 = vmatmul.mubr.f32.gmra.mrb[142].mxu1 %v4476_v39 }
 0x40d   : > { %v4583_v55 = vpop.f32.mrb[72].mxu1 }
 0x40e   : > { %v8105_v8 = vadd.f32 %v8102_v10, %v4583_v55  ;;  %v4585_v58 = vpop.f32.mrb[73].mxu1 }
 0x410   : > { %v4765_v59 = vmul.f32 %v8105_v8, %v8105_v8 }
 0x411   : > { %v4588_v23 = vpop.f32.mrb[74].mxu1 }
 0x412   : > { %v8111_v21 = vadd.f32 %v8102_v10, %v4588_v23  ;;  %v4590_v62 = vpop.f32.mrb[75].mxu1  ;;  %v4801_v29 = vsel %vm4764_vm8, %v4765_v59, 0.0 }
 0x413   : > { %v4837_v63 = vsel %vm513_vm3, %v4801_v29, 0.0 }
 0x414   : > { %4838 = vadd.xlane.f32.xlu0 %v4837_v63  ;;  %v4766_v4 = vmul.f32 %v8111_v21, %v8111_v21 }
 0x415   : > { %v4593_v16 = vpop.f32.mrb[76].mxu1 }
 0x416   : > { %v8119_v35 = vadd.f32 %v8102_v10, %v4593_v16  ;;  %v4595_v13 = vpop.f32.mrb[77].mxu1  ;;  %v4802_v49 = vsel %vm4764_vm8, %v4766_v4, 0.0 }
 0x417   : > { %v4840_v27 = vsel %vm513_vm3, %v4802_v49, 0.0 }
 0x418   : > { %4841 = vadd.xlane.f32.xlu0 %v4840_v27  ;;  %v4767_v42 = vmul.f32 %v8119_v35, %v8119_v35 }
 0x419   : > { %v4598_v6 = vpop.f32.mrb[78].mxu1 }
 0x41a   : > { %v8127_v38 = vadd.f32 %v8102_v10, %v4598_v6  ;;  %v4600_v61 = vpop.f32.mrb[79].mxu1  ;;  %v4803_v48 = vsel %vm4764_vm8, %v4767_v42, 0.0 }
 0x41b   : > { %v4843_v28 = vsel %vm513_vm3, %v4803_v48, 0.0 }
 0x41c   : > { %4844 = vadd.xlane.f32.xlu1 %v4843_v28  ;;  %v4768_v26 = vmul.f32 %v8127_v38, %v8127_v38 }
 0x41d   : > { %v4603_v0 = vpop.f32.mrb[80].mxu1 }
 0x41e   : > { %v8135_v51 = vadd.f32 %v8102_v10, %v4603_v0  ;;  %v4605_v30 = vpop.f32.mrb[81].mxu1  ;;  %v4804_v41 = vsel %vm4764_vm8, %v4768_v26, 0.0 }
 0x41f   : > { %v4846_v36 = vsel %vm513_vm3, %v4804_v41, 0.0 }
 0x420   : > { %4847 = vadd.xlane.f32.xlu1 %v4846_v36  ;;  %v4769_v9 = vmul.f32 %v8135_v51, %v8135_v51 }
 0x421   : > { %v4608_v31 = vpop.f32.mrb[82].mxu1 }
 0x422   : > { %v8143_v54 = vadd.f32 %v8102_v10, %v4608_v31  ;;  %v4610_v18 = vpop.f32.mrb[83].mxu1  ;;  %v4805_v44 = vsel %vm4764_vm8, %v4769_v9, 0.0 }
 0x423   : > { %v4849_v15 = vsel %vm513_vm3, %v4805_v44, 0.0 }
 0x424   : > { %4850 = vadd.xlane.f32.xlu0 %v4849_v15  ;;  %v4770_v3 = vmul.f32 %v8143_v54, %v8143_v54 }
 0x425   : > { %v4613_v1 = vpop.f32.mrb[84].mxu1 }
 0x426   : > { %v8151_v46 = vadd.f32 %v8102_v10, %v4613_v1  ;;  %v4615_v33 = vpop.f32.mrb[85].mxu1  ;;  %v4806_v52 = vsel %vm4764_vm8, %v4770_v3, 0.0 }
 0x427   : > { %v4852_v22 = vsel %vm513_vm3, %v4806_v52, 0.0 }
 0x428   : > { %4853 = vadd.xlane.f32.xlu1 %v4852_v22  ;;  %v4771_v50 = vmul.f32 %v8151_v46, %v8151_v46 }
 0x429   : > { %v4618_v40 = vpop.f32.mrb[86].mxu1 }
 0x42a   : > { %v8159_v53 = vadd.f32 %v8102_v10, %v4618_v40  ;;  %v4620_v14 = vpop.f32.mrb[87].mxu1  ;;  %v4807_v45 = vsel %vm4764_vm8, %v4771_v50, 0.0 }
 0x42b   : > { %v4855_v60 = vsel %vm513_vm3, %v4807_v45, 0.0 }
 0x42c   : > { %4856 = vadd.xlane.f32.xlu0 %v4855_v60  ;;  %v4772_v11 = vmul.f32 %v8159_v53, %v8159_v53 }
 0x42d   : > { %v4623_v12 = vpop.f32.mrb[88].mxu1 }
 0x42e   : > { %v8167_v7 = vadd.f32 %v8102_v10, %v4623_v12  ;;  %v4625_v24 = vpop.f32.mrb[89].mxu1  ;;  %v4808_v19 = vsel %vm4764_vm8, %v4772_v11, 0.0 }
 0x42f   : > { %v4858_v25 = vsel %vm513_vm3, %v4808_v19, 0.0 }
 0x430   : > { %4859 = vadd.xlane.f32.xlu1 %v4858_v25  ;;  %v4773_v32 = vmul.f32 %v8167_v7, %v8167_v7 }
 0x431   : > { %v4628_v57 = vpop.f32.mrb[90].mxu1 }
 0x432   : > { %v8175_v43 = vadd.f32 %v8102_v10, %v4628_v57  ;;  %v4630_v37 = vpop.f32.mrb[91].mxu1  ;;  %v4809_v56 = vsel %vm4764_vm8, %v4773_v32, 0.0 }
 0x433   : > { %v4861_v17 = vsel %vm513_vm3, %v4809_v56, 0.0 }
 0x434   : > { %4862 = vadd.xlane.f32.xlu0 %v4861_v17  ;;  %v4774_v2 = vmul.f32 %v8175_v43, %v8175_v43 }
 0x435   : > { %v4633_v20 = vpop.f32.mrb[92].mxu1 }
 0x436   : > { %v8183_v34 = vadd.f32 %v8102_v10, %v4633_v20  ;;  %v4635_v39 = vpop.f32.mrb[93].mxu1  ;;  %v4810_v5 = vsel %vm4764_vm8, %v4774_v2, 0.0 }
 0x437   : > { %v4864_v55 = vsel %vm513_vm3, %v4810_v5, 0.0 }
 0x438   : > { %4865 = vadd.xlane.f32.xlu1 %v4864_v55  ;;  %v4775_v58 = vmul.f32 %v8183_v34, %v8183_v34 }
 0x439   : > { %v4638_v59 = vpop.f32.mrb[94].mxu1 }
 0x43a   : > { %v8191_v23 = vadd.f32 %v8102_v10, %v4638_v59  ;;  %v4640_v62 = vpop.f32.mrb[95].mxu1  ;;  %v4811_v29 = vsel %vm4764_vm8, %v4775_v58, 0.0 }
 0x43b   : > { %v4867_v63 = vsel %vm513_vm3, %v4811_v29, 0.0 }
 0x43c   : > { %4868 = vadd.xlane.f32.xlu0 %v4867_v63  ;;  %v4776_v4 = vmul.f32 %v8191_v23, %v8191_v23 }
 0x43d   : > { %v4643_v16 = vpop.f32.mrb[96].mxu1 }
 0x43e   : > { %v8199_v13 = vadd.f32 %v8102_v10, %v4643_v16  ;;  %v4645_v49 = vpop.f32.mrb[97].mxu1  ;;  %v4812_v27 = vsel %vm4764_vm8, %v4776_v4, 0.0 }
 0x43f   : > { %v4870_v42 = vsel %vm513_vm3, %v4812_v27, 0.0 }
 0x440   : > { %4871 = vadd.xlane.f32.xlu1 %v4870_v42  ;;  %v4777_v6 = vmul.f32 %v8199_v13, %v8199_v13 }
 0x441   : > { %v4648_v61 = vpop.f32.mrb[98].mxu1 }
 0x442   : > { %v8207_v48 = vadd.f32 %v8102_v10, %v4648_v61  ;;  %v4650_v28 = vpop.f32.mrb[99].mxu1  ;;  %v4813_v26 = vsel %vm4764_vm8, %v4777_v6, 0.0 }
 0x443   : > { %v4873_v0 = vsel %vm513_vm3, %v4813_v26, 0.0 }
 0x444   : > { %4874 = vadd.xlane.f32.xlu0 %v4873_v0  ;;  %v4778_v30 = vmul.f32 %v8207_v48, %v8207_v48 }
 0x445   : > { %v4653_v41 = vpop.f32.mrb[100].mxu1 }
 0x446   : > { %v8215_v36 = vadd.f32 %v8102_v10, %v4653_v41  ;;  %v4655_v9 = vpop.f32.mrb[101].mxu1  ;;  %v4814_v31 = vsel %vm4764_vm8, %v4778_v30, 0.0 }
 0x447   : > { %v4876_v18 = vsel %vm513_vm3, %v4814_v31, 0.0 }
 0x448   : > { %4877 = vadd.xlane.f32.xlu1 %v4876_v18  ;;  %v4779_v44 = vmul.f32 %v8215_v36, %v8215_v36 }
 0x449   : > { %v4658_v15 = vpop.f32.mrb[102].mxu1 }
 0x44a   : > { %v8223_v3 = vadd.f32 %v8102_v10, %v4658_v15  ;;  %v4660_v1 = vpop.f32.mrb[103].mxu1  ;;  %v4815_v33 = vsel %vm4764_vm8, %v4779_v44, 0.0 }
 0x44b   : > { %v4879_v52 = vsel %vm513_vm3, %v4815_v33, 0.0 }
 0x44c   : > { %4880 = vadd.xlane.f32.xlu0 %v4879_v52  ;;  %v4780_v22 = vmul.f32 %v8223_v3, %v8223_v3 }
 0x44d   : > { %v4663_v50 = vpop.f32.mrb[104].mxu1 }
 0x44e   : > { %v8231_v40 = vadd.f32 %v8102_v10, %v4663_v50  ;;  %v4665_v14 = vpop.f32.mrb[105].mxu1  ;;  %v4816_v45 = vsel %vm4764_vm8, %v4780_v22, 0.0 }
 0x44f   : > { %v4882_v60 = vsel %vm513_vm3, %v4816_v45, 0.0 }
 0x450   : > { %4883 = vadd.xlane.f32.xlu1 %v4882_v60  ;;  %v4781_v11 = vmul.f32 %v8231_v40, %v8231_v40 }
 0x451   : > { %v4668_v12 = vpop.f32.mrb[106].mxu1 }
 0x452   : > { %v8239_v24 = vadd.f32 %v8102_v10, %v4668_v12  ;;  %v4670_v19 = vpop.f32.mrb[107].mxu1  ;;  %v4817_v25 = vsel %vm4764_vm8, %v4781_v11, 0.0 }
 0x453   : > { %v4885_v32 = vsel %vm513_vm3, %v4817_v25, 0.0 }
 0x454   : > { %4886 = vadd.xlane.f32.xlu0 %v4885_v32  ;;  %v4782_v57 = vmul.f32 %v8239_v24, %v8239_v24 }
 0x455   : > { %v4673_v37 = vpop.f32.mrb[108].mxu1 }
 0x456   : > { %v8247_v56 = vadd.f32 %v8102_v10, %v4673_v37  ;;  %v4675_v17 = vpop.f32.mrb[109].mxu1  ;;  %v4818_v2 = vsel %vm4764_vm8, %v4782_v57, 0.0 }
 0x457   : > { %v4888_v20 = vsel %vm513_vm3, %v4818_v2, 0.0 }
 0x458   : > { %4889 = vadd.xlane.f32.xlu1 %v4888_v20  ;;  %v4783_v39 = vmul.f32 %v8247_v56, %v8247_v56 }
 0x459   : > { %v4678_v5 = vpop.f32.mrb[110].mxu1 }
 0x45a   : > { %v8255_v55 = vadd.f32 %v8102_v10, %v4678_v5  ;;  %v4680_v58 = vpop.f32.mrb[111].mxu1  ;;  %v4819_v59 = vsel %vm4764_vm8, %v4783_v39, 0.0 }
 0x45b   : > { %v4891_v62 = vsel %vm513_vm3, %v4819_v59, 0.0 }
 0x45c   : > { %4892 = vadd.xlane.f32.xlu0 %v4891_v62  ;;  %v4784_v29 = vmul.f32 %v8255_v55, %v8255_v55 }
 0x45d   : > { %v4683_v63 = vpop.f32.mrb[112].mxu1 }
 0x45e   : > { %v8263_v4 = vadd.f32 %v8102_v10, %v4683_v63  ;;  %v4685_v16 = vpop.f32.mrb[113].mxu1  ;;  %v4820_v49 = vsel %vm4764_vm8, %v4784_v29, 0.0 }
 0x45f   : > { %v4894_v27 = vsel %vm513_vm3, %v4820_v49, 0.0 }
 0x460   : > { %4895 = vadd.xlane.f32.xlu1 %v4894_v27  ;;  %v4785_v42 = vmul.f32 %v8263_v4, %v8263_v4 }
 0x461   : > { %v4688_v6 = vpop.f32.mrb[114].mxu1 }
 0x462   : > { %v8271_v61 = vadd.f32 %v8102_v10, %v4688_v6  ;;  %v4690_v28 = vpop.f32.mrb[115].mxu1  ;;  %v4821_v26 = vsel %vm4764_vm8, %v4785_v42, 0.0 }
 0x463   : > { %v4897_v0 = vsel %vm513_vm3, %v4821_v26, 0.0 }
 0x464   : > { %4898 = vadd.xlane.f32.xlu0 %v4897_v0  ;;  %v4786_v30 = vmul.f32 %v8271_v61, %v8271_v61 }
 0x465   : > { %v4693_v41 = vpop.f32.mrb[116].mxu1 }
 0x466   : > { %v8279_v9 = vadd.f32 %v8102_v10, %v4693_v41  ;;  %v4695_v31 = vpop.f32.mrb[117].mxu1  ;;  %v4822_v18 = vsel %vm4764_vm8, %v4786_v30, 0.0 }
 0x467   : > { %v4900_v44 = vsel %vm513_vm3, %v4822_v18, 0.0 }
 0x468   : > { %4901 = vadd.xlane.f32.xlu1 %v4900_v44  ;;  %v4787_v15 = vmul.f32 %v8279_v9, %v8279_v9 }
 0x469   : > { %v4698_v1 = vpop.f32.mrb[118].mxu1 }
 0x46a   : > { %v8287_v33 = vadd.f32 %v8102_v10, %v4698_v1  ;;  %v4700_v52 = vpop.f32.mrb[119].mxu1  ;;  %v4823_v22 = vsel %vm4764_vm8, %v4787_v15, 0.0 }
 0x46b   : > { %v4903_v50 = vsel %vm513_vm3, %v4823_v22, 0.0 }
 0x46c   : > { %4904 = vadd.xlane.f32.xlu0 %v4903_v50  ;;  %v4788_v14 = vmul.f32 %v8287_v33, %v8287_v33 }
 0x46d   : > { %v4703_v45 = vpop.f32.mrb[120].mxu1 }
 0x46e   : > { %v8295_v60 = vadd.f32 %v8102_v10, %v4703_v45  ;;  %v4705_v11 = vpop.f32.mrb[121].mxu1  ;;  %v4824_v12 = vsel %vm4764_vm8, %v4788_v14, 0.0 }
 0x46f   : > { %v4906_v19 = vsel %vm513_vm3, %v4824_v12, 0.0 }
 0x470   : > { %4907 = vadd.xlane.f32.xlu1 %v4906_v19  ;;  %v4789_v25 = vmul.f32 %v8295_v60, %v8295_v60 }
 0x471   : > { %v4708_v32 = vpop.f32.mrb[122].mxu1 }
 0x472   : > { %v8303_v57 = vadd.f32 %v8102_v10, %v4708_v32  ;;  %v4710_v37 = vpop.f32.mrb[123].mxu1  ;;  %v4825_v17 = vsel %vm4764_vm8, %v4789_v25, 0.0 }
 0x473   : > { %v4909_v2 = vsel %vm513_vm3, %v4825_v17, 0.0 }
 0x474   : > { %4910 = vadd.xlane.f32.xlu0 %v4909_v2  ;;  %v4790_v20 = vmul.f32 %v8303_v57, %v8303_v57 }
 0x475   : > { %v4713_v39 = vpop.f32.mrb[124].mxu1 }
 0x476   : > { %v8311_v5 = vadd.f32 %v8102_v10, %v4713_v39  ;;  %v4715_v58 = vpop.f32.mrb[125].mxu1  ;;  %v4826_v59 = vsel %vm4764_vm8, %v4790_v20, 0.0 }
 0x477   : > { %v4912_v62 = vsel %vm513_vm3, %v4826_v59, 0.0 }
 0x478   : > { %4913 = vadd.xlane.f32.xlu1 %v4912_v62  ;;  %v4791_v29 = vmul.f32 %v8311_v5, %v8311_v5 }
 0x479   : > { %v4718_v63 = vpop.f32.mrb[126].mxu1 }
 0x47a   : > { %v8319_v16 = vadd.f32 %v8102_v10, %v4718_v63  ;;  %v4720_v49 = vpop.f32.mrb[127].mxu1  ;;  %v4827_v27 = vsel %vm4764_vm8, %v4791_v29, 0.0 }
 0x47b   : > { %v4915_v42 = vsel %vm513_vm3, %v4827_v27, 0.0  ;;  %v5700_v27 = vmul.f32 -1.442695, %v8105_v8 }
 0x47c   : > { %4916 = vadd.xlane.f32.xlu0 %v4915_v42  ;;  %v4792_v6 = vmul.f32 %v8319_v16, %v8319_v16 }
 0x47d   : > { %v4723_v28 = vpop.f32.mrb[128].mxu1  ;;  %6454 = vpow2.f32 %v5700_v27  ;;  %v5705_v27 = vmul.f32 -1.442695, %v8143_v54 }
 0x47e   : > { %v8327_v26 = vadd.f32 %v8102_v10, %v4723_v28  ;;  %v4725_v0 = vpop.f32.mrb[129].mxu1  ;;  %v4828_v30 = vsel %vm4764_vm8, %v4792_v6, 0.0 }
 0x47f   : > { %v4918_v41 = vsel %vm513_vm3, %v4828_v30, 0.0 }
 0x480   : > { %4919 = vadd.xlane.f32.xlu1 %v4918_v41  ;;  %v4793_v31 = vmul.f32 %v8327_v26, %v8327_v26 }
 0x481   : > { %v4728_v18 = vpop.f32.mrb[130].mxu1 }
 0x482   : > { %v8335_v44 = vadd.f32 %v8102_v10, %v4728_v18  ;;  %v4730_v15 = vpop.f32.mrb[131].mxu1  ;;  %v4829_v1 = vsel %vm4764_vm8, %v4793_v31, 0.0  ;;  %v5701_v31 = vmul.f32 -1.442695, %v8111_v21 }
 0x483   : > { %v4921_v52 = vsel %vm513_vm3, %v4829_v1, 0.0 }
 0x484   : > { %4922 = vadd.xlane.f32.xlu0 %v4921_v52  ;;  %v4794_v22 = vmul.f32 %v8335_v44, %v8335_v44  ;;  %6456 = vpow2.f32 %v5701_v31 }
 0x485   : > { %v4733_v50 = vpop.f32.mrb[132].mxu1 }
 0x486   : > { %v8343_v14 = vadd.f32 %v8102_v10, %v4733_v50  ;;  %v4735_v45 = vpop.f32.mrb[133].mxu1  ;;  %v4830_v11 = vsel %vm4764_vm8, %v4794_v22, 0.0 }
 0x487   : > { %v4924_v12 = vsel %vm513_vm3, %v4830_v11, 0.0  ;;  %v5702_v45 = vmul.f32 -1.442695, %v8119_v35 }
 0x488   : > { %4925 = vadd.xlane.f32.xlu1 %v4924_v12  ;;  %v4795_v19 = vmul.f32 %v8343_v14, %v8343_v14 }
 0x489   : > { %v4738_v25 = vpop.f32.mrb[134].mxu1  ;;  %6458 = vpow2.f32 %v5702_v45 }
 0x48a   : > { %v8351_v32 = vadd.f32 %v8102_v10, %v4738_v25  ;;  %v4740_v37 = vpop.f32.mrb[135].mxu1  ;;  %v4831_v17 = vsel %vm4764_vm8, %v4795_v19, 0.0 }
 0x48b   : > { %v4927_v2 = vsel %vm513_vm3, %v4831_v17, 0.0  ;;  %v5703_v17 = vmul.f32 -1.442695, %v8127_v38 }
 0x48c   : > { %4928 = vadd.xlane.f32.xlu0 %v4927_v2  ;;  %v4796_v20 = vmul.f32 %v8351_v32, %v8351_v32 }
 0x48d   : > { %v4743_v39 = vpop.f32.mrb[136].mxu1  ;;  %6460 = vpow2.f32 %v5703_v17 }
 0x48e   : > { %v8359_v58 = vadd.f32 %v8102_v10, %v4743_v39  ;;  %v4745_v59 = vpop.f32.mrb[137].mxu1  ;;  %v4832_v62 = vsel %vm4764_vm8, %v4796_v20, 0.0 }
 0x48f   : > { %v4930_v29 = vsel %vm513_vm3, %v4832_v62, 0.0  ;;  %v5704_v59 = vmul.f32 -1.442695, %v8135_v51 }
 0x490   : > { %4931 = vadd.xlane.f32.xlu1 %v4930_v29  ;;  %v4797_v63 = vmul.f32 %v8359_v58, %v8359_v58 }
 0x491   : > { %v4748_v49 = vpop.f32.mrb[138].mxu1 }
 0x492   : > { %v8368_v42 = vadd.f32 %v8102_v10, %v4748_v49  ;;  %v4750_v6 = vpop.f32.mrb[139].mxu1  ;;  %v4833_v28 = vsel %vm4764_vm8, %v4797_v63, 0.0 }
 0x493   : > { %v4933_v0 = vsel %vm513_vm3, %v4833_v28, 0.0 }
 0x494   : > { %4934 = vadd.xlane.f32.xlu0 %v4933_v0  ;;  %v4798_v30 = vmul.f32 %v8368_v42, %v8368_v42 }
 0x495   : > { %v4753_v41 = vpop.f32.mrb[140].mxu1 }
 0x496   : > { %v8377_v18 = vadd.f32 %v8102_v10, %v4753_v41  ;;  %v4755_v15 = vpop.f32.mrb[141].mxu1  ;;  %v4834_v1 = vsel %vm4764_vm8, %v4798_v30, 0.0  ;;  %v5706_v41 = vmul.f32 -1.442695, %v8151_v46 }
 0x497   : > { %v4936_v52 = vsel %vm513_vm3, %v4834_v1, 0.0 }
 0x498   : > { %4937 = vadd.xlane.f32.xlu1 %v4936_v52  ;;  %v4799_v22 = vmul.f32 %v8377_v18, %v8377_v18 }
 0x499   : > { %v4758_v50 = vpop.f32.mrb[142].mxu1 }
 0x49a   : > { %v8386_v11 = vadd.f32 %v8102_v10, %v4758_v50  ;;  %v4760_v12 = vpop.f32.mrb[143].mxu1  ;;  %v4835_v19 = vsel %vm4764_vm8, %v4799_v22, 0.0  ;;  %v6455_v10 = vpop.eup %6454  ;;  %v5707_v50 = vmul.f32 -1.442695, %v8159_v53 }
 0x49b   : > { %v4939_v25 = vsel %vm513_vm3, %v4835_v19, 0.0  ;;  %v5198_v29 = vadd.f32 1.0, %v6455_v10  ;;  %v6457_v63 = vpop.eup %6456  ;;  %v5708_v10 = vmul.f32 -1.442695, %v8167_v7 }
 0x49c   : > { %4940 = vadd.xlane.f32.xlu0 %v4939_v25  ;;  %v4800_v37 = vmul.f32 %v8386_v11, %v8386_v11  ;;  %v5199_v28 = vadd.f32 1.0, %v6457_v63  ;;  %v6459_v0 = vpop.eup %6458 }
 0x49d   : > { %v5200_v15 = vadd.f32 1.0, %v6459_v0  ;;  %v6461_v1 = vpop.eup %6460 }
 0x49e   : > { %v4836_v2 = vsel %vm4764_vm8, %v4800_v37, 0.0  ;;  %v5201_v12 = vadd.f32 1.0, %v6461_v1 }
 0x49f   : > { %v4942_v20 = vsel %vm513_vm3, %v4836_v2, 0.0 }
 0x4a0   : > { %4943 = vadd.xlane.f32.xlu1 %v4942_v20 }
 0x4a1   : > { %v4839_v39 = vpop.xlane.xlu0 %4838 }
 0x4a2   : > { %v4945_v62 = vmax.f32 %v4839_v39, 1e-24 }
 0x4a4   : > { %6462 = vrsqrt.f32 %v4945_v62 }
 0x4a5   : > { %v4842_v49 = vpop.xlane.xlu0 %4841  ;;  %6464 = vpow2.f32 %v5704_v59 }
 0x4a6   : > { %v4946_v6 = vmax.f32 %v4842_v49, 1e-24  ;;  %6466 = vrcp.f32 %v5198_v29 }
 0x4a8   : > { %6468 = vrsqrt.f32 %v4946_v6 }
 0x4a9   : > { %v4845_v30 = vpop.xlane.xlu1 %4844  ;;  %6470 = vpow2.f32 %v5705_v27 }
 0x4aa   : > { %v4947_v31 = vmax.f32 %v4845_v30, 1e-24  ;;  %6472 = vrcp.f32 %v5199_v28  ;;  %v5709_v28 = vmul.f32 -1.442695, %v8175_v43 }
 0x4ac   : > { %6474 = vrsqrt.f32 %v4947_v31 }
 0x4ad   : > { %v4848_v52 = vpop.xlane.xlu1 %4847  ;;  %6476 = vpow2.f32 %v5706_v41 }
 0x4ae   : > { %v6463_v22 = vpop.eup %6462  ;;  %v4948_v45 = vmax.f32 %v4848_v52, 1e-24  ;;  %6478 = vrcp.f32 %v5200_v15 }
 0x4af   : > { %v5017_v19 = vsel %vm4764_vm8, %v6463_v22, 1.0  ;;  %v6465_v25 = vpop.eup %6464 }
 0x4b0   : > { %v5053_v37 = vmul.f32 %v5017_v19, %v8105_v8  ;;  %6480 = vrsqrt.f32 %v4948_v45  ;;  %v6467_v17 = vpop.eup %6466  ;;  %v5202_v62 = vadd.f32 1.0, %v6465_v25 }
 0x4b1   : > { %v4851_v2 = vpop.xlane.xlu0 %4850  ;;  %6482 = vpow2.f32 %v5707_v50  ;;  %v5710_v50 = vmul.f32 -1.442695, %v8183_v34 }
 0x4b2   : > { %v6469_v20 = vpop.eup %6468  ;;  %v5306_v39 = vsel %vm5089_vm9, %v6467_v17, %v5053_v37  ;;  %v4949_v59 = vmax.f32 %v4851_v2, 1e-24  ;;  %6484 = vrcp.f32 %v5201_v12 }
 0x4b3   : > { %5342 = vst.msk [vmem:[%s8408_s21] sm:$0xff] %vm513_vm3, %v5306_v39  ;;  %v5018_v29 = vsel %vm4764_vm8, %v6469_v20, 1.0  ;;  %v6471_v8 = vpop.eup %6470 }
 0x4b4   : > { %v5054_v63 = vmul.f32 %v5018_v29, %v8111_v21  ;;  %6486 = vrsqrt.f32 %v4949_v59  ;;  %v6473_v49 = vpop.eup %6472  ;;  %v5203_v41 = vadd.f32 1.0, %v6471_v8 }
 0x4b5   : > { %v4854_v27 = vpop.xlane.xlu1 %4853  ;;  %6488 = vpow2.f32 %v5708_v10  ;;  %v5711_v10 = vmul.f32 -1.442695, %v8191_v23 }
 0x4b6   : > { %v6475_v6 = vpop.eup %6474  ;;  %v5307_v0 = vsel %vm5089_vm9, %v6473_v49, %v5054_v63  ;;  %v4950_v30 = vmax.f32 %v4854_v27, 1e-24  ;;  %6490 = vrcp.f32 %v5202_v62 }
 0x4b7   : > { %5343 = vst.msk [vmem:[%s8408_s21 + $0x8] sm:$0xff] %vm513_vm3, %v5307_v0  ;;  %v5019_v31 = vsel %vm4764_vm8, %v6475_v6, 1.0  ;;  %v6477_v21 = vpop.eup %6476  ;;  %v5712_v6 = vmul.f32 -1.442695, %v8199_v13 }
 0x4b8   : > { %v5055_v15 = vmul.f32 %v5019_v31, %v8119_v35  ;;  %6492 = vrsqrt.f32 %v4950_v30  ;;  %v6479_v1 = vpop.eup %6478  ;;  %v5204_v19 = vadd.f32 1.0, %v6477_v21 }
 0x4b9   : > { %v4857_v52 = vpop.xlane.xlu0 %4856  ;;  %6494 = vpow2.f32 %v5709_v28 }
 0x4ba   : > { %v6481_v22 = vpop.eup %6480  ;;  %v5308_v45 = vsel %vm5089_vm9, %v6479_v1, %v5055_v15  ;;  %v4951_v12 = vmax.f32 %v4857_v52, 1e-24  ;;  %6496 = vrcp.f32 %v5203_v41  ;;  %v5713_v52 = vmul.f32 -1.442695, %v8207_v48 }
 0x4bb   : > { %5344 = vst.msk [vmem:[%s8408_s21 + $0x10] sm:$0xff] %vm513_vm3, %v5308_v45  ;;  %v5020_v25 = vsel %vm4764_vm8, %v6481_v22, 1.0  ;;  %v6483_v35 = vpop.eup %6482 }
 0x4bc   : > { %v5056_v37 = vmul.f32 %v5020_v25, %v8127_v38  ;;  %6498 = vrsqrt.f32 %v4951_v12  ;;  %v6485_v17 = vpop.eup %6484  ;;  %v5205_v62 = vadd.f32 1.0, %v6483_v35 }
 0x4bd   : > { %v4860_v2 = vpop.xlane.xlu1 %4859  ;;  %6500 = vpow2.f32 %v5710_v50 }
 0x4be   : > { %v6487_v20 = vpop.eup %6486  ;;  %v5309_v39 = vsel %vm5089_vm9, %v6485_v17, %v5056_v37  ;;  %v4952_v59 = vmax.f32 %v4860_v2, 1e-24  ;;  %6502 = vrcp.f32 %v5204_v19  ;;  %v5714_v17 = vmul.f32 -1.442695, %v8215_v36 }
 0x4bf   : > { %5345 = vst.msk [vmem:[%s8408_s21 + $0x18] sm:$0xff] %vm513_vm3, %v5309_v39  ;;  %v5021_v29 = vsel %vm4764_vm8, %v6487_v20, 1.0  ;;  %v6489_v38 = vpop.eup %6488 }
 0x4c0   : > { %v5057_v8 = vmul.f32 %v5021_v29, %v8135_v51  ;;  %6504 = vrsqrt.f32 %v4952_v59  ;;  %v6491_v63 = vpop.eup %6490  ;;  %v5206_v30 = vadd.f32 1.0, %v6489_v38 }
 0x4c1   : > { %v4863_v49 = vpop.xlane.xlu0 %4862  ;;  %6506 = vpow2.f32 %v5711_v10 }
 0x4c2   : > { %v6493_v27 = vpop.eup %6492  ;;  %v5310_v28 = vsel %vm5089_vm9, %v6491_v63, %v5057_v8  ;;  %v4953_v0 = vmax.f32 %v4863_v49, 1e-24  ;;  %6508 = vrcp.f32 %v5205_v62  ;;  %v5715_v8 = vmul.f32 -1.442695, %v8223_v3 }
 0x4c3   : > { %5346 = vst.msk [vmem:[%s8408_s21 + $0x20] sm:$0xff] %vm513_vm3, %v5310_v28  ;;  %v5022_v41 = vsel %vm4764_vm8, %v6493_v27, 1.0  ;;  %v6495_v51 = vpop.eup %6494 }
 0x4c4   : > { %v5058_v31 = vmul.f32 %v5022_v41, %v8143_v54  ;;  %6510 = vrsqrt.f32 %v4953_v0  ;;  %v6497_v21 = vpop.eup %6496  ;;  %v5207_v45 = vadd.f32 1.0, %v6495_v51  ;;  %v5716_v51 = vmul.f32 -1.442695, %v8231_v40 }
 0x4c5   : > { %v4866_v15 = vpop.xlane.xlu1 %4865  ;;  %6512 = vpow2.f32 %v5712_v6 }
 0x4c6   : > { %v6499_v1 = vpop.eup %6498  ;;  %v5311_v22 = vsel %vm5089_vm9, %v6497_v21, %v5058_v31  ;;  %v4954_v50 = vmax.f32 %v4866_v15, 1e-24  ;;  %6514 = vrcp.f32 %v5206_v30 }
 0x4c7   : > { %5347 = vst.msk [vmem:[%s8408_s21 + $0x28] sm:$0xff] %vm513_vm3, %v5311_v22  ;;  %v5023_v12 = vsel %vm4764_vm8, %v6499_v1, 1.0  ;;  %v6501_v54 = vpop.eup %6500 }
 0x4c8   : > { %v5059_v19 = vmul.f32 %v5023_v12, %v8151_v46  ;;  %6516 = vrsqrt.f32 %v4954_v50  ;;  %v6503_v25 = vpop.eup %6502  ;;  %v5208_v10 = vadd.f32 1.0, %v6501_v54  ;;  %v5717_v12 = vmul.f32 -1.442695, %v8239_v24 }
 0x4c9   : > { %v4869_v35 = vpop.xlane.xlu0 %4868  ;;  %6518 = vpow2.f32 %v5713_v52 }
 0x4ca   : > { %v6505_v37 = vpop.eup %6504  ;;  %v5312_v2 = vsel %vm5089_vm9, %v6503_v25, %v5059_v19  ;;  %v4955_v20 = vmax.f32 %v4869_v35, 1e-24  ;;  %6520 = vrcp.f32 %v5207_v45 }
 0x4cb   : > { %5348 = vst.msk [vmem:[%s8408_s21 + $0x30] sm:$0xff] %vm513_vm3, %v5312_v2  ;;  %v5024_v39 = vsel %vm4764_vm8, %v6505_v37, 1.0  ;;  %v6507_v46 = vpop.eup %6506 }
 0x4cc   : > { %v5060_v59 = vmul.f32 %v5024_v39, %v8159_v53  ;;  %6522 = vrsqrt.f32 %v4955_v20  ;;  %v6509_v62 = vpop.eup %6508  ;;  %v5209_v27 = vadd.f32 1.0, %v6507_v46 }
 0x4cd   : > { %v4872_v29 = vpop.xlane.xlu1 %4871  ;;  %6524 = vpow2.f32 %v5714_v17 }
 0x4ce   : > { %v6511_v38 = vpop.eup %6510  ;;  %v5313_v63 = vsel %vm5089_vm9, %v6509_v62, %v5060_v59  ;;  %v4956_v49 = vmax.f32 %v4872_v29, 1e-24  ;;  %6526 = vrcp.f32 %v5208_v10  ;;  %v5718_v10 = vmul.f32 -1.442695, %v8247_v56 }
 0x4cf   : > { %5349 = vst.msk [vmem:[%s8408_s21 + $0x38] sm:$0xff] %vm513_vm3, %v5313_v63  ;;  %v5025_v6 = vsel %vm4764_vm8, %v6511_v38, 1.0  ;;  %v6513_v53 = vpop.eup %6512 }
 0x4d0   : > { %v5061_v28 = vmul.f32 %v5025_v6, %v8167_v7  ;;  %6528 = vrsqrt.f32 %v4956_v49  ;;  %v6515_v0 = vpop.eup %6514  ;;  %v5210_v15 = vadd.f32 1.0, %v6513_v53  ;;  %v5719_v49 = vmul.f32 -1.442695, %v8255_v55 }
 0x4d1   : > { %v4875_v30 = vpop.xlane.xlu0 %4874  ;;  %6530 = vpow2.f32 %v5715_v8 }
 0x4d2   : > { %v6517_v41 = vpop.eup %6516  ;;  %v5314_v31 = vsel %vm5089_vm9, %v6515_v0, %v5061_v28  ;;  %v4957_v21 = vmax.f32 %v4875_v30, 1e-24  ;;  %6532 = vrcp.f32 %v5209_v27 }
 0x4d3   : > { %5350 = vst.msk [vmem:[%s8408_s21 + $0x40] sm:$0xff] %vm513_vm3, %v5314_v31  ;;  %v5026_v1 = vsel %vm4764_vm8, %v6517_v41, 1.0  ;;  %v6519_v7 = vpop.eup %6518  ;;  %v5720_v31 = vmul.f32 -1.442695, %v8263_v4 }
 0x4d4   : > { %v5062_v52 = vmul.f32 %v5026_v1, %v8175_v43  ;;  %6534 = vrsqrt.f32 %v4957_v21  ;;  %v6521_v22 = vpop.eup %6520  ;;  %v5211_v25 = vadd.f32 1.0, %v6519_v7 }
 0x4d5   : > { %v4878_v50 = vpop.xlane.xlu1 %4877  ;;  %6536 = vpow2.f32 %v5716_v51 }
 0x4d6   : > { %v6523_v45 = vpop.eup %6522  ;;  %v5315_v54 = vsel %vm5089_vm9, %v6521_v22, %v5062_v52  ;;  %v4958_v19 = vmax.f32 %v4878_v50, 1e-24  ;;  %6538 = vrcp.f32 %v5210_v15 }
 0x4d7   : > { %5351 = vst.msk [vmem:[%s8408_s21 + $0x48] sm:$0xff] %vm513_vm3, %v5315_v54  ;;  %v5027_v35 = vsel %vm4764_vm8, %v6523_v45, 1.0  ;;  %v6525_v43 = vpop.eup %6524 }
 0x4d8   : > { %v5063_v37 = vmul.f32 %v5027_v35, %v8183_v34  ;;  %6540 = vrsqrt.f32 %v4958_v19  ;;  %v6527_v17 = vpop.eup %6526  ;;  %v5212_v59 = vadd.f32 1.0, %v6525_v43 }
 0x4d9   : > { %v4881_v2 = vpop.xlane.xlu0 %4880  ;;  %6542 = vpow2.f32 %v5717_v12  ;;  %v5721_v12 = vmul.f32 -1.442695, %v8271_v61 }
 0x4da   : > { %v6529_v20 = vpop.eup %6528  ;;  %v5316_v39 = vsel %vm5089_vm9, %v6527_v17, %v5063_v37  ;;  %v4959_v46 = vmax.f32 %v4881_v2, 1e-24  ;;  %6544 = vrcp.f32 %v5211_v25 }
 0x4db   : > { %5352 = vst.msk [vmem:[%s8408_s21 + $0x50] sm:$0xff] %vm513_vm3, %v5316_v39  ;;  %v5028_v62 = vsel %vm4764_vm8, %v6529_v20, 1.0  ;;  %v6531_v34 = vpop.eup %6530  ;;  %v5722_v20 = vmul.f32 -1.442695, %v8279_v9 }
 0x4dc   : > { %v5064_v29 = vmul.f32 %v5028_v62, %v8191_v23  ;;  %6546 = vrsqrt.f32 %v4959_v46  ;;  %v6533_v38 = vpop.eup %6532  ;;  %v5213_v53 = vadd.f32 1.0, %v6531_v34 }
 0x4dd   : > { %v4884_v8 = vpop.xlane.xlu1 %4883  ;;  %6548 = vpow2.f32 %v5718_v10 }
 0x4de   : > { %v6535_v63 = vpop.eup %6534  ;;  %v5317_v27 = vsel %vm5089_vm9, %v6533_v38, %v5064_v29  ;;  %v4960_v6 = vmax.f32 %v4884_v8, 1e-24  ;;  %6550 = vrcp.f32 %v5212_v59  ;;  %v5723_v8 = vmul.f32 -1.442695, %v8287_v33 }
 0x4df   : > { %5353 = vst.msk [vmem:[%s8408_s21 + $0x58] sm:$0xff] %vm513_vm3, %v5317_v27  ;;  %v5029_v28 = vsel %vm4764_vm8, %v6535_v63, 1.0  ;;  %v6537_v23 = vpop.eup %6536 }
 0x4e0   : > { %v5065_v0 = vmul.f32 %v5029_v28, %v8199_v13  ;;  %6552 = vrsqrt.f32 %v4960_v6  ;;  %v6539_v30 = vpop.eup %6538  ;;  %v5214_v1 = vadd.f32 1.0, %v6537_v23 }
 0x4e1   : > { %v4887_v41 = vpop.xlane.xlu0 %4886  ;;  %6554 = vpow2.f32 %v5719_v49 }
 0x4e2   : > { %v6541_v51 = vpop.eup %6540  ;;  %v5318_v21 = vsel %vm5089_vm9, %v6539_v30, %v5065_v0  ;;  %v4961_v15 = vmax.f32 %v4887_v41, 1e-24  ;;  %6556 = vrcp.f32 %v5213_v53  ;;  %v5724_v30 = vmul.f32 -1.442695, %v8295_v60 }
 0x4e3   : > { %5354 = vst.msk [vmem:[%s8408_s21 + $0x60] sm:$0xff] %vm513_vm3, %v5318_v21  ;;  %v5030_v7 = vsel %vm4764_vm8, %v6541_v51, 1.0  ;;  %v6543_v13 = vpop.eup %6542 }
 0x4e4   : > { %v5066_v52 = vmul.f32 %v5030_v7, %v8207_v48  ;;  %6558 = vrsqrt.f32 %v4961_v15  ;;  %v6545_v22 = vpop.eup %6544  ;;  %v5215_v25 = vadd.f32 1.0, %v6543_v13 }
 0x4e5   : > { %v4890_v50 = vpop.xlane.xlu1 %4889  ;;  %6560 = vpow2.f32 %v5720_v31 }
 0x4e6   : > { %v6547_v45 = vpop.eup %6546  ;;  %v5319_v54 = vsel %vm5089_vm9, %v6545_v22, %v5066_v52  ;;  %v4962_v19 = vmax.f32 %v4890_v50, 1e-24  ;;  %6562 = vrcp.f32 %v5214_v1  ;;  %v5725_v52 = vmul.f32 -1.442695, %v8303_v57 }
 0x4e7   : > { %5355 = vst.msk [vmem:[%s8408_s21 + $0x68] sm:$0xff] %vm513_vm3, %v5319_v54  ;;  %v5031_v35 = vsel %vm4764_vm8, %v6547_v45, 1.0  ;;  %v6549_v48 = vpop.eup %6548 }
 0x4e8   : > { %v5067_v43 = vmul.f32 %v5031_v35, %v8215_v36  ;;  %6564 = vrsqrt.f32 %v4962_v19  ;;  %v6551_v37 = vpop.eup %6550  ;;  %v5216_v46 = vadd.f32 1.0, %v6549_v48  ;;  %v5726_v48 = vmul.f32 -1.442695, %v8311_v5 }
 0x4e9   : > { %v4893_v17 = vpop.xlane.xlu0 %4892  ;;  %6566 = vpow2.f32 %v5721_v12 }
 0x4ea   : > { %v6553_v2 = vpop.eup %6552  ;;  %v5320_v10 = vsel %vm5089_vm9, %v6551_v37, %v5067_v43  ;;  %v4963_v39 = vmax.f32 %v4893_v17, 1e-24  ;;  %6568 = vrcp.f32 %v5215_v25 }
 0x4eb   : > { %5356 = vst.msk [vmem:[%s8408_s21 + $0x70] sm:$0xff] %vm513_vm3, %v5320_v10  ;;  %v5032_v59 = vsel %vm4764_vm8, %v6553_v2, 1.0  ;;  %v6555_v36 = vpop.eup %6554 }
 0x4ec   : > { %v5068_v62 = vmul.f32 %v5032_v59, %v8223_v3  ;;  %6570 = vrsqrt.f32 %v4963_v39  ;;  %v6557_v34 = vpop.eup %6556  ;;  %v5217_v27 = vadd.f32 1.0, %v6555_v36  ;;  %v5727_v59 = vmul.f32 -1.442695, %v8319_v16 }
 0x4ed   : > { %v4896_v29 = vpop.xlane.xlu1 %4895  ;;  %6572 = vpow2.f32 %v5722_v20 }
 0x4ee   : > { %v6559_v38 = vpop.eup %6558  ;;  %v5321_v63 = vsel %vm5089_vm9, %v6557_v34, %v5068_v62  ;;  %v4964_v49 = vmax.f32 %v4896_v29, 1e-24  ;;  %6574 = vrcp.f32 %v5216_v46 }
 0x4ef   : > { %5357 = vst.msk [vmem:[%s8408_s21 + $0x78] sm:$0xff] %vm513_vm3, %v5321_v63  ;;  %v5033_v6 = vsel %vm4764_vm8, %v6559_v38, 1.0  ;;  %v6561_v3 = vpop.eup %6560 }
 0x4f0   : > { %v5069_v53 = vmul.f32 %v5033_v6, %v8231_v40  ;;  %6576 = vrsqrt.f32 %v4964_v49  ;;  %v6563_v28 = vpop.eup %6562  ;;  %v5218_v31 = vadd.f32 1.0, %v6561_v3 }
 0x4f1   : > { %v4899_v23 = vpop.xlane.xlu0 %4898  ;;  %6578 = vpow2.f32 %v5723_v8 }
 0x4f2   : > { %v6565_v0 = vpop.eup %6564  ;;  %v5322_v41 = vsel %vm5089_vm9, %v6563_v28, %v5069_v53  ;;  %v4965_v51 = vmax.f32 %v4899_v23, 1e-24  ;;  %6580 = vrcp.f32 %v5217_v27  ;;  %v5728_v27 = vmul.f32 -1.442695, %v8327_v26 }
 0x4f3   : > { %5358 = vst.msk [vmem:[%s8408_s21 + $0x80] sm:$0xff] %vm513_vm3, %v5322_v41  ;;  %v5034_v21 = vsel %vm4764_vm8, %v6565_v0, 1.0  ;;  %v6567_v40 = vpop.eup %6566 }
 0x4f4   : > { %v5070_v15 = vmul.f32 %v5034_v21, %v8239_v24  ;;  %6582 = vrsqrt.f32 %v4965_v51  ;;  %v6569_v1 = vpop.eup %6568  ;;  %v5219_v45 = vadd.f32 1.0, %v6567_v40  ;;  %v5729_v51 = vmul.f32 -1.442695, %v8335_v44 }
 0x4f5   : > { %v4902_v7 = vpop.xlane.xlu1 %4901  ;;  %6584 = vpow2.f32 %v5724_v30 }
 0x4f6   : > { %v6571_v13 = vpop.eup %6570  ;;  %v5323_v22 = vsel %vm5089_vm9, %v6569_v1, %v5070_v15  ;;  %v4966_v50 = vmax.f32 %v4902_v7, 1e-24  ;;  %6586 = vrcp.f32 %v5218_v31 }
 0x4f7   : > { %5359 = vst.msk [vmem:[%s8408_s21 + $0x88] sm:$0xff] %vm513_vm3, %v5323_v22  ;;  %v5035_v12 = vsel %vm4764_vm8, %v6571_v13, 1.0  ;;  %v6573_v24 = vpop.eup %6572  ;;  %v5730_v22 = vmul.f32 -1.442695, %v8343_v14 }
 0x4f8   : > { %v5071_v54 = vmul.f32 %v5035_v12, %v8247_v56  ;;  %6588 = vrsqrt.f32 %v4966_v50  ;;  %v6575_v19 = vpop.eup %6574  ;;  %v5220_v17 = vadd.f32 1.0, %v6573_v24 }
 0x4f9   : > { %v4905_v25 = vpop.xlane.xlu0 %4904  ;;  %6590 = vpow2.f32 %v5725_v52 }
 0x4fa   : > { %v6577_v35 = vpop.eup %6576  ;;  %v5324_v43 = vsel %vm5089_vm9, %v6575_v19, %v5071_v54  ;;  %v4967_v37 = vmax.f32 %v4905_v25, 1e-24  ;;  %6592 = vrcp.f32 %v5219_v45 }
 0x4fb   : > { %5360 = vst.msk [vmem:[%s8408_s21 + $0x90] sm:$0xff] %vm513_vm3, %v5324_v43  ;;  %v5036_v2 = vsel %vm4764_vm8, %v6577_v35, 1.0  ;;  %v6579_v56 = vpop.eup %6578 }
 0x4fc   : > { %v5072_v20 = vmul.f32 %v5036_v2, %v8255_v55  ;;  %6594 = vrsqrt.f32 %v4967_v37  ;;  %v6581_v10 = vpop.eup %6580  ;;  %v5221_v34 = vadd.f32 1.0, %v6579_v56 }
 0x4fd   : > { %v4908_v39 = vpop.xlane.xlu1 %4907  ;;  %6596 = vpow2.f32 %v5726_v48  ;;  %v5731_v48 = vmul.f32 -1.442695, %v8351_v32 }
 0x4fe   : > { %v6583_v46 = vpop.eup %6582  ;;  %v5325_v36 = vsel %vm5089_vm9, %v6581_v10, %v5072_v20  ;;  %v4968_v62 = vmax.f32 %v4908_v39, 1e-24  ;;  %6598 = vrcp.f32 %v5220_v17 }
 0x4ff   : > { %5361 = vst.msk [vmem:[%s8408_s21 + $0x98] sm:$0xff] %vm513_vm3, %v5325_v36  ;;  %v5037_v29 = vsel %vm4764_vm8, %v6583_v46, 1.0  ;;  %v6585_v55 = vpop.eup %6584  ;;  %v5732_v46 = vmul.f32 -1.442695, %v8359_v58 }
 0x500   : > { %v5073_v38 = vmul.f32 %v5037_v29, %v8263_v4  ;;  %6600 = vrsqrt.f32 %v4968_v62  ;;  %v6587_v8 = vpop.eup %6586  ;;  %v5222_v53 = vadd.f32 1.0, %v6585_v55 }
 0x501   : > { %v4911_v63 = vpop.xlane.xlu0 %4910  ;;  %6602 = vpow2.f32 %v5727_v59 }
 0x502   : > { %v6589_v49 = vpop.eup %6588  ;;  %v5326_v6 = vsel %vm5089_vm9, %v6587_v8, %v5073_v38  ;;  %v4969_v3 = vmax.f32 %v4911_v63, 1e-24  ;;  %6604 = vrcp.f32 %v5221_v34  ;;  %v5733_v63 = vmul.f32 -1.442695, %v8368_v42 }
 0x503   : > { %5362 = vst.msk [vmem:[%s8408_s21 + $0xa0] sm:$0xff] %vm513_vm3, %v5326_v6  ;;  %v5038_v28 = vsel %vm4764_vm8, %v6589_v49, 1.0  ;;  %v6591_v4 = vpop.eup %6590 }
 0x504   : > { %v5074_v23 = vmul.f32 %v5038_v28, %v8271_v61  ;;  %6606 = vrsqrt.f32 %v4969_v3  ;;  %v6593_v0 = vpop.eup %6592  ;;  %v5223_v40 = vadd.f32 1.0, %v6591_v4 }
 0x505   : > { %v4914_v30 = vpop.xlane.xlu1 %4913  ;;  %6608 = vpow2.f32 %v5728_v27 }
 0x506   : > { %v6595_v41 = vpop.eup %6594  ;;  %v5327_v31 = vsel %vm5089_vm9, %v6593_v0, %v5074_v23  ;;  %v4970_v21 = vmax.f32 %v4914_v30, 1e-24  ;;  %6610 = vrcp.f32 %v5222_v53  ;;  %v5734_v0 = vmul.f32 -1.442695, %v8377_v18 }
 0x507   : > { %5363 = vst.msk [vmem:[%s8408_s21 + $0xa8] sm:$0xff] %vm513_vm3, %v5327_v31  ;;  %v5039_v15 = vsel %vm4764_vm8, %v6595_v41, 1.0  ;;  %v6597_v61 = vpop.eup %6596 }
 0x508   : > { %v5075_v1 = vmul.f32 %v5039_v15, %v8279_v9  ;;  %6612 = vrsqrt.f32 %v4970_v21  ;;  %v6599_v7 = vpop.eup %6598  ;;  %v5224_v12 = vadd.f32 1.0, %v6597_v61 }
 0x509   : > { %v4917_v13 = vpop.xlane.xlu0 %4916  ;;  %6614 = vpow2.f32 %v5729_v51 }
 0x50a   : > { %v6601_v52 = vpop.eup %6600  ;;  %v5328_v50 = vsel %vm5089_vm9, %v6599_v7, %v5075_v1  ;;  %v4971_v45 = vmax.f32 %v4917_v13, 1e-24  ;;  %6616 = vrcp.f32 %v5223_v40  ;;  %v5735_v1 = vmul.f32 -1.442695, %v8386_v11 }
 0x50b   : > { %5364 = vst.msk [vmem:[%s8408_s21 + $0xb0] sm:$0xff] %vm513_vm3, %v5328_v50  ;;  %v5040_v24 = vsel %vm4764_vm8, %v6601_v52, 1.0  ;;  %v6603_v9 = vpop.eup %6602 }
 0x50c   : > { %v5076_v54 = vmul.f32 %v5040_v24, %v8287_v33  ;;  %6618 = vrsqrt.f32 %v4971_v45  ;;  %v6605_v19 = vpop.eup %6604  ;;  %v5225_v17 = vadd.f32 1.0, %v6603_v9 }
 0x50d   : > { %v4920_v25 = vpop.xlane.xlu1 %4919  ;;  %6620 = vpow2.f32 %v5730_v22 }
 0x50e   : > { %v6607_v35 = vpop.eup %6606  ;;  %v5329_v43 = vsel %vm5089_vm9, %v6605_v19, %v5076_v54  ;;  %v4972_v37 = vmax.f32 %v4920_v25, 1e-24  ;;  %6622 = vrcp.f32 %v5224_v12 }
 0x50f   : > { %5365 = vst.msk [vmem:[%s8408_s21 + $0xb8] sm:$0xff] %vm513_vm3, %v5329_v43  ;;  %v5041_v2 = vsel %vm4764_vm8, %v6607_v35, 1.0  ;;  %v6609_v33 = vpop.eup %6608 }
 0x510   : > { %v5077_v56 = vmul.f32 %v5041_v2, %v8295_v60  ;;  %6624 = vrsqrt.f32 %v4972_v37  ;;  %v6611_v20 = vpop.eup %6610  ;;  %v5226_v62 = vadd.f32 1.0, %v6609_v33 }
 0x511   : > { %v4923_v10 = vpop.xlane.xlu0 %4922  ;;  %6626 = vpow2.f32 %v5731_v48 }
 0x512   : > { %v6613_v39 = vpop.eup %6612  ;;  %v5330_v59 = vsel %vm5089_vm9, %v6611_v20, %v5077_v56  ;;  %v4973_v36 = vmax.f32 %v4923_v10, 1e-24  ;;  %6628 = vrcp.f32 %v5225_v17 }
 0x513   : > { %5366 = vst.msk [vmem:[%s8408_s21 + $0xc0] sm:$0xff] %vm513_vm3, %v5330_v59  ;;  %v5042_v34 = vsel %vm4764_vm8, %v6613_v39, 1.0  ;;  %v6615_v60 = vpop.eup %6614 }
 0x514   : > { %v5078_v29 = vmul.f32 %v5042_v34, %v8303_v57  ;;  %6630 = vrsqrt.f32 %v4973_v36  ;;  %v6617_v55 = vpop.eup %6616  ;;  %v5227_v6 = vadd.f32 1.0, %v6615_v60 }
 0x515   : > { %v4926_v38 = vpop.xlane.xlu1 %4925  ;;  %6632 = vpow2.f32 %v5732_v46 }
 0x516   : > { %v6619_v8 = vpop.eup %6618  ;;  %v5331_v49 = vsel %vm5089_vm9, %v6617_v55, %v5078_v29  ;;  %v4974_v27 = vmax.f32 %v4926_v38, 1e-24  ;;  %6634 = vrcp.f32 %v5226_v62 }
 0x517   : > { %5367 = vst.msk [vmem:[%s8408_s21 + $0xc8] sm:$0xff] %vm513_vm3, %v5331_v49  ;;  %v5043_v3 = vsel %vm4764_vm8, %v6619_v8, 1.0  ;;  %v6621_v57 = vpop.eup %6620 }
 0x518   : > { %v5079_v53 = vmul.f32 %v5043_v3, %v8311_v5  ;;  %6636 = vrsqrt.f32 %v4974_v27  ;;  %v6623_v28 = vpop.eup %6622  ;;  %v5228_v51 = vadd.f32 1.0, %v6621_v57 }
 0x519   : > { %v4929_v4 = vpop.xlane.xlu0 %4928  ;;  %6638 = vpow2.f32 %v5733_v63 }
 0x51a   : > { %v6625_v23 = vpop.eup %6624  ;;  %v5332_v30 = vsel %vm5089_vm9, %v6623_v28, %v5079_v53  ;;  %v4975_v41 = vmax.f32 %v4929_v4, 1e-24  ;;  %6640 = vrcp.f32 %v5227_v6 }
 0x51b   : > { %5368 = vst.msk [vmem:[%s8408_s21 + $0xd0] sm:$0xff] %vm513_vm3, %v5332_v30  ;;  %v5044_v31 = vsel %vm4764_vm8, %v6625_v23, 1.0  ;;  %v6627_v5 = vpop.eup %6626 }
 0x51c   : > { %v5080_v21 = vmul.f32 %v5044_v31, %v8319_v16  ;;  %6642 = vrsqrt.f32 %v4975_v41  ;;  %v6629_v40 = vpop.eup %6628  ;;  %v5229_v52 = vadd.f32 1.0, %v6627_v5 }
 0x51d   : > { %v4932_v15 = vpop.xlane.xlu1 %4931  ;;  %6644 = vpow2.f32 %v5734_v0 }
 0x51e   : > { %v6631_v61 = vpop.eup %6630  ;;  %v5333_v7 = vsel %vm5089_vm9, %v6629_v40, %v5080_v21  ;;  %v4976_v13 = vmax.f32 %v4932_v15, 1e-24  ;;  %6646 = vrcp.f32 %v5228_v51 }
 0x51f   : > { %5369 = vst.msk [vmem:[%s8408_s21 + $0xd8] sm:$0xff] %vm513_vm3, %v5333_v7  ;;  %v5045_v22 = vsel %vm4764_vm8, %v6631_v61, 1.0  ;;  %v6633_v16 = vpop.eup %6632 }
 0x520   : > { %v5081_v50 = vmul.f32 %v5045_v22, %v8327_v26  ;;  %6648 = vrsqrt.f32 %v4976_v13  ;;  %v6635_v45 = vpop.eup %6634  ;;  %v5230_v19 = vadd.f32 1.0, %v6633_v16 }
 0x521   : > { %v4935_v12 = vpop.xlane.xlu0 %4934  ;;  %6650 = vpow2.f32 %v5735_v1 }
 0x522   : > { %v6637_v24 = vpop.eup %6636  ;;  %v5334_v9 = vsel %vm5089_vm9, %v6635_v45, %v5081_v50  ;;  %v4977_v54 = vmax.f32 %v4935_v12, 1e-24  ;;  %6652 = vrcp.f32 %v5229_v52 }
 0x523   : > { %5370 = vst.msk [vmem:[%s8408_s21 + $0xe0] sm:$0xff] %vm513_vm3, %v5334_v9  ;;  %v5046_v25 = vsel %vm4764_vm8, %v6637_v24, 1.0  ;;  %v6639_v35 = vpop.eup %6638 }
 0x524   : > { %v5082_v26 = vmul.f32 %v5046_v25, %v8335_v44  ;;  %6654 = vrsqrt.f32 %v4977_v54  ;;  %v6641_v48 = vpop.eup %6640  ;;  %v5231_v33 = vadd.f32 1.0, %v6639_v35 }
 0x525   : > { %v4938_v43 = vpop.xlane.xlu1 %4937  ;;  %6656 = vrcp.f32 %v5230_v19 }
 0x526   : > { %v6643_v37 = vpop.eup %6642  ;;  %v5335_v17 = vsel %vm5089_vm9, %v6641_v48, %v5082_v26  ;;  %v4978_v2 = vmax.f32 %v4938_v43, 1e-24 }
 0x527   : > { %5371 = vst.msk [vmem:[%s8408_s21 + $0xe8] sm:$0xff] %vm513_vm3, %v5335_v17  ;;  %v5047_v56 = vsel %vm4764_vm8, %v6643_v37, 1.0  ;;  %v6645_v20 = vpop.eup %6644 }
 0x528   : > { %v5083_v10 = vmul.f32 %v5047_v56, %v8343_v14  ;;  %6658 = vrsqrt.f32 %v4978_v2  ;;  %v6647_v44 = vpop.eup %6646  ;;  %v5232_v62 = vadd.f32 1.0, %v6645_v20 }
 0x529   : > { %v4941_v39 = vpop.xlane.xlu0 %4940  ;;  %6660 = vrcp.f32 %v5231_v33 }
 0x52a   : > { %v6649_v46 = vpop.eup %6648  ;;  %v5336_v59 = vsel %vm5089_vm9, %v6647_v44, %v5083_v10  ;;  %v4979_v36 = vmax.f32 %v4941_v39, 1e-24 }
 0x52b   : > { %5372 = vst.msk [vmem:[%s8408_s21 + $0xf0] sm:$0xff] %vm513_vm3, %v5336_v59  ;;  %v5048_v34 = vsel %vm4764_vm8, %v6649_v46, 1.0  ;;  %v6651_v60 = vpop.eup %6650 }
 0x52c   : > { %v5084_v29 = vmul.f32 %v5048_v34, %v8351_v32  ;;  %6662 = vrsqrt.f32 %v4979_v36  ;;  %v6653_v14 = vpop.eup %6652  ;;  %v5233_v49 = vadd.f32 1.0, %v6651_v60 }
 0x52d   : > { %v4944_v55 = vpop.xlane.xlu1 %4943  ;;  %6664 = vrcp.f32 %v5232_v62 }
 0x52e   : > { %v6655_v38 = vpop.eup %6654  ;;  %v5337_v8 = vsel %vm5089_vm9, %v6653_v14, %v5084_v29  ;;  %v4980_v63 = vmax.f32 %v4944_v55, 1e-24 }
 0x52f   : > { %5373 = vst.msk [vmem:[%s8408_s21 + $0xf8] sm:$0xff] %vm513_vm3, %v5337_v8  ;;  %v5049_v27 = vsel %vm4764_vm8, %v6655_v38, 1.0  ;;  %v6657_v32 = vpop.eup %6656 }
 0x530   : > { %v5085_v6 = vmul.f32 %v5049_v27, %v8359_v58  ;;  %6666 = vrsqrt.f32 %v4980_v63 }
 0x531   : > { %6668 = vrcp.f32 %v5233_v49 }
 0x532   : > { %v6659_v3 = vpop.eup %6658  ;;  %v5338_v57 = vsel %vm5089_vm9, %v6657_v32, %v5085_v6 }
 0x533   : > { %5374 = vst.msk [vmem:[%s8408_s21 + $0x100] sm:$0xff] %vm513_vm3, %v5338_v57  ;;  %v5050_v53 = vsel %vm4764_vm8, %v6659_v3, 1.0  ;;  %v6661_v4 = vpop.eup %6660 }
 0x534   : > { %v5086_v28 = vmul.f32 %v5050_v53, %v8368_v42 }
 0x536   : > { %v6663_v23 = vpop.eup %6662  ;;  %v5339_v58 = vsel %vm5089_vm9, %v6661_v4, %v5086_v28 }
 0x537   : > { %5375 = vst.msk [vmem:[%s8408_s21 + $0x108] sm:$0xff] %vm513_vm3, %v5339_v58  ;;  %v5051_v0 = vsel %vm4764_vm8, %v6663_v23, 1.0  ;;  %v6665_v41 = vpop.eup %6664 }
 0x538   : > { %v5087_v30 = vmul.f32 %v5051_v0, %v8377_v18 }
 0x53a   : > { %v6667_v51 = vpop.eup %6666  ;;  %v5340_v31 = vsel %vm5089_vm9, %v6665_v41, %v5087_v30 }
 0x53b   : > { %5376 = vst.msk [vmem:[%s8408_s21 + $0x110] sm:$0xff] %vm513_vm3, %v5340_v31  ;;  %v5052_v42 = vsel %vm4764_vm8, %v6667_v51, 1.0  ;;  %v6669_v21 = vpop.eup %6668 }
 0x53c   : > { %v5088_v5 = vmul.f32 %v5052_v42, %v8386_v11 }
 0x53e   : > { %v5341_v40 = vsel %vm5089_vm9, %v6669_v21, %v5088_v5 }
 0x53f   : > { %5377 = vst.msk [vmem:[%s8408_s21 + $0x118] sm:$0xff] %vm513_vm3, %v5341_v40 }
 0x540 PF: > { %s15_s18 = sadd.s32 1, %s6698_s18  }
 0x541   : > { %p12_p4 = scmp.ge.s32.totalorder %s15_s18, 4  }
 0x543   :  { %14 = sbr.rel (!%p12_p4) target bundleno = 1 (0x1), region = 78 }

</bundles_post_ra>
